<compile_context>
chip_gen: v6e
topology: v6e:2x2x1
jax: 0.10.0
libtpu: 0.0.40
codegen_flags: <defaults>
</compile_context>

<pallas_src>
import functools
import math

import jax
import jax.numpy as jnp
from jax.experimental import pallas as pl
from jax.experimental.pallas import tpu as pltpu


# ----------------------------------------------------------------------------
# tile-size helpers
# ----------------------------------------------------------------------------
def _pick_lane_tile(n, target=256):
    """Largest multiple-of-128 tile dividing n (or n itself if n <= target)."""
    if n <= target:
        return n
    t = (target // 128) * 128
    while t >= 128:
        if n % t == 0:
            return t
        t -= 128
    return n


def _pick_row_tile(n, target=512):
    """Largest multiple-of-8 tile dividing n (or n itself if n <= target)."""
    if n <= target:
        return n
    t = (target // 8) * 8
    while t >= 8:
        if n % t == 0:
            return t
        t -= 8
    return n


# ----------------------------------------------------------------------------
# Pallas kernels
# ----------------------------------------------------------------------------
def _conv3x3_kernel(x_ref, w_ref, b_ref, o_ref, *, relu, wp, n_out):
    # x_ref: (1, Np8, Cin)  bf16 zero-padded image, flat (H+2)*Wp row layout
    # w_ref: (9, Cin, Cout) bf16, tap index kk = 3*ky + kx (VMEM-resident)
    # b_ref: (1, Cout)      f32
    # o_ref: (1, n_out, Cout) bf16, padded-width (H*Wp) row layout
    v = x_ref[0]                       # (Np8, Cin) bf16
    rows = v.shape[0]
    acc = None
    for ky in range(3):
        for kx in range(3):
            off = ky * wp + kx
            z = jnp.dot(v, w_ref[3 * ky + kx],
                        preferred_element_type=jnp.float32)   # (Np8, Cout) f32
            if off:
                # output row q needs z[q + off]; roll by (rows - off) == roll by -off.
                # Wrapped / zero-pad rows only land in the 2 discarded padded-width
                # columns (x = W, W+1) of the output layout.
                z = pltpu.roll(z, shift=rows - off, axis=0)
            z = z[:n_out]
            acc = z if acc is None else acc + z
    acc = acc + b_ref[...]
    if relu:
        acc = jnp.maximum(acc, 0.0)
    o_ref[0] = acc.astype(o_ref.dtype)


def conv3x3(x, w9, b, relu=True, shift=None):
    """3x3 conv, padding=1 (NHWC) with optional fused per-(batch,channel) FiLM shift.

    x: (B,H,W,Cin) f32/bf16; w9: (9, Cin, Cout) bf16 (tap kk=3*ky+kx);
    b: (1, Cout) f32.  Returns (B,H,W,Cout) bf16.
    """
    B, H, W, Cin = x.shape
    Cout = w9.shape[-1]
    Wp = W + 2
    Np = (H + 2) * Wp
    Np8 = ((Np + 7) // 8) * 8
    HWp = H * Wp

    if shift is not None:
        x = x.astype(jnp.float32) + shift[:, None, None, :]   # fuses into the pad/cast
    xp = jnp.pad(x.astype(jnp.bfloat16), ((0, 0), (1, 1), (1, 1), (0, 0)))
    v = xp.reshape(B, Np, Cin)
    if Np8 != Np:
        v = jnp.pad(v, ((0, 0), (0, Np8 - Np), (0, 0)))

    flops = 2 * B * Np * 9 * Cin * Cout
    bytes_accessed = (B * Np8 * Cin * 2 + 9 * Cin * Cout * 2 + Cout * 4
                      + B * HWp * Cout * 2)

    out = pl.pallas_call(
        functools.partial(_conv3x3_kernel, relu=relu, wp=Wp, n_out=HWp),
        out_shape=jax.ShapeDtypeStruct((B, HWp, Cout), jnp.bfloat16),
        grid=(B,),
        in_specs=[
            pl.BlockSpec((1, Np8, Cin), lambda bb: (bb, 0, 0)),
            pl.BlockSpec((9, Cin, Cout), lambda bb: (0, 0, 0)),   # weight stays resident
            pl.BlockSpec((1, Cout), lambda bb: (0, 0)),
        ],
        out_specs=pl.BlockSpec((1, HWp, Cout), lambda bb: (bb, 0, 0)),
        compiler_params=pltpu.CompilerParams(
            dimension_semantics=("parallel",)),
        cost_estimate=pl.CostEstimate(flops=flops, transcendentals=0,
                                      bytes_accessed=bytes_accessed),
    )(v, w9, b)
    # drop the 2 garbage columns of the padded-width row layout
    return out.reshape(B, H, Wp, Cout)[:, :, :W, :]


def _matmul_bias_kernel(x_ref, w_ref, b_ref, o_ref):
    acc = jnp.dot(x_ref[...], w_ref[...], preferred_element_type=jnp.float32)
    acc = acc + b_ref[...]
    o_ref[...] = acc.astype(o_ref.dtype)


def matmul_bias(x, w, b):
    """(N,K) @ (K,M) + b with bf16 operands / f32 accumulation, bf16 output."""
    N, K = x.shape
    M = w.shape[-1]
    TN = _pick_row_tile(N, 512)
    TM = _pick_lane_tile(M, 256)
    return pl.pallas_call(
        _matmul_bias_kernel,
        out_shape=jax.ShapeDtypeStruct((N, M), jnp.bfloat16),
        grid=(N // TN, M // TM),
        in_specs=[
            pl.BlockSpec((TN, K), lambda i, j: (i, 0)),
            pl.BlockSpec((K, TM), lambda i, j: (0, j)),
            pl.BlockSpec((1, TM), lambda i, j: (0, j)),
        ],
        out_specs=pl.BlockSpec((TN, TM), lambda i, j: (i, j)),
        compiler_params=pltpu.CompilerParams(
            dimension_semantics=("parallel", "parallel")),
    )(x.astype(jnp.bfloat16), w, b)


# ----------------------------------------------------------------------------
# glue layers (plain XLA, intentionally tiny / fuse with neighbours)
# ----------------------------------------------------------------------------
def conv_transpose_2x2(x, w, b4):
    """nn.ConvTranspose2d(Cin, Cout, 2, stride=2) as a per-pixel matmul + interleave."""
    B, H, W, Cin = x.shape
    Cout = w.shape[-1] // 4
    y = matmul_bias(x.reshape(B * H * W, Cin), w, b4)   # (BHW, 4*Cout), cols (dy,dx,co)
    y = y.reshape(B, H, W, 2, 2, Cout).transpose(0, 1, 3, 2, 4, 5)
    # TODO(synk): replace this 6-D transpose with strided stores in a Pallas epilogue.
    return y.reshape(B, 2 * H, 2 * W, Cout)


def avgpool2(x):
    B, H, W, C = x.shape
    x = x.astype(jnp.float32)
    return x.reshape(B, H // 2, 2, W // 2, 2, C).mean(axis=(2, 4))


def gelu(x):
    return jax.nn.gelu(x, approximate=False)   # matches nn.GELU() (erf form)


def linear(x, w, b):
    # tiny matmuls kept in plain XLA (below Pallas launch overhead)
    return x @ w + b


def sinusoidal_pos_emb(t, dim=32):
    half = dim // 2
    freqs = jnp.exp(jnp.arange(half, dtype=jnp.float32)
                    * (-math.log(10000.0) / (half - 1)))
    emb = t.astype(jnp.float32)[:, None] * freqs[None, :]
    return jnp.concatenate([jnp.sin(emb), jnp.cos(emb)], axis=-1)


# ----------------------------------------------------------------------------
# parameter initialization (deterministic, synthetic)
# ----------------------------------------------------------------------------
class _KeyGen:
    def __init__(self, seed):
        self._key = jax.random.PRNGKey(seed)

    def __call__(self):
        self._key, k = jax.random.split(self._key)
        return k


def _init_conv3x3(kg, cin, cout):
    scale = 1.0 / math.sqrt(cin * 9)
    w = jax.random.uniform(kg(), (3, 3, cin, cout), jnp.float32, -scale, scale)
    b = jax.random.uniform(kg(), (1, cout), jnp.float32, -scale, scale)
    # (ky,kx,ci,co) -> (9, Cin, Cout), tap index kk = 3*ky + kx; bf16 for the MXU
    return w.reshape(9, cin, cout).astype(jnp.bfloat16), b


def _init_convT(kg, cin, cout):
    scale = 1.0 / math.sqrt(cin * 4)
    w = jax.random.uniform(kg(), (cin, 4 * cout), jnp.float32, -scale, scale)
    b = jax.random.uniform(kg(), (1, cout), jnp.float32, -scale, scale)
    # TODO(synk): importing real PyTorch ConvTranspose2d weights requires matching
    #             this (dy,dx,co) column ordering exactly.
    return w.astype(jnp.bfloat16), jnp.tile(b, (1, 4))


def _init_linear(kg, din, dout):
    scale = 1.0 / math.sqrt(din)
    w = jax.random.uniform(kg(), (din, dout), jnp.float32, -scale, scale)
    b = jax.random.uniform(kg(), (dout,), jnp.float32, -scale, scale)
    return w, b


def _init_adjust(kg, oc, mid=32):
    return {
        'c1': _init_conv3x3(kg, 2, mid),
        'c2': _init_conv3x3(kg, mid, 2 * mid),
        'c3': _init_conv3x3(kg, 2 * mid, 4 * mid),
        # final 1x1 conv == linear; commutes exactly with the global average pool
        'c4': _init_linear(kg, 4 * mid, 2 * oc),
    }


def init_params(in_ch=3, out_ch=1, seed=0):
    kg = _KeyGen(seed)
    p = {}
    p['tm1'] = _init_linear(kg, 32, 128)
    p['tm2'] = _init_linear(kg, 128, 32)
    p['inc1'] = _init_conv3x3(kg, in_ch, 64)
    p['inc2'] = _init_conv3x3(kg, 64, 64)
    p['mlp1'] = _init_linear(kg, 32, 64)
    p['adj1'] = _init_adjust(kg, 64)
    p['conv1'] = [_init_conv3x3(kg, 64, 128),
                  _init_conv3x3(kg, 128, 128),
                  _init_conv3x3(kg, 128, 128)]
    p['mlp2'] = _init_linear(kg, 32, 128)
    p['adj2'] = _init_adjust(kg, 128)
    p['conv2'] = [_init_conv3x3(kg, 128, 256)] + \
                 [_init_conv3x3(kg, 256, 256) for _ in range(5)]
    p['up1'] = _init_convT(kg, 256, 128)
    p['mlp3'] = _init_linear(kg, 32, 128)
    p['adj3'] = _init_adjust(kg, 128)
    p['conv3'] = [_init_conv3x3(kg, 128, 128) for _ in range(3)]
    p['up2'] = _init_convT(kg, 128, 64)
    p['mlp4'] = _init_linear(kg, 32, 64)
    p['adj4'] = _init_adjust(kg, 64)
    p['conv4'] = [_init_conv3x3(kg, 64, 64) for _ in range(2)]
    p['outc'] = _init_linear(kg, 64, out_ch)
    return p


# ----------------------------------------------------------------------------
# module forward passes
# ----------------------------------------------------------------------------
def adjust_forward(xa, pa):
    h = conv3x3(xa, *pa['c1'], relu=True)
    h = avgpool2(h)
    h = conv3x3(h, *pa['c2'], relu=True)
    h = avgpool2(h)
    h = conv3x3(h, *pa['c3'], relu=True)
    # AvgPool2d(2) -> 1x1 conv -> adaptive_avg_pool2d(1,1)  ==  global mean then
    # linear (exact: both pools are uniform averages, the 1x1 conv is linear).
    pooled = h.astype(jnp.float32).mean(axis=(1, 2))
    o = linear(pooled, *pa['c4'])
    oc = o.shape[1] // 2
    return o[:, :oc], o[:, oc:]


def unet_forward(p, x, t, x_adjust, adjust=True):
    inx = conv3x3(x, *p['inc1'], relu=True)
    inx = conv3x3(inx, *p['inc2'], relu=True)

    temb = sinusoidal_pos_emb(t, 32)
    temb = linear(temb, *p['tm1'])
    temb = gelu(temb)
    temb = linear(temb, *p['tm2'])

    def film_shift(mlp_p, adj_p):
        cond = linear(gelu(temb), *mlp_p)                 # (B, C)
        if adjust:
            g, be = adjust_forward(x_adjust, adj_p)
            return g * cond + be                          # per-(batch,channel) shift
        return cond

    def conv_block(feat, blocks, shift):
        # FiLM shift fused into the first conv's pad/cast producer (no extra pass)
        h = conv3x3(feat, *blocks[0], relu=True, shift=shift)
        for wb in blocks[1:]:
            h = conv3x3(h, *wb, relu=True)
        return h

    down1 = avgpool2(inx)
    conv1 = conv_block(down1, p['conv1'], film_shift(p['mlp1'], p['adj1']))

    down2 = avgpool2(conv1)
    conv2 = conv_block(down2, p['conv2'], film_shift(p['mlp2'], p['adj2']))

    up1 = conv1 + conv_transpose_2x2(conv2, *p['up1'])    # H,W even -> no extra pad
    conv3 = conv_block(up1, p['conv3'], film_shift(p['mlp3'], p['adj3']))

    up2 = inx + conv_transpose_2x2(conv3, *p['up2'])
    conv4 = conv_block(up2, p['conv4'], film_shift(p['mlp4'], p['adj4']))

    # outc: 1x1 conv with Cout=1 kept in XLA (lane width 1 would force masked stores)
    w_o, b_o = p['outc']
    B, H, W, C = conv4.shape
    out = (conv4.reshape(B * H * W, C).astype(jnp.float32) @ w_o + b_o)
    return out.reshape(B, H, W, -1)


@functools.partial(jax.jit, static_argnames=('adjust', 'context'))
def network_forward(params, x, t, y, x_end, adjust=True, context=True):
    """Inputs follow PyTorch NCHW; x:(B,3,H,W), t:(B,), y:(B,1,H,W), x_end:(B,1,H,W)."""
    x_nhwc = jnp.transpose(x, (0, 2, 3, 1))
    if context:
        x_middle = x_nhwc[..., 1:2]                       # x[:, 1].unsqueeze(1)
    else:
        x_middle = x_nhwc
    xa = jnp.transpose(jnp.concatenate([y, x_end], axis=1), (0, 2, 3, 1))
    out = unet_forward(params, x_nhwc, t, xa, adjust=adjust)
    out = out + x_middle
    return jnp.transpose(out, (0, 3, 1, 2))               # back to NCHW


# ----------------------------------------------------------------------------
if __name__ == "__main__":
    # ---- numerical self-check of the Pallas conv against lax.conv (same bf16 operands)
    kg = _KeyGen(123)
    cin, cout, hh, ww = 16, 32, 16, 16
    xc = jax.random.normal(kg(), (2, hh, ww, cin), jnp.float32)
    w9, bc = _init_conv3x3(kg, cin, cout)
    got = conv3x3(xc, w9, bc, relu=True).astype(jnp.float32)
    w_hwio = w9.astype(jnp.float32).reshape(3, 3, cin, cout)      # (ky,kx,ci,co)
    ref = jax.lax.conv_general_dilated(
        xc.astype(jnp.bfloat16).astype(jnp.float32), w_hwio, (1, 1), 'SAME',
        dimension_numbers=('NHWC', 'HWIO', 'NHWC'),
        precision=jax.lax.Precision.HIGHEST)
    ref = jnp.maximum(ref + bc.reshape(1, 1, 1, cout), 0.0)
    ref = ref.astype(jnp.bfloat16).astype(jnp.float32)            # kernel emits bf16
    got = jax.block_until_ready(got)
    assert jnp.allclose(got, ref, atol=3e-2, rtol=3e-2), \
        float(jnp.max(jnp.abs(got - ref)))

    # ---- full Network forward
    B, C, H, W = 2, 3, 16, 16
    key = jax.random.PRNGKey(0)
    kx_, kt_, ky_, ke_ = jax.random.split(key, 4)
    x = jax.random.normal(kx_, (B, C, H, W), jnp.float32)
    t = jax.random.randint(kt_, (B,), 0, 1000).astype(jnp.float32)
    y = jax.random.normal(ky_, (B, 1, H, W), jnp.float32)
    x_end = jax.random.normal(ke_, (B, 1, H, W), jnp.float32)

    params = init_params(in_ch=C, out_ch=1, seed=0)
    out = network_forward(params, x, t, y, x_end, adjust=True)
    out = jax.block_until_ready(out)
    assert out.shape == (B, 1, H, W), out.shape
    assert bool(jnp.all(jnp.isfinite(out)))
    print("KERNEL_OK")
</pallas_src>

<mosaic_0001>
module attributes {stable_mosaic.version = 11 : i64} {
  func.func @_conv3x3_kernel(%arg0: i32, %arg1: memref<1x328x16xbf16, #tpu.memory_space<vmem>>, %arg2: memref<9x16x32xbf16, #tpu.memory_space<vmem>>, %arg3: memref<1x32xf32, #tpu.memory_space<vmem>>, %arg4: memref<1x288x32xbf16, #tpu.memory_space<vmem>>) attributes {dimension_semantics = [#tpu.dimension_semantics<parallel>], iteration_bounds = array<i64: 2>, scalar_prefetch = 0 : i64, scratch_operands = 0 : i64, tpu.core_type = #tpu.core_type<tc>, window_params = [{transform_indices = @transform_0, window_bounds = array<i64: 1, 328, 16>}, {pipeline_mode = #tpu.pipeline_mode<synchronous>, transform_indices = @transform_1, window_bounds = array<i64: 9, 16, 32>}, {pipeline_mode = #tpu.pipeline_mode<synchronous>, transform_indices = @transform_2, window_bounds = array<i64: 1, 32>}, {transform_indices = @transform_3, window_bounds = array<i64: 1, 288, 32>}]} {
    %c0 = arith.constant 0 : index
    %c0_0 = arith.constant 0 : index
    %c0_1 = arith.constant 0 : index
    %0 = vector.load %arg1[%c0, %c0_0, %c0_1] : memref<1x328x16xbf16, #tpu.memory_space<vmem>>, vector<1x328x16xbf16>
    %1 = vector.shape_cast %0 : vector<1x328x16xbf16> to vector<328x16xbf16>
    %c0_2 = arith.constant 0 : index
    %c0_3 = arith.constant 0 : index
    %c0_4 = arith.constant 0 : index
    %2 = vector.load %arg2[%c0_2, %c0_3, %c0_4] : memref<9x16x32xbf16, #tpu.memory_space<vmem>>, vector<1x16x32xbf16>
    %3 = vector.shape_cast %2 : vector<1x16x32xbf16> to vector<16x32xbf16>
    %cst = arith.constant dense<0.000000e+00> : vector<328x32xf32>
    %4 = tpu.matmul %1, %3, %cst {dimension_numbers = #tpu.dot_dimension_numbers<[1], [0], [0], [1], [0, 0, 1, 1], [], []>} : vector<328x16xbf16>, vector<16x32xbf16>, vector<328x32xf32> -> vector<328x32xf32>
    %5 = vector.extract_strided_slice %4 {offsets = [0, 0], sizes = [288, 32], strides = [1, 1]} : vector<328x32xf32> to vector<288x32xf32>
    %c1 = arith.constant 1 : index
    %c0_5 = arith.constant 0 : index
    %c0_6 = arith.constant 0 : index
    %6 = vector.load %arg2[%c1, %c0_5, %c0_6] : memref<9x16x32xbf16, #tpu.memory_space<vmem>>, vector<1x16x32xbf16>
    %7 = vector.shape_cast %6 : vector<1x16x32xbf16> to vector<16x32xbf16>
    %cst_7 = arith.constant dense<0.000000e+00> : vector<328x32xf32>
    %8 = tpu.matmul %1, %7, %cst_7 {dimension_numbers = #tpu.dot_dimension_numbers<[1], [0], [0], [1], [0, 0, 1, 1], [], []>} : vector<328x16xbf16>, vector<16x32xbf16>, vector<328x32xf32> -> vector<328x32xf32>
    %c327_i32 = arith.constant 327 : i32
    %9 = tpu.dynamic_rotate %8 by %c327_i32 dim 0 : vector<328x32xf32>, i32 -> vector<328x32xf32>
    %10 = vector.extract_strided_slice %9 {offsets = [0, 0], sizes = [288, 32], strides = [1, 1]} : vector<328x32xf32> to vector<288x32xf32>
    %11 = arith.addf %5, %10 : vector<288x32xf32>
    %c2 = arith.constant 2 : index
    %c0_8 = arith.constant 0 : index
    %c0_9 = arith.constant 0 : index
    %12 = vector.load %arg2[%c2, %c0_8, %c0_9] : memref<9x16x32xbf16, #tpu.memory_space<vmem>>, vector<1x16x32xbf16>
    %13 = vector.shape_cast %12 : vector<1x16x32xbf16> to vector<16x32xbf16>
    %cst_10 = arith.constant dense<0.000000e+00> : vector<328x32xf32>
    %14 = tpu.matmul %1, %13, %cst_10 {dimension_numbers = #tpu.dot_dimension_numbers<[1], [0], [0], [1], [0, 0, 1, 1], [], []>} : vector<328x16xbf16>, vector<16x32xbf16>, vector<328x32xf32> -> vector<328x32xf32>
    %c326_i32 = arith.constant 326 : i32
    %15 = tpu.dynamic_rotate %14 by %c326_i32 dim 0 : vector<328x32xf32>, i32 -> vector<328x32xf32>
    %16 = vector.extract_strided_slice %15 {offsets = [0, 0], sizes = [288, 32], strides = [1, 1]} : vector<328x32xf32> to vector<288x32xf32>
    %17 = arith.addf %11, %16 : vector<288x32xf32>
    %c3 = arith.constant 3 : index
    %c0_11 = arith.constant 0 : index
    %c0_12 = arith.constant 0 : index
    %18 = vector.load %arg2[%c3, %c0_11, %c0_12] : memref<9x16x32xbf16, #tpu.memory_space<vmem>>, vector<1x16x32xbf16>
    %19 = vector.shape_cast %18 : vector<1x16x32xbf16> to vector<16x32xbf16>
    %cst_13 = arith.constant dense<0.000000e+00> : vector<328x32xf32>
    %20 = tpu.matmul %1, %19, %cst_13 {dimension_numbers = #tpu.dot_dimension_numbers<[1], [0], [0], [1], [0, 0, 1, 1], [], []>} : vector<328x16xbf16>, vector<16x32xbf16>, vector<328x32xf32> -> vector<328x32xf32>
    %c310_i32 = arith.constant 310 : i32
    %21 = tpu.dynamic_rotate %20 by %c310_i32 dim 0 : vector<328x32xf32>, i32 -> vector<328x32xf32>
    %22 = vector.extract_strided_slice %21 {offsets = [0, 0], sizes = [288, 32], strides = [1, 1]} : vector<328x32xf32> to vector<288x32xf32>
    %23 = arith.addf %17, %22 : vector<288x32xf32>
    %c4 = arith.constant 4 : index
    %c0_14 = arith.constant 0 : index
    %c0_15 = arith.constant 0 : index
    %24 = vector.load %arg2[%c4, %c0_14, %c0_15] : memref<9x16x32xbf16, #tpu.memory_space<vmem>>, vector<1x16x32xbf16>
    %25 = vector.shape_cast %24 : vector<1x16x32xbf16> to vector<16x32xbf16>
    %cst_16 = arith.constant dense<0.000000e+00> : vector<328x32xf32>
    %26 = tpu.matmul %1, %25, %cst_16 {dimension_numbers = #tpu.dot_dimension_numbers<[1], [0], [0], [1], [0, 0, 1, 1], [], []>} : vector<328x16xbf16>, vector<16x32xbf16>, vector<328x32xf32> -> vector<328x32xf32>
    %c309_i32 = arith.constant 309 : i32
    %27 = tpu.dynamic_rotate %26 by %c309_i32 dim 0 : vector<328x32xf32>, i32 -> vector<328x32xf32>
    %28 = vector.extract_strided_slice %27 {offsets = [0, 0], sizes = [288, 32], strides = [1, 1]} : vector<328x32xf32> to vector<288x32xf32>
    %29 = arith.addf %23, %28 : vector<288x32xf32>
    %c5 = arith.constant 5 : index
    %c0_17 = arith.constant 0 : index
    %c0_18 = arith.constant 0 : index
    %30 = vector.load %arg2[%c5, %c0_17, %c0_18] : memref<9x16x32xbf16, #tpu.memory_space<vmem>>, vector<1x16x32xbf16>
    %31 = vector.shape_cast %30 : vector<1x16x32xbf16> to vector<16x32xbf16>
    %cst_19 = arith.constant dense<0.000000e+00> : vector<328x32xf32>
    %32 = tpu.matmul %1, %31, %cst_19 {dimension_numbers = #tpu.dot_dimension_numbers<[1], [0], [0], [1], [0, 0, 1, 1], [], []>} : vector<328x16xbf16>, vector<16x32xbf16>, vector<328x32xf32> -> vector<328x32xf32>
    %c308_i32 = arith.constant 308 : i32
    %33 = tpu.dynamic_rotate %32 by %c308_i32 dim 0 : vector<328x32xf32>, i32 -> vector<328x32xf32>
    %34 = vector.extract_strided_slice %33 {offsets = [0, 0], sizes = [288, 32], strides = [1, 1]} : vector<328x32xf32> to vector<288x32xf32>
    %35 = arith.addf %29, %34 : vector<288x32xf32>
    %c6 = arith.constant 6 : index
    %c0_20 = arith.constant 0 : index
    %c0_21 = arith.constant 0 : index
    %36 = vector.load %arg2[%c6, %c0_20, %c0_21] : memref<9x16x32xbf16, #tpu.memory_space<vmem>>, vector<1x16x32xbf16>
    %37 = vector.shape_cast %36 : vector<1x16x32xbf16> to vector<16x32xbf16>
    %cst_22 = arith.constant dense<0.000000e+00> : vector<328x32xf32>
    %38 = tpu.matmul %1, %37, %cst_22 {dimension_numbers = #tpu.dot_dimension_numbers<[1], [0], [0], [1], [0, 0, 1, 1], [], []>} : vector<328x16xbf16>, vector<16x32xbf16>, vector<328x32xf32> -> vector<328x32xf32>
    %c292_i32 = arith.constant 292 : i32
    %39 = tpu.dynamic_rotate %38 by %c292_i32 dim 0 : vector<328x32xf32>, i32 -> vector<328x32xf32>
    %40 = vector.extract_strided_slice %39 {offsets = [0, 0], sizes = [288, 32], strides = [1, 1]} : vector<328x32xf32> to vector<288x32xf32>
    %41 = arith.addf %35, %40 : vector<288x32xf32>
    %c7 = arith.constant 7 : index
    %c0_23 = arith.constant 0 : index
    %c0_24 = arith.constant 0 : index
    %42 = vector.load %arg2[%c7, %c0_23, %c0_24] : memref<9x16x32xbf16, #tpu.memory_space<vmem>>, vector<1x16x32xbf16>
    %43 = vector.shape_cast %42 : vector<1x16x32xbf16> to vector<16x32xbf16>
    %cst_25 = arith.constant dense<0.000000e+00> : vector<328x32xf32>
    %44 = tpu.matmul %1, %43, %cst_25 {dimension_numbers = #tpu.dot_dimension_numbers<[1], [0], [0], [1], [0, 0, 1, 1], [], []>} : vector<328x16xbf16>, vector<16x32xbf16>, vector<328x32xf32> -> vector<328x32xf32>
    %c291_i32 = arith.constant 291 : i32
    %45 = tpu.dynamic_rotate %44 by %c291_i32 dim 0 : vector<328x32xf32>, i32 -> vector<328x32xf32>
    %46 = vector.extract_strided_slice %45 {offsets = [0, 0], sizes = [288, 32], strides = [1, 1]} : vector<328x32xf32> to vector<288x32xf32>
    %47 = arith.addf %41, %46 : vector<288x32xf32>
    %c8 = arith.constant 8 : index
    %c0_26 = arith.constant 0 : index
    %c0_27 = arith.constant 0 : index
    %48 = vector.load %arg2[%c8, %c0_26, %c0_27] : memref<9x16x32xbf16, #tpu.memory_space<vmem>>, vector<1x16x32xbf16>
    %49 = vector.shape_cast %48 : vector<1x16x32xbf16> to vector<16x32xbf16>
    %cst_28 = arith.constant dense<0.000000e+00> : vector<328x32xf32>
    %50 = tpu.matmul %1, %49, %cst_28 {dimension_numbers = #tpu.dot_dimension_numbers<[1], [0], [0], [1], [0, 0, 1, 1], [], []>} : vector<328x16xbf16>, vector<16x32xbf16>, vector<328x32xf32> -> vector<328x32xf32>
    %c290_i32 = arith.constant 290 : i32
    %51 = tpu.dynamic_rotate %50 by %c290_i32 dim 0 : vector<328x32xf32>, i32 -> vector<328x32xf32>
    %52 = vector.extract_strided_slice %51 {offsets = [0, 0], sizes = [288, 32], strides = [1, 1]} : vector<328x32xf32> to vector<288x32xf32>
    %53 = arith.addf %47, %52 : vector<288x32xf32>
    %c0_29 = arith.constant 0 : index
    %c0_30 = arith.constant 0 : index
    %54 = vector.load %arg3[%c0_29, %c0_30] : memref<1x32xf32, #tpu.memory_space<vmem>>, vector<1x32xf32>
    %55 = vector.broadcast %54 : vector<1x32xf32> to vector<288x32xf32>
    %56 = arith.addf %53, %55 : vector<288x32xf32>
    %cst_31 = arith.constant 0.000000e+00 : f32
    %57 = vector.broadcast %cst_31 : f32 to vector<288x32xf32>
    %58 = arith.maximumf %56, %57 : vector<288x32xf32>
    %59 = arith.truncf %58 : vector<288x32xf32> to vector<288x32xbf16>
    %c0_32 = arith.constant 0 : index
    %c0_33 = arith.constant 0 : index
    %c0_34 = arith.constant 0 : index
    %60 = vector.load %arg4[%c0_32, %c0_33, %c0_34] : memref<1x288x32xbf16, #tpu.memory_space<vmem>>, vector<1x288x32xbf16>
    %61 = vector.shape_cast %60 : vector<1x288x32xbf16> to vector<288x32xbf16>
    %62 = vector.shape_cast %59 : vector<288x32xbf16> to vector<1x288x32xbf16>
    tpu.vector_store %arg4[%c0_32, %c0_33, %c0_34], %62 {strides = array<i32>} : memref<1x288x32xbf16, #tpu.memory_space<vmem>>, vector<1x288x32xbf16>,
    return
  }
  func.func @transform_0(%arg0: i32) -> (i32, i32, i32) {
    %c0_i32 = arith.constant 0 : i32
    %c0_i32_0 = arith.constant 0 : i32
    %c0_i32_1 = arith.constant 0 : i32
    return %arg0, %c0_i32, %c0_i32_0 : i32, i32, i32
  }
  func.func @transform_1(%arg0: i32) -> (i32, i32, i32) {
    %c0_i32 = arith.constant 0 : i32
    %c0_i32_0 = arith.constant 0 : i32
    %c0_i32_1 = arith.constant 0 : i32
    %c0_i32_2 = arith.constant 0 : i32
    return %c0_i32, %c0_i32_0, %c0_i32_1 : i32, i32, i32
  }
  func.func @transform_2(%arg0: i32) -> (i32, i32) {
    %c0_i32 = arith.constant 0 : i32
    %c0_i32_0 = arith.constant 0 : i32
    %c0_i32_1 = arith.constant 0 : i32
    return %c0_i32, %c0_i32_0 : i32, i32
  }
  func.func @transform_3(%arg0: i32) -> (i32, i32, i32) {
    %c0_i32 = arith.constant 0 : i32
    %c0_i32_0 = arith.constant 0 : i32
    %c0_i32_1 = arith.constant 0 : i32
    return %arg0, %c0_i32, %c0_i32_0 : i32, i32, i32
  }
}

</mosaic_0001>

<bundles_post_ra>
// kernel: tpu_custom_call.1
= control target key start
LH: loop header
LB: loop body
LE: loop exit
PB: predicated region body
PF: predicated region fallthrough
CT: control target
= control target key end

     0   :  { %s4808_s12 = smov 0   ;;  %s6875_s0 = inlined_call_operand.vmem [shape: bf16[2,328,16], index: 0, kind: input, shape index: {}]   ;;  %s6876_s1 = inlined_call_operand.vmem [shape: bf16[9,16,32], index: 1, kind: input, shape index: {}]   ;;  %s6877_s2 = inlined_call_operand.vmem [shape: f32[1,32], index: 2, kind: input, shape index: {}]   ;;  %s6878_s3 = inlined_call_operand.vmem [shape: bf16[2,288,32], index: 3, kind: output, shape index: {}]  }
   0x1 LB: > { %s3418_s13 = sadd.s32 4294967295, %s4784_s12   ;;  %p3422_p0 = scmp.ge.s32.totalorder %s4784_s12, 1  ;;  %s4784_s12 = sphi %s4808_s12, %s13_s12  }
   0x2   : > { %p137_p1 = scmp.lt.s32.totalorder %s4784_s12, 3 }
   0x4   : > { %p138_p2 = pnand %p3422_p0, %p137_p1 }
   0x6   : > { %141 = sbr.rel (%p138_p2) target bundleno = 975 (0x3cf), region = 32 }
   0xb   : > { %v4721_v0 = vld [vmem:[%s6876_s1] sm:$0xff]   ;;  %v6879_v1 = vmov 0.0   ;;  %p161_p3 = scmp.lt.s32.totalorder %s3418_s13, 1  ;;  %vm4787_vm0 = vmmov 0   ;;  %vm324_vm1 = vcmask 130048   ;;  %v4724_v2 = vld [vmem:[%s6876_s1 + $0x10] sm:$0xff]  }
   0xc   : > { %3933 = vmatprep.subr.bf16.mxu0 %v6879_v1  ;;  %4707 = vmatprep.subr.bf16.mxu1 %v6879_v1  ;;  %v4725_v3 = vld [vmem:[%s6876_s1 + $0x8] sm:$0xff]   ;;  %v4745_v25 = vld [vmem:[%s6876_s1 + $0x18] sm:$0xff]   ;;  %v4746_v26 = vld [vmem:[%s6876_s1 + $0x20] sm:$0xff]   ;;  %vm3326_vm8 = vcmask 257024  }
   0xd   : > { %3934 = vmatpush3.bf16.msra.mxu0 %v4721_v0  ;;  %4708 = vmatpush3.bf16.msra.mxu1 %v4721_v0  ;;  %s6933_s13 = smov (!%p161_p3, %s3418_s13), 1 }
   0xe   : > { %3935 = vmatprep.mubr.msk.bf16.mxu0 %vm4787_vm0, %v6879_v1  ;;  %3979 = vmatprep.mubr.msk.bf16.mxu1 %vm4787_vm0, %v6879_v1  ;;  %s4709_s16 = smul.u32 164, %s6933_s13 }
   0xf   : > { %4105 = vmatprep.subr.bf16.mxu0 %v6879_v1  ;;  %4019 = vmatprep.subr.bf16.mxu1 %v6879_v1  ;;  %s4710_s11 = smul.u32 144, %s6933_s13 }
  0x10   : > { %s4839_s23 = scalar_lea.vmem %s6875_s0, %s4709_s16 }
  0x11   : > { %v4842_v4 = vld [vmem:[%s4839_s23] sm:$0xff]   ;;  %v4845_v5 = vld [vmem:[%s4839_s23 + $0x58] sm:$0xff]   ;;  %v4857_v6 = vld [vmem:[%s4839_s23 + $0x8] sm:$0xff]   ;;  %s6595_s15 = scalar_lea.vmem %s6878_s3, %s4710_s11 }
  0x12   : > { %3936 = vmatmul.mubr.msk.bf16.vlgmr.msra.gmra.mxu0 %vm324_vm1, %v4842_v4  ;;  %3980 = vmatmul.mubr.msk.bf16.vlgmr.msra.gmra.mxu1 %vm324_vm1, %v4845_v5  ;;  %v4861_v7 = vld [vmem:[%s4839_s23 + $0x60] sm:$0xff]   ;;  %v4872_v8 = vld [vmem:[%s4839_s23 + $0x10] sm:$0xff]   ;;  %v4875_v9 = vld [vmem:[%s4839_s23 + $0x68] sm:$0xff]  }
  0x13   : > { %4106 = vmatpush3.bf16.msra.mxu0 %v4724_v2  ;;  %4020 = vmatpush3.bf16.msra.mxu1 %v4725_v3  ;;  %v4886_v10 = vld [vmem:[%s4839_s23 + $0x18] sm:$0xff]   ;;  %v4889_v11 = vld [vmem:[%s4839_s23 + $0x70] sm:$0xff]   ;;  %v4900_v12 = vld [vmem:[%s4839_s23 + $0x20] sm:$0xff]  }
  0x14   : > { %3939 = vmatprep.mubr.msk.bf16.mxu0 %vm4787_vm0, %v6879_v1  ;;  %3983 = vmatprep.mubr.msk.bf16.mxu1 %vm4787_vm0, %v6879_v1  ;;  %v4903_v13 = vld [vmem:[%s4839_s23 + $0x78] sm:$0xff]   ;;  %v4914_v14 = vld [vmem:[%s4839_s23 + $0x28] sm:$0xff]   ;;  %v4917_v15 = vld [vmem:[%s4839_s23 + $0x80] sm:$0xff]  }
  0x15   : > { %4191 = vmatprep.subr.bf16.mxu1 %v6879_v1  ;;  %4277 = vmatprep.subr.bf16.mxu0 %v6879_v1  ;;  %v4928_v16 = vld [vmem:[%s4839_s23 + $0x30] sm:$0xff]   ;;  %v4931_v17 = vld [vmem:[%s4839_s23 + $0x88] sm:$0xff]   ;;  %v4942_v18 = vld [vmem:[%s4839_s23 + $0x38] sm:$0xff]  }
  0x16   : > { %v4945_v19 = vld [vmem:[%s4839_s23 + $0x90] sm:$0xff]   ;;  %v4956_v20 = vld [vmem:[%s4839_s23 + $0x40] sm:$0xff]   ;;  %v4959_v21 = vld [vmem:[%s4839_s23 + $0x98] sm:$0xff]  }
  0x17   : > { %v4970_v22 = vld [vmem:[%s4839_s23 + $0x48] sm:$0xff]   ;;  %v4973_v23 = vld [vmem:[%s4839_s23 + $0xa0] ss:$0 sps:$4 sm:$0xff]   ;;  %v4984_v24 = vld [vmem:[%s4839_s23 + $0x50] sm:$0xff]  }
  0x1a   : > { %3940 = vmatmul.mubr.msk.bf16.gmra.mxu0 %vm324_vm1, %v4857_v6  ;;  %3984 = vmatmul.mubr.msk.bf16.gmra.mxu1 %vm324_vm1, %v4861_v7 }
  0x1b   : > { %3943 = vmatprep.mubr.msk.bf16.mxu0 %vm4787_vm0, %v6879_v1  ;;  %3987 = vmatprep.mubr.msk.bf16.mxu1 %vm4787_vm0, %v6879_v1 }
  0x22   : > { %3944 = vmatmul.mubr.msk.bf16.gmra.mxu0 %vm324_vm1, %v4872_v8  ;;  %3988 = vmatmul.mubr.msk.bf16.gmra.mxu1 %vm324_vm1, %v4875_v9 }
  0x23   : > { %3947 = vmatprep.mubr.msk.bf16.mxu0 %vm4787_vm0, %v6879_v1  ;;  %3991 = vmatprep.mubr.msk.bf16.mxu1 %vm4787_vm0, %v6879_v1 }
  0x2a   : > { %3948 = vmatmul.mubr.msk.bf16.gmra.mxu0 %vm324_vm1, %v4886_v10  ;;  %3992 = vmatmul.mubr.msk.bf16.gmra.mxu1 %vm324_vm1, %v4889_v11 }
  0x2b   : > { %3951 = vmatprep.mubr.msk.bf16.mxu0 %vm4787_vm0, %v6879_v1  ;;  %3995 = vmatprep.mubr.msk.bf16.mxu1 %vm4787_vm0, %v6879_v1 }
  0x32   : > { %3952 = vmatmul.mubr.msk.bf16.gmra.mxu0 %vm324_vm1, %v4900_v12  ;;  %3996 = vmatmul.mubr.msk.bf16.gmra.mxu1 %vm324_vm1, %v4903_v13 }
  0x33   : > { %3955 = vmatprep.mubr.msk.bf16.mxu0 %vm4787_vm0, %v6879_v1  ;;  %3999 = vmatprep.mubr.msk.bf16.mxu1 %vm4787_vm0, %v6879_v1 }
  0x3a   : > { %3956 = vmatmul.mubr.msk.bf16.gmra.mxu0 %vm324_vm1, %v4914_v14  ;;  %4000 = vmatmul.mubr.msk.bf16.gmra.mxu1 %vm324_vm1, %v4917_v15 }
  0x3b   : > { %3959 = vmatprep.mubr.msk.bf16.mxu0 %vm4787_vm0, %v6879_v1  ;;  %4003 = vmatprep.mubr.msk.bf16.mxu1 %vm4787_vm0, %v6879_v1 }
  0x42   : > { %3960 = vmatmul.mubr.msk.bf16.gmra.mxu0 %vm324_vm1, %v4928_v16  ;;  %4004 = vmatmul.mubr.msk.bf16.gmra.mxu1 %vm324_vm1, %v4931_v17 }
  0x43   : > { %3963 = vmatprep.mubr.msk.bf16.mxu0 %vm4787_vm0, %v6879_v1  ;;  %4007 = vmatprep.mubr.msk.bf16.mxu1 %vm4787_vm0, %v6879_v1 }
  0x4a   : > { %3964 = vmatmul.mubr.msk.bf16.gmra.mxu0 %vm324_vm1, %v4942_v18  ;;  %4008 = vmatmul.mubr.msk.bf16.gmra.mxu1 %vm324_vm1, %v4945_v19 }
  0x4b   : > { %3967 = vmatprep.mubr.msk.bf16.mxu0 %vm4787_vm0, %v6879_v1  ;;  %4011 = vmatprep.mubr.msk.bf16.mxu1 %vm4787_vm0, %v6879_v1 }
  0x52   : > { %3968 = vmatmul.mubr.msk.bf16.gmra.mxu0 %vm324_vm1, %v4956_v20  ;;  %4012 = vmatmul.mubr.msk.bf16.gmra.mxu1 %vm324_vm1, %v4959_v21 }
  0x53   : > { %3971 = vmatprep.mubr.msk.bf16.mxu0 %vm4787_vm0, %v6879_v1  ;;  %4015 = vmatprep.mubr.msk.bf16.mxu1 %vm4787_vm0, %v6879_v1 }
  0x5a   : > { %3972 = vmatmul.mubr.msk.bf16.gmra.mxu0 %vm324_vm1, %v4970_v22  ;;  %4016 = vmatmul.mubr.msk.bf16.gmra.mxu1 %vm324_vm1, %v4973_v23 }
  0x5b   : > { %3975 = vmatprep.mubr.msk.bf16.mxu0 %vm4787_vm0, %v6879_v1  ;;  %4021 = vmatprep.mubr.msk.bf16.mxu1 %vm4787_vm0, %v6879_v1 }
  0x62   : > { %3976 = vmatmul.mubr.msk.bf16.gmra.mxu0 %vm324_vm1, %v4984_v24  ;;  %4022 = vmatmul.mubr.msk.bf16.vlgmr.msra.gmra.mxu1 %vm324_vm1, %v4842_v4 }
  0x63   : > { %4107 = vmatprep.mubr.msk.bf16.mxu0 %vm4787_vm0, %v6879_v1  ;;  %4192 = vmatpush3.bf16.msra.mxu1 %v4745_v25 }
  0x64   : > { %4025 = vmatprep.mubr.msk.bf16.mxu1 %vm4787_vm0, %v6879_v1  ;;  %4363 = vmatprep.subr.bf16.mxu1 %v6879_v1 }
  0x6a   : > { %4108 = vmatmul.mubr.msk.bf16.vlgmr.msra.gmra.mxu0 %vm324_vm1, %v4842_v4  ;;  %4026 = vmatmul.mubr.msk.bf16.gmra.mxu1 %vm324_vm1, %v4857_v6 }
  0x6b   : > { %4278 = vmatpush3.bf16.msra.mxu0 %v4746_v26  ;;  %4029 = vmatprep.mubr.msk.bf16.mxu1 %vm4787_vm0, %v6879_v1 }
  0x6c   : > { %4111 = vmatprep.mubr.msk.bf16.mxu0 %vm4787_vm0, %v6879_v1  ;;  %4449 = vmatprep.subr.bf16.mxu0 %v6879_v1 }
  0x72   : > { %4112 = vmatmul.mubr.msk.bf16.gmra.mxu0 %vm324_vm1, %v4857_v6  ;;  %4030 = vmatmul.mubr.msk.bf16.gmra.mxu1 %vm324_vm1, %v4872_v8 }
  0x73   : > { %4115 = vmatprep.mubr.msk.bf16.mxu0 %vm4787_vm0, %v6879_v1  ;;  %4033 = vmatprep.mubr.msk.bf16.mxu1 %vm4787_vm0, %v6879_v1 }
  0x7a   : > { %4116 = vmatmul.mubr.msk.bf16.gmra.mxu0 %vm324_vm1, %v4872_v8  ;;  %4034 = vmatmul.mubr.msk.bf16.gmra.mxu1 %vm324_vm1, %v4886_v10 }
  0x7b   : > { %4119 = vmatprep.mubr.msk.bf16.mxu0 %vm4787_vm0, %v6879_v1  ;;  %4037 = vmatprep.mubr.msk.bf16.mxu1 %vm4787_vm0, %v6879_v1 }
  0x82   : > { %4120 = vmatmul.mubr.msk.bf16.gmra.mxu0 %vm324_vm1, %v4886_v10  ;;  %4038 = vmatmul.mubr.msk.bf16.gmra.mxu1 %vm324_vm1, %v4900_v12 }
  0x83   : > { %4123 = vmatprep.mubr.msk.bf16.mxu0 %vm4787_vm0, %v6879_v1  ;;  %4041 = vmatprep.mubr.msk.bf16.mxu1 %vm4787_vm0, %v6879_v1 }
  0x8a   : > { %4124 = vmatmul.mubr.msk.bf16.gmra.mxu0 %vm324_vm1, %v4900_v12  ;;  %4042 = vmatmul.mubr.msk.bf16.gmra.mxu1 %vm324_vm1, %v4914_v14 }
  0x8b   : > { %4127 = vmatprep.mubr.msk.bf16.mxu0 %vm4787_vm0, %v6879_v1  ;;  %4045 = vmatprep.mubr.msk.bf16.mxu1 %vm4787_vm0, %v6879_v1 }
  0x92   : > { %4128 = vmatmul.mubr.msk.bf16.gmra.mxu0 %vm324_vm1, %v4914_v14  ;;  %4046 = vmatmul.mubr.msk.bf16.gmra.mxu1 %vm324_vm1, %v4928_v16 }
  0x93   : > { %4131 = vmatprep.mubr.msk.bf16.mxu0 %vm4787_vm0, %v6879_v1  ;;  %4049 = vmatprep.mubr.msk.bf16.mxu1 %vm4787_vm0, %v6879_v1 }
  0x9a   : > { %4132 = vmatmul.mubr.msk.bf16.gmra.mxu0 %vm324_vm1, %v4928_v16  ;;  %4050 = vmatmul.mubr.msk.bf16.gmra.mxu1 %vm324_vm1, %v4942_v18 }
  0x9b   : > { %4135 = vmatprep.mubr.msk.bf16.mxu0 %vm4787_vm0, %v6879_v1  ;;  %4053 = vmatprep.mubr.msk.bf16.mxu1 %vm4787_vm0, %v6879_v1 }
  0xa2   : > { %4136 = vmatmul.mubr.msk.bf16.gmra.mxu0 %vm324_vm1, %v4942_v18  ;;  %4054 = vmatmul.mubr.msk.bf16.gmra.mxu1 %vm324_vm1, %v4956_v20 }
  0xa3   : > { %4139 = vmatprep.mubr.msk.bf16.mxu0 %vm4787_vm0, %v6879_v1  ;;  %4057 = vmatprep.mubr.msk.bf16.mxu1 %vm4787_vm0, %v6879_v1 }
  0xaa   : > { %4140 = vmatmul.mubr.msk.bf16.gmra.mxu0 %vm324_vm1, %v4956_v20  ;;  %4058 = vmatmul.mubr.msk.bf16.gmra.mxu1 %vm324_vm1, %v4970_v22 }
  0xab   : > { %4143 = vmatprep.mubr.msk.bf16.mxu0 %vm4787_vm0, %v6879_v1  ;;  %4061 = vmatprep.mubr.msk.bf16.mxu1 %vm4787_vm0, %v6879_v1 }
  0xb2   : > { %4144 = vmatmul.mubr.msk.bf16.gmra.mxu0 %vm324_vm1, %v4970_v22  ;;  %4062 = vmatmul.mubr.msk.bf16.gmra.mxu1 %vm324_vm1, %v4984_v24 }
  0xb3   : > { %4147 = vmatprep.mubr.msk.bf16.mxu0 %vm4787_vm0, %v6879_v1  ;;  %4065 = vmatprep.mubr.msk.bf16.mxu1 %vm4787_vm0, %v6879_v1 }
  0xba   : > { %4148 = vmatmul.mubr.msk.bf16.gmra.mxu0 %vm324_vm1, %v4984_v24  ;;  %4066 = vmatmul.mubr.msk.bf16.gmra.mxu1 %vm324_vm1, %v4845_v5 }
  0xbb   : > { %4151 = vmatprep.mubr.msk.bf16.mxu0 %vm4787_vm0, %v6879_v1  ;;  %4069 = vmatprep.mubr.msk.bf16.mxu1 %vm4787_vm0, %v6879_v1 }
  0xc2   : > { %4152 = vmatmul.mubr.msk.bf16.gmra.mxu0 %vm324_vm1, %v4845_v5  ;;  %4070 = vmatmul.mubr.msk.bf16.gmra.mxu1 %vm324_vm1, %v4861_v7 }
  0xc3   : > { %4155 = vmatprep.mubr.msk.bf16.mxu0 %vm4787_vm0, %v6879_v1  ;;  %4073 = vmatprep.mubr.msk.bf16.mxu1 %vm4787_vm0, %v6879_v1 }
  0xca   : > { %4156 = vmatmul.mubr.msk.bf16.gmra.mxu0 %vm324_vm1, %v4861_v7  ;;  %4074 = vmatmul.mubr.msk.bf16.gmra.mxu1 %vm324_vm1, %v4875_v9 }
  0xcb   : > { %4159 = vmatprep.mubr.msk.bf16.mxu0 %vm4787_vm0, %v6879_v1  ;;  %4077 = vmatprep.mubr.msk.bf16.mxu1 %vm4787_vm0, %v6879_v1 }
  0xd2   : > { %v5106_v27 = vpop.f32.mrf.mxu0  ;;  %4160 = vmatmul.mubr.msk.bf16.gmra.mxu0 %vm324_vm1, %v4875_v9  ;;  %v5110_v28 = vpop.f32.mrf.mxu1  ;;  %4078 = vmatmul.mubr.msk.bf16.gmra.mxu1 %vm324_vm1, %v4889_v11 }
  0xd3   : > { %4163 = vmatprep.mubr.msk.bf16.mxu0 %vm4787_vm0, %v6879_v1  ;;  %4081 = vmatprep.mubr.msk.bf16.mxu1 %vm4787_vm0, %v6879_v1 }
  0xd4   : > { %v3937_v29 = vpop.f32.mrf.mxu0  ;;  %v3981_v30 = vpop.f32.mrf.mxu1 }
  0xd6   : > { %v5118_v31 = vpop.f32.mrf.mxu0  ;;  %v5120_v32 = vpop.f32.mrf.mxu1 }
  0xd8   : > { %v3938_v33 = vpop.f32.mrf.mxu0  ;;  %v3982_v34 = vpop.f32.mrf.mxu1 }
  0xda   : > { %v5122_v35 = vpop.f32.mrf.mxu0  ;;  %4164 = vmatmul.mubr.msk.bf16.gmra.mxu0 %vm324_vm1, %v4889_v11  ;;  %v5126_v36 = vpop.f32.mrf.mxu1  ;;  %4082 = vmatmul.mubr.msk.bf16.gmra.mxu1 %vm324_vm1, %v4903_v13 }
  0xdb   : > { %4167 = vmatprep.mubr.msk.bf16.mxu0 %vm4787_vm0, %v6879_v1  ;;  %4085 = vmatprep.mubr.msk.bf16.mxu1 %vm4787_vm0, %v6879_v1 }
  0xdc   : > { %v3941_v37 = vpop.f32.mrf.mxu0  ;;  %v3985_v38 = vpop.f32.mrf.mxu1 }
  0xde   : > { %v5134_v39 = vpop.f32.mrf.mxu0  ;;  %v5136_v40 = vpop.f32.mrf.mxu1 }
  0xe0   : > { %v3942_v41 = vpop.f32.mrf.mxu0  ;;  %v3986_v42 = vpop.f32.mrf.mxu1 }
  0xe2   : > { %v5138_v43 = vpop.f32.mrf.mxu0  ;;  %4168 = vmatmul.mubr.msk.bf16.gmra.mxu0 %vm324_vm1, %v4903_v13  ;;  %v5142_v44 = vpop.f32.mrf.mxu1  ;;  %4086 = vmatmul.mubr.msk.bf16.gmra.mxu1 %vm324_vm1, %v4917_v15 }
  0xe3   : > { %4171 = vmatprep.mubr.msk.bf16.mxu0 %vm4787_vm0, %v6879_v1  ;;  %4089 = vmatprep.mubr.msk.bf16.mxu1 %vm4787_vm0, %v6879_v1 }
  0xe4   : > { %v3945_v45 = vpop.f32.mrf.mxu0  ;;  %v3989_v46 = vpop.f32.mrf.mxu1 }
  0xe6   : > { %v5150_v47 = vpop.f32.mrf.mxu0  ;;  %v5152_v48 = vpop.f32.mrf.mxu1 }
  0xe8   : > { %v3946_v49 = vpop.f32.mrf.mxu0  ;;  %v3990_v50 = vpop.f32.mrf.mxu1 }
  0xea   : > { %v5154_v51 = vpop.f32.mrf.mxu0  ;;  %4172 = vmatmul.mubr.msk.bf16.gmra.mxu0 %vm324_vm1, %v4917_v15  ;;  %v5158_v52 = vpop.f32.mrf.mxu1  ;;  %4090 = vmatmul.mubr.msk.bf16.gmra.mxu1 %vm324_vm1, %v4931_v17 }
  0xeb   : > { %4175 = vmatprep.mubr.msk.bf16.mxu0 %vm4787_vm0, %v6879_v1  ;;  %4093 = vmatprep.mubr.msk.bf16.mxu1 %vm4787_vm0, %v6879_v1 }
  0xec   : > { %v3949_v53 = vpop.f32.mrf.mxu0  ;;  %v3993_v54 = vpop.f32.mrf.mxu1 }
  0xee   : > { %v5166_v55 = vpop.f32.mrf.mxu0  ;;  %v5168_v56 = vpop.f32.mrf.mxu1 }
  0xf0   : > { %v3950_v57 = vpop.f32.mrf.mxu0  ;;  %v3994_v58 = vpop.f32.mrf.mxu1 }
  0xf2   : > { %v5170_v59 = vpop.f32.mrf.mxu0  ;;  %4176 = vmatmul.mubr.msk.bf16.gmra.mxu0 %vm324_vm1, %v4931_v17  ;;  %v5174_v60 = vpop.f32.mrf.mxu1  ;;  %4094 = vmatmul.mubr.msk.bf16.gmra.mxu1 %vm324_vm1, %v4945_v19 }
  0xf3   : > { %4179 = vmatprep.mubr.msk.bf16.mxu0 %vm4787_vm0, %v6879_v1  ;;  %4097 = vmatprep.mubr.msk.bf16.mxu1 %vm4787_vm0, %v6879_v1 }
  0xf4   : > { %v3953_v61 = vpop.f32.mrf.mxu0  ;;  %v3997_v62 = vpop.f32.mrf.mxu1 }
  0xf6   : > { %v5182_v63 = vpop.f32.mrf.mxu0  ;;  %v5184_v0 = vpop.f32.mrf.mxu1 }
  0xf8   : > { %v3954_v2 = vpop.f32.mrf.mxu0  ;;  %v3998_v3 = vpop.f32.mrf.mxu1 }
  0xfa   : > { %v5186_v15 = vpop.f32.mrf.mxu0  ;;  %4180 = vmatmul.mubr.msk.bf16.gmra.mxu0 %vm324_vm1, %v4945_v19  ;;  %v5190_v17 = vpop.f32.mrf.mxu1  ;;  %4098 = vmatmul.mubr.msk.bf16.gmra.mxu1 %vm324_vm1, %v4959_v21 }
  0xfb   : > { %4183 = vmatprep.mubr.msk.bf16.mxu0 %vm4787_vm0, %v6879_v1  ;;  %4101 = vmatprep.mubr.msk.bf16.mxu1 %vm4787_vm0, %v6879_v1 }
  0xfc   : > { %v3957_v25 = vpop.f32.mrf.mxu0  ;;  %v4001_v26 = vpop.f32.mrf.mxu1 }
  0xfe   : > { %v5198_v29 = vpop.f32.mrf.mxu0  ;;  %v5200_v30 = vpop.f32.mrf.mxu1 }
 0x100   : > { %v3958_v33 = vpop.f32.mrf.mxu0  ;;  %v4002_v34 = vpop.f32.mrf.mxu1 }
 0x102   : > { %v5202_v19 = vpop.f32.mrf.mxu0  ;;  %4184 = vmatmul.mubr.msk.bf16.gmra.mxu0 %vm324_vm1, %v4959_v21  ;;  %v5206_v37 = vpop.f32.mrf.mxu1  ;;  %4102 = vmatmul.mubr.msk.bf16.gmra.mxu1 %vm324_vm1, %v4973_v23  ;;  %v4747_v21 = vld [vmem:[%s6876_s1 + $0x28] sm:$0xff]  }
 0x103   : > { %6901 = vst [vmem:[#allocation2_spill] sm:$0xff] %v5206_v37  ;;  %4187 = vmatprep.mubr.msk.bf16.mxu0 %vm4787_vm0, %v6879_v1  ;;  %4193 = vmatprep.mubr.msk.bf16.mxu1 %vm4787_vm0, %v6879_v1 }
 0x104   : > { %v3961_v38 = vpop.f32.mrf.mxu0  ;;  %v4005_v41 = vpop.f32.mrf.mxu1 }
 0x106   : > { %v5214_v42 = vpop.f32.mrf.mxu0  ;;  %v5216_v45 = vpop.f32.mrf.mxu1 }
 0x107   : > { %6902 = vst [vmem:[#allocation3_spill] sm:$0xff] %v5216_v45 }
 0x108   : > { %v3962_v46 = vpop.f32.mrf.mxu0  ;;  %v4006_v49 = vpop.f32.mrf.mxu1 }
 0x10a   : > { %v5221_v50 = vpop.f32.mrf.mxu0  ;;  %4188 = vmatmul.mubr.msk.bf16.gmra.mxu0 %vm324_vm1, %v4973_v23  ;;  %v566_v53 = vpop.f32.mrf.mxu1  ;;  %4194 = vmatmul.mubr.msk.bf16.vlgmr.msra.gmra.mxu1 %vm324_vm1, %v4842_v4  ;;  %v4748_v23 = vld [vmem:[%s6876_s1 + $0x30] sm:$0xff]  }
 0x10b   : > { %4279 = vmatprep.mubr.msk.bf16.mxu0 %vm4787_vm0, %v6879_v1  ;;  %4364 = vmatpush3.bf16.msra.mxu1 %v4747_v21 }
 0x10c   : > { %v3965_v54 = vpop.f32.mrf.mxu0  ;;  %4197 = vmatprep.mubr.msk.bf16.mxu1 %vm4787_vm0, %v6879_v1  ;;  %v4009_v57 = vpop.f32.mrf.mxu1  ;;  %4535 = vmatprep.subr.bf16.mxu1 %v6879_v1 }
 0x10e   : > { %v5232_v58 = vpop.f32.mrf.mxu0  ;;  %v568_v61 = vpop.f32.mrf.mxu1 }
 0x10f   : > { %v825_v61 = vlaneseq }
 0x110   : > { %v3966_v62 = vpop.f32.mrf.mxu0  ;;  %v4010_v2 = vpop.f32.mrf.mxu1 }
 0x112   : > { %v5237_v3 = vpop.f32.mrf.mxu0  ;;  %4280 = vmatmul.mubr.msk.bf16.vlgmr.msra.gmra.mxu0 %vm324_vm1, %v4842_v4  ;;  %v572_v25 = vpop.f32.mrf.mxu1  ;;  %4198 = vmatmul.mubr.msk.bf16.gmra.mxu1 %vm324_vm1, %v4857_v6 }
 0x113   : > { %4450 = vmatpush3.bf16.msra.mxu0 %v4748_v23  ;;  %4201 = vmatprep.mubr.msk.bf16.mxu1 %vm4787_vm0, %v6879_v1  ;;  %v5268_v25 = vshrl.u32 %v825_v61, 7 }
 0x114   : > { %v3969_v26 = vpop.f32.mrf.mxu0  ;;  %4283 = vmatprep.mubr.msk.bf16.mxu0 %vm4787_vm0, %v6879_v1  ;;  %v4013_v33 = vpop.f32.mrf.mxu1  ;;  %4621 = vmatprep.subr.bf16.mxu0 %v6879_v1 }
 0x115   : > { %vm827_vm2 = vcmp.lt.s32.totalorder %v5268_v25, 7  ;;  %vm1142_vm3 = vcmp.lt.s32.totalorder %v5268_v25, 6  ;;  %vm1771_vm4 = vcmp.lt.s32.totalorder %v5268_v25, 5  ;;  %vm2086_vm5 = vcmp.lt.s32.totalorder %v5268_v25, 4 }
 0x116   : > { %v5248_v34 = vpop.f32.mrf.mxu0  ;;  %v574_v38 = vpop.f32.mrf.mxu1  ;;  %vm2715_vm6 = vcmp.lt.s32.totalorder %v5268_v25, 3  ;;  %vm3030_vm7 = vcmp.lt.s32.totalorder %v5268_v25, 2 }
 0x118   : > { %v3970_v41 = vpop.f32.mrf.mxu0  ;;  %v4014_v4 = vpop.f32.mrf.mxu1 }
 0x11a   : > { %v5250_v46 = vpop.f32.mrf.mxu0  ;;  %4284 = vmatmul.mubr.msk.bf16.gmra.mxu0 %vm324_vm1, %v4857_v6  ;;  %v578_v21 = vpop.f32.mrf.mxu1  ;;  %4202 = vmatmul.mubr.msk.bf16.gmra.mxu1 %vm324_vm1, %v4872_v8 }
 0x11b   : > { %4287 = vmatprep.mubr.msk.bf16.mxu0 %vm4787_vm0, %v6879_v1  ;;  %4205 = vmatprep.mubr.msk.bf16.mxu1 %vm4787_vm0, %v6879_v1 }
 0x11c   : > { %v3973_v49 = vpop.f32.mrf.mxu0  ;;  %v4017_v53 = vpop.f32.mrf.mxu1 }
 0x11e   : > { %v5260_v54 = vpop.f32.mrf.mxu0  ;;  %v580_v57 = vpop.f32.mrf.mxu1 }
 0x120   : > { %v3974_v23 = vpop.f32.mrf.mxu0  ;;  %v4018_v62 = vpop.f32.mrf.mxu1 }
 0x122   : > { %v5262_v2 = vpop.f32.mrf.mxu0  ;;  %4288 = vmatmul.mubr.msk.bf16.gmra.mxu0 %vm324_vm1, %v4872_v8  ;;  %v626_v6 = vpop.f32.mrf.mxu1  ;;  %4206 = vmatmul.mubr.msk.bf16.gmra.mxu1 %vm324_vm1, %v4886_v10 }
 0x123   : > { %4291 = vmatprep.mubr.msk.bf16.mxu0 %vm4787_vm0, %v6879_v1  ;;  %4209 = vmatprep.mubr.msk.bf16.mxu1 %vm4787_vm0, %v6879_v1  ;;  %v788_v38 = vrot.slane %v626_v6, 1 }
 0x124   : > { %v3977_v26 = vpop.f32.mrf.mxu0  ;;  %v4023_v33 = vpop.f32.mrf.mxu1 }
 0x126   : > { %v5274_v41 = vpop.f32.mrf.mxu0  ;;  %v629_v4 = vpop.f32.mrf.mxu1 }
 0x127   : > { %v789_v8 = vrot.slane %v629_v4, 1 }
 0x128   : > { %v3978_v21 = vpop.f32.mrf.mxu0  ;;  %v4024_v49 = vpop.f32.mrf.mxu1 }
 0x129   : > { %v863_v53 = vsel %vm827_vm2, %v788_v38, %v789_v8 }
 0x12a   : > { %v943_v57 = vpop.f32.mrf.mxu0  ;;  %4292 = vmatmul.mubr.msk.bf16.gmra.mxu0 %vm324_vm1, %v4886_v10  ;;  %v634_v61 = vpop.f32.mrf.mxu1  ;;  %4210 = vmatmul.mubr.msk.bf16.gmra.mxu1 %vm324_vm1, %v4900_v12  ;;  %v864_v21 = vadd.f32 %v863_v53, %v5106_v27  ;;  %v6904_v27 = vmov 0.0  }
 0x12b   : > { %4295 = vmatprep.mubr.msk.bf16.mxu0 %vm4787_vm0, %v6879_v1  ;;  %v790_v23 = vrot.slane %v634_v61, 1  ;;  %4213 = vmatprep.mubr.msk.bf16.mxu1 %vm4787_vm0, %v6879_v1  ;;  %v1105_v10 = vrot.slane %v943_v57, 2 }
 0x12c   : > { %v4109_v62 = vpop.f32.mrf.mxu0  ;;  %v4027_v6 = vpop.f32.mrf.mxu1 }
 0x12d   : > { %v862_v26 = vsel %vm827_vm2, %v789_v8, %v790_v23 }
 0x12e   : > { %v946_v33 = vpop.f32.mrf.mxu0  ;;  %v637_v38 = vpop.f32.mrf.mxu1 }
 0x12f   : > { %v1106_v4 = vrot.slane %v946_v33, 2  ;;  %v791_v49 = vrot.slane %v637_v38, 1 }
 0x130   : > { %v4110_v45 = vpop.f32.mrf.mxu0  ;;  %v4028_v62 = vpop.f32.mrf.mxu1 }
 0x131   : > { %v1178_v61 = vsel %vm1142_vm3, %v1105_v10, %v1106_v4  ;;  %v861_v6 = vsel %vm827_vm2, %v790_v23, %v791_v49  ;;  %v865_v45 = vadd.f32 %v862_v26, %v5118_v31 }
 0x132   : > { %v5295_v1 = vadd.f32 %v1178_v61, %v864_v21  ;;  %v951_v37 = vpop.f32.mrf.mxu0  ;;  %4296 = vmatmul.mubr.msk.bf16.gmra.mxu0 %vm324_vm1, %v4900_v12  ;;  %v642_v8 = vpop.f32.mrf.mxu1  ;;  %4214 = vmatmul.mubr.msk.bf16.gmra.mxu1 %vm324_vm1, %v4914_v14  ;;  %v866_v62 = vadd.f32 %v861_v6, %v5122_v35 }
 0x133   : > { %v1107_v57 = vrot.slane %v951_v37, 2  ;;  %4299 = vmatprep.mubr.msk.bf16.mxu0 %vm4787_vm0, %v6904_v27  ;;  %v792_v53 = vrot.slane %v642_v8, 1  ;;  %4217 = vmatprep.mubr.msk.bf16.mxu1 %vm4787_vm0, %v6904_v27 }
 0x134   : > { %6903 = vst [vmem:[#allocation4_spill] sm:$0xff] %v5295_v1  ;;  %v4113_v33 = vpop.f32.mrf.mxu0  ;;  %v4031_v10 = vpop.f32.mrf.mxu1 }
 0x135   : > { %v1177_v23 = vsel %vm1142_vm3, %v1106_v4, %v1107_v57  ;;  %v860_v12 = vsel %vm827_vm2, %v791_v49, %v792_v53 }
 0x136   : > { %v5310_v37 = vadd.f32 %v1177_v23, %v865_v45  ;;  %v954_v38 = vpop.f32.mrf.mxu0  ;;  %v645_v21 = vpop.f32.mrf.mxu1  ;;  %v867_v35 = vadd.f32 %v860_v12, %v5134_v39 }
 0x137   : > { %v1108_v61 = vrot.slane %v954_v38, 2  ;;  %v793_v31 = vrot.slane %v645_v21, 1 }
 0x138   : > { %v4114_v26 = vpop.f32.mrf.mxu0  ;;  %v4032_v33 = vpop.f32.mrf.mxu1 }
 0x139   : > { %v1176_v8 = vsel %vm1142_vm3, %v1107_v57, %v1108_v61  ;;  %v859_v4 = vsel %vm827_vm2, %v792_v53, %v793_v31 }
 0x13a   : > { %v5317_v10 = vadd.f32 %v1176_v8, %v866_v62  ;;  %v959_v1 = vpop.f32.mrf.mxu0  ;;  %4300 = vmatmul.mubr.msk.bf16.gmra.mxu0 %vm324_vm1, %v4914_v14  ;;  %v650_v49 = vpop.f32.mrf.mxu1  ;;  %4218 = vmatmul.mubr.msk.bf16.gmra.mxu1 %vm324_vm1, %v4928_v16  ;;  %v868_v26 = vadd.f32 %v859_v4, %v5138_v43 }
 0x13b   : > { %v1109_v45 = vrot.slane %v959_v1, 2  ;;  %4303 = vmatprep.mubr.msk.bf16.mxu0 %vm4787_vm0, %v6904_v27  ;;  %v794_v6 = vrot.slane %v650_v49, 1  ;;  %4221 = vmatprep.mubr.msk.bf16.mxu1 %vm4787_vm0, %v6904_v27 }
 0x13c   : > { %v4117_v57 = vpop.f32.mrf.mxu0  ;;  %v4035_v23 = vpop.f32.mrf.mxu1 }
 0x13d   : > { %v1175_v53 = vsel %vm1142_vm3, %v1108_v61, %v1109_v45  ;;  %v858_v1 = vsel %vm827_vm2, %v793_v31, %v794_v6 }
 0x13e   : > { %v5332_v14 = vadd.f32 %v1175_v53, %v867_v35  ;;  %v962_v38 = vpop.f32.mrf.mxu0  ;;  %v653_v21 = vpop.f32.mrf.mxu1  ;;  %v869_v43 = vadd.f32 %v858_v1, %v5150_v47 }
 0x13f   : > { %v1110_v62 = vrot.slane %v962_v38, 2  ;;  %v795_v39 = vrot.slane %v653_v21, 1 }
 0x140   : > { %v4118_v12 = vpop.f32.mrf.mxu0  ;;  %v4036_v33 = vpop.f32.mrf.mxu1 }
 0x141   : > { %v1174_v8 = vsel %vm1142_vm3, %v1109_v45, %v1110_v62  ;;  %v857_v61 = vsel %vm827_vm2, %v794_v6, %v795_v39 }
 0x142   : > { %v5339_v49 = vadd.f32 %v1174_v8, %v868_v26  ;;  %v967_v57 = vpop.f32.mrf.mxu0  ;;  %4304 = vmatmul.mubr.msk.bf16.gmra.mxu0 %vm324_vm1, %v4928_v16  ;;  %v658_v31 = vpop.f32.mrf.mxu1  ;;  %4222 = vmatmul.mubr.msk.bf16.gmra.mxu1 %vm324_vm1, %v4942_v18  ;;  %v870_v12 = vadd.f32 %v857_v61, %v5154_v51 }
 0x143   : > { %v1111_v35 = vrot.slane %v967_v57, 2  ;;  %4307 = vmatprep.mubr.msk.bf16.mxu0 %vm4787_vm0, %v6904_v27  ;;  %v796_v4 = vrot.slane %v658_v31, 1  ;;  %4225 = vmatprep.mubr.msk.bf16.mxu1 %vm4787_vm0, %v6904_v27 }
 0x144   : > { %v4121_v45 = vpop.f32.mrf.mxu0  ;;  %v4039_v53 = vpop.f32.mrf.mxu1 }
 0x145   : > { %v1173_v6 = vsel %vm1142_vm3, %v1110_v62, %v1111_v35  ;;  %v856_v16 = vsel %vm827_vm2, %v795_v39, %v796_v4 }
 0x146   : > { %v5354_v23 = vadd.f32 %v1173_v6, %v869_v43  ;;  %v970_v38 = vpop.f32.mrf.mxu0  ;;  %v661_v21 = vpop.f32.mrf.mxu1  ;;  %v871_v51 = vadd.f32 %v856_v16, %v5166_v55 }
 0x147   : > { %v1112_v26 = vrot.slane %v970_v38, 2  ;;  %v797_v47 = vrot.slane %v661_v21, 1 }
 0x148   : > { %v4122_v1 = vpop.f32.mrf.mxu0  ;;  %v4040_v33 = vpop.f32.mrf.mxu1 }
 0x149   : > { %v1172_v8 = vsel %vm1142_vm3, %v1111_v35, %v1112_v26  ;;  %v855_v62 = vsel %vm827_vm2, %v796_v4, %v797_v47 }
 0x14a   : > { %v5361_v57 = vadd.f32 %v1172_v8, %v870_v12  ;;  %v975_v31 = vpop.f32.mrf.mxu0  ;;  %4308 = vmatmul.mubr.msk.bf16.gmra.mxu0 %vm324_vm1, %v4942_v18  ;;  %v666_v39 = vpop.f32.mrf.mxu1  ;;  %4226 = vmatmul.mubr.msk.bf16.gmra.mxu1 %vm324_vm1, %v4956_v20  ;;  %v872_v12 = vadd.f32 %v855_v62, %v5170_v59 }
 0x14b   : > { %v1113_v43 = vrot.slane %v975_v31, 2  ;;  %4311 = vmatprep.mubr.msk.bf16.mxu0 %vm4787_vm0, %v6904_v27  ;;  %v798_v61 = vrot.slane %v666_v39, 1  ;;  %4229 = vmatprep.mubr.msk.bf16.mxu1 %vm4787_vm0, %v6904_v27 }
 0x14c   : > { %v4125_v35 = vpop.f32.mrf.mxu0  ;;  %v4043_v45 = vpop.f32.mrf.mxu1 }
 0x14d   : > { %v1171_v4 = vsel %vm1142_vm3, %v1112_v26, %v1113_v43  ;;  %v854_v18 = vsel %vm827_vm2, %v797_v47, %v798_v61 }
 0x14e   : > { %v5376_v6 = vadd.f32 %v1171_v4, %v871_v51  ;;  %v978_v53 = vpop.f32.mrf.mxu0  ;;  %v669_v38 = vpop.f32.mrf.mxu1  ;;  %v873_v59 = vadd.f32 %v854_v18, %v5182_v63 }
 0x14f   : > { %v1114_v21 = vrot.slane %v978_v53, 2  ;;  %v799_v55 = vrot.slane %v669_v38, 1 }
 0x150   : > { %v4126_v16 = vpop.f32.mrf.mxu0  ;;  %v4044_v8 = vpop.f32.mrf.mxu1 }
 0x151   : > { %v1170_v1 = vsel %vm1142_vm3, %v1113_v43, %v1114_v21  ;;  %v853_v26 = vsel %vm827_vm2, %v798_v61, %v799_v55 }
 0x152   : > { %v5383_v33 = vadd.f32 %v1170_v1, %v872_v12  ;;  %v983_v31 = vpop.f32.mrf.mxu0  ;;  %4312 = vmatmul.mubr.msk.bf16.gmra.mxu0 %vm324_vm1, %v4956_v20  ;;  %v674_v47 = vpop.f32.mrf.mxu1  ;;  %4230 = vmatmul.mubr.msk.bf16.gmra.mxu1 %vm324_vm1, %v4970_v22  ;;  %v874_v38 = vadd.f32 %v853_v26, %v5186_v15 }
 0x153   : > { %v1115_v39 = vrot.slane %v983_v31, 2  ;;  %4315 = vmatprep.mubr.msk.bf16.mxu0 %vm4787_vm0, %v6904_v27  ;;  %v800_v62 = vrot.slane %v674_v47, 1  ;;  %4233 = vmatprep.mubr.msk.bf16.mxu1 %vm4787_vm0, %v6904_v27 }
 0x154   : > { %v4129_v43 = vpop.f32.mrf.mxu0  ;;  %v4047_v61 = vpop.f32.mrf.mxu1 }
 0x155   : > { %v1169_v51 = vsel %vm1142_vm3, %v1114_v21, %v1115_v39  ;;  %v852_v20 = vsel %vm827_vm2, %v799_v55, %v800_v62 }
 0x156   : > { %v5398_v35 = vadd.f32 %v1169_v51, %v873_v59  ;;  %v986_v4 = vpop.f32.mrf.mxu0  ;;  %v677_v45 = vpop.f32.mrf.mxu1  ;;  %v875_v15 = vadd.f32 %v852_v20, %v5198_v29 }
 0x157   : > { %v1116_v53 = vrot.slane %v986_v4, 2  ;;  %v801_v63 = vrot.slane %v677_v45, 1 }
 0x158   : > { %v4130_v18 = vpop.f32.mrf.mxu0  ;;  %v4048_v16 = vpop.f32.mrf.mxu1 }
 0x159   : > { %v1168_v12 = vsel %vm1142_vm3, %v1115_v39, %v1116_v53  ;;  %v851_v21 = vsel %vm827_vm2, %v800_v62, %v801_v63 }
 0x15a   : > { %v5405_v1 = vadd.f32 %v1168_v12, %v874_v38  ;;  %v991_v8 = vpop.f32.mrf.mxu0  ;;  %4316 = vmatmul.mubr.msk.bf16.gmra.mxu0 %vm324_vm1, %v4970_v22  ;;  %v682_v55 = vpop.f32.mrf.mxu1  ;;  %4234 = vmatmul.mubr.msk.bf16.gmra.mxu1 %vm324_vm1, %v4984_v24  ;;  %v876_v4 = vadd.f32 %v851_v21, %v5202_v19 }
 0x15b   : > { %v1117_v31 = vrot.slane %v991_v8, 2  ;;  %4319 = vmatprep.mubr.msk.bf16.mxu0 %vm4787_vm0, %v6904_v27  ;;  %v802_v26 = vrot.slane %v682_v55, 1  ;;  %4237 = vmatprep.mubr.msk.bf16.mxu1 %vm4787_vm0, %v6904_v27 }
 0x15c   : > { %v4133_v47 = vpop.f32.mrf.mxu0  ;;  %v4051_v59 = vpop.f32.mrf.mxu1 }
 0x15d   : > { %v1167_v39 = vsel %vm1142_vm3, %v1116_v53, %v1117_v31  ;;  %v850_v22 = vsel %vm827_vm2, %v801_v63, %v802_v26 }
 0x15e   : > { %v5420_v62 = vadd.f32 %v1167_v39, %v875_v15  ;;  %v994_v43 = vpop.f32.mrf.mxu0  ;;  %v685_v51 = vpop.f32.mrf.mxu1  ;;  %v877_v19 = vadd.f32 %v850_v22, %v5214_v42 }
 0x15f   : > { %v1118_v61 = vrot.slane %v994_v43, 2  ;;  %v803_v29 = vrot.slane %v685_v51, 1 }
 0x160   : > { %v4134_v20 = vpop.f32.mrf.mxu0  ;;  %v4052_v38 = vpop.f32.mrf.mxu1 }
 0x161   : > { %v1166_v45 = vsel %vm1142_vm3, %v1117_v31, %v1118_v61  ;;  %v849_v53 = vsel %vm827_vm2, %v802_v26, %v803_v29 }
 0x162   : > { %v5427_v18 = vadd.f32 %v1166_v45, %v876_v4  ;;  %v999_v12 = vpop.f32.mrf.mxu0  ;;  %4320 = vmatmul.mubr.msk.bf16.gmra.mxu0 %vm324_vm1, %v4984_v24  ;;  %v690_v63 = vpop.f32.mrf.mxu1  ;;  %4238 = vmatmul.mubr.msk.bf16.gmra.mxu1 %vm324_vm1, %v4845_v5  ;;  %v878_v59 = vadd.f32 %v849_v53, %v5221_v50 }
 0x163   : > { %v1119_v16 = vrot.slane %v999_v12, 2  ;;  %4323 = vmatprep.mubr.msk.bf16.mxu0 %vm4787_vm0, %v6904_v27  ;;  %v804_v21 = vrot.slane %v690_v63, 1  ;;  %4241 = vmatprep.mubr.msk.bf16.mxu1 %vm4787_vm0, %v6904_v27 }
 0x164   : > { %v4137_v8 = vpop.f32.mrf.mxu0  ;;  %v4055_v31 = vpop.f32.mrf.mxu1 }
 0x165   : > { %v1165_v55 = vsel %vm1142_vm3, %v1118_v61, %v1119_v16  ;;  %v848_v24 = vsel %vm827_vm2, %v803_v29, %v804_v21 }
 0x166   : > { %v5442_v15 = vadd.f32 %v1165_v55, %v877_v19  ;;  %v1002_v26 = vpop.f32.mrf.mxu0  ;;  %v693_v47 = vpop.f32.mrf.mxu1  ;;  %v879_v50 = vadd.f32 %v848_v24, %v5232_v58 }
 0x167   : > { %v1120_v39 = vrot.slane %v1002_v26, 2  ;;  %v805_v42 = vrot.slane %v693_v47, 1 }
 0x168   : > { %v4138_v22 = vpop.f32.mrf.mxu0  ;;  %v4056_v51 = vpop.f32.mrf.mxu1 }
 0x169   : > { %v1164_v43 = vsel %vm1142_vm3, %v1119_v16, %v1120_v39  ;;  %v847_v61 = vsel %vm827_vm2, %v804_v21, %v805_v42 }
 0x16a   : > { %v5449_v4 = vadd.f32 %v1164_v43, %v878_v59  ;;  %v1007_v20 = vpop.f32.mrf.mxu0  ;;  %4324 = vmatmul.mubr.msk.bf16.gmra.mxu0 %vm324_vm1, %v4845_v5  ;;  %v698_v29 = vpop.f32.mrf.mxu1  ;;  %4242 = vmatmul.mubr.msk.bf16.gmra.mxu1 %vm324_vm1, %v4861_v7  ;;  %v880_v55 = vadd.f32 %v847_v61, %v5237_v3 }
 0x16b   : > { %v1121_v45 = vrot.slane %v1007_v20, 2  ;;  %4327 = vmatprep.mubr.msk.bf16.mxu0 %vm4787_vm0, %v6904_v27  ;;  %v806_v38 = vrot.slane %v698_v29, 1  ;;  %4245 = vmatprep.mubr.msk.bf16.mxu1 %vm4787_vm0, %v6904_v27 }
 0x16c   : > { %v4141_v53 = vpop.f32.mrf.mxu0  ;;  %v4059_v63 = vpop.f32.mrf.mxu1 }
 0x16d   : > { %v1163_v12 = vsel %vm1142_vm3, %v1120_v39, %v1121_v45  ;;  %v846_v5 = vsel %vm827_vm2, %v805_v42, %v806_v38 }
 0x16e   : > { %v5464_v16 = vadd.f32 %v1163_v12, %v879_v50  ;;  %v1010_v19 = vpop.f32.mrf.mxu0  ;;  %v701_v21 = vpop.f32.mrf.mxu1  ;;  %v881_v3 = vadd.f32 %v846_v5, %v5248_v34 }
 0x16f   : > { %v1122_v8 = vrot.slane %v1010_v19, 2  ;;  %v807_v58 = vrot.slane %v701_v21, 1 }
 0x170   : > { %v4142_v31 = vpop.f32.mrf.mxu0  ;;  %v4060_v26 = vpop.f32.mrf.mxu1 }
 0x171   : > { %v1162_v24 = vsel %vm1142_vm3, %v1121_v45, %v1122_v8  ;;  %v845_v47 = vsel %vm827_vm2, %v806_v38, %v807_v58 }
 0x172   : > { %v5471_v39 = vadd.f32 %v1162_v24, %v880_v55  ;;  %v1015_v59 = vpop.f32.mrf.mxu0  ;;  %4328 = vmatmul.mubr.msk.bf16.gmra.mxu0 %vm324_vm1, %v4861_v7  ;;  %v706_v42 = vpop.f32.mrf.mxu1  ;;  %4246 = vmatmul.mubr.msk.bf16.gmra.mxu1 %vm324_vm1, %v4875_v9  ;;  %v882_v53 = vadd.f32 %v845_v47, %v5250_v46 }
 0x173   : > { %v1123_v22 = vrot.slane %v1015_v59, 2  ;;  %4331 = vmatprep.mubr.msk.bf16.mxu0 %vm4787_vm0, %v6904_v27  ;;  %v808_v43 = vrot.slane %v706_v42, 1  ;;  %4249 = vmatprep.mubr.msk.bf16.mxu1 %vm4787_vm0, %v6904_v27 }
 0x174   : > { %v4145_v51 = vpop.f32.mrf.mxu0  ;;  %v4063_v20 = vpop.f32.mrf.mxu1 }
 0x175   : > { %v1161_v61 = vsel %vm1142_vm3, %v1122_v8, %v1123_v22  ;;  %v844_v7 = vsel %vm827_vm2, %v807_v58, %v808_v43 }
 0x176   : > { %v5486_v29 = vadd.f32 %v1161_v61, %v881_v3  ;;  %v1018_v45 = vpop.f32.mrf.mxu0  ;;  %v709_v50 = vpop.f32.mrf.mxu1  ;;  %v883_v46 = vadd.f32 %v844_v7, %v5260_v54 }
 0x177   : > { %v1124_v38 = vrot.slane %v1018_v45, 2  ;;  %v809_v34 = vrot.slane %v709_v50, 1 }
 0x178   : > { %v4146_v12 = vpop.f32.mrf.mxu0  ;;  %v4064_v5 = vpop.f32.mrf.mxu1 }
 0x179   : > { %v1160_v63 = vsel %vm1142_vm3, %v1123_v22, %v1124_v38  ;;  %v843_v19 = vsel %vm827_vm2, %v808_v43, %v809_v34 }
 0x17a   : > { %v5493_v21 = vadd.f32 %v1160_v63, %v882_v53  ;;  %v1023_v8 = vpop.f32.mrf.mxu0  ;;  %4332 = vmatmul.mubr.msk.bf16.gmra.mxu0 %vm324_vm1, %v4875_v9  ;;  %v714_v55 = vpop.f32.mrf.mxu1  ;;  %4250 = vmatmul.mubr.msk.bf16.gmra.mxu1 %vm324_vm1, %v4889_v11  ;;  %v884_v43 = vadd.f32 %v843_v19, %v5262_v2 }
 0x17b   : > { %v1125_v58 = vrot.slane %v1023_v8, 2  ;;  %4335 = vmatprep.mubr.msk.bf16.mxu0 %vm4787_vm0, %v6904_v27  ;;  %v810_v31 = vrot.slane %v714_v55, 1  ;;  %4253 = vmatprep.mubr.msk.bf16.mxu1 %vm4787_vm0, %v6904_v27 }
 0x17c   : > { %v4149_v24 = vpop.f32.mrf.mxu0  ;;  %v4067_v47 = vpop.f32.mrf.mxu1 }
 0x17d   : > { %v1159_v26 = vsel %vm1142_vm3, %v1124_v38, %v1125_v58  ;;  %v842_v9 = vsel %vm827_vm2, %v809_v34, %v810_v31 }
 0x17e   : > { %v5508_v59 = vadd.f32 %v1159_v26, %v883_v46  ;;  %v1026_v42 = vpop.f32.mrf.mxu0  ;;  %v717_v22 = vpop.f32.mrf.mxu1  ;;  %v885_v2 = vadd.f32 %v842_v9, %v5274_v41 }
 0x17f   : > { %v1126_v3 = vrot.slane %v1026_v42, 2  ;;  %v811_v54 = vrot.slane %v717_v22, 1  ;;  %v5540_v42 = vld [vmem:[%s4839_s23 + $0x78] sm:$0xff]  }
 0x180   : > { %v4150_v51 = vpop.f32.mrf.mxu0  ;;  %v4068_v20 = vpop.f32.mrf.mxu1 }
 0x181   : > { %v1158_v61 = vsel %vm1142_vm3, %v1125_v58, %v1126_v3  ;;  %v841_v7 = vsel %vm827_vm2, %v810_v31, %v811_v54 }
 0x182   : > { %v5515_v45 = vadd.f32 %v1158_v61, %v884_v43  ;;  %v1031_v50 = vpop.f32.mrf.mxu0  ;;  %4336 = vmatmul.mubr.msk.bf16.gmra.mxu0 %vm324_vm1, %v4889_v11  ;;  %v722_v38 = vpop.f32.mrf.mxu1  ;;  %4254 = vmatmul.mubr.msk.bf16.gmra.mxu1 %vm324_vm1, %v4903_v13  ;;  %v886_v41 = vadd.f32 %v841_v7, %v5110_v28  ;;  %v5545_v28 = vld [vmem:[%s4839_s23 + $0x80] sm:$0xff]  }
 0x183   : > { %v1127_v53 = vrot.slane %v1031_v50, 2  ;;  %4339 = vmatprep.mubr.msk.bf16.mxu0 %vm4787_vm0, %v6904_v27  ;;  %v812_v34 = vrot.slane %v722_v38, 1  ;;  %4257 = vmatprep.mubr.msk.bf16.mxu1 %vm4787_vm0, %v6904_v27 }
 0x184   : > { %v4153_v12 = vpop.f32.mrf.mxu0  ;;  %v4071_v11 = vpop.f32.mrf.mxu1 }
 0x185   : > { %v1157_v63 = vsel %vm1142_vm3, %v1126_v3, %v1127_v53  ;;  %v840_v5 = vsel %vm827_vm2, %v811_v54, %v812_v34 }
 0x186   : > { %v5530_v19 = vadd.f32 %v1157_v63, %v885_v2  ;;  %v1034_v13 = vpop.f32.mrf.mxu0  ;;  %v725_v8 = vpop.f32.mrf.mxu1  ;;  %v887_v43 = vadd.f32 %v840_v5, %v5120_v32 }
 0x187   : > { %v1128_v55 = vrot.slane %v1034_v13, 2  ;;  %v813_v58 = vrot.slane %v725_v8, 1 }
 0x188   : > { %v4154_v46 = vpop.f32.mrf.mxu0  ;;  %v4072_v24 = vpop.f32.mrf.mxu1 }
 0x189   : > { %v1156_v31 = vsel %vm1142_vm3, %v1127_v53, %v1128_v55  ;;  %v839_v26 = vsel %vm827_vm2, %v812_v34, %v813_v58 }
 0x18a   : > { %v5537_v47 = vadd.f32 %v1156_v31, %v886_v41  ;;  %v1039_v9 = vpop.f32.mrf.mxu0  ;;  %4340 = vmatmul.mubr.msk.bf16.gmra.mxu0 %vm324_vm1, %v5540_v42  ;;  %v730_v22 = vpop.f32.mrf.mxu1  ;;  %4258 = vmatmul.mubr.msk.bf16.gmra.mxu1 %vm324_vm1, %v5545_v28  ;;  %v888_v32 = vadd.f32 %v839_v26, %v5126_v36 }
 0x18b   : > { %v1129_v3 = vrot.slane %v1039_v9, 2  ;;  %4343 = vmatprep.mubr.msk.bf16.mxu0 %vm4787_vm0, %v6904_v27  ;;  %v814_v54 = vrot.slane %v730_v22, 1  ;;  %4261 = vmatprep.mubr.msk.bf16.mxu1 %vm4787_vm0, %v6904_v27 }
 0x18c   : > { %v4157_v51 = vpop.f32.mrf.mxu0  ;;  %v4075_v20 = vpop.f32.mrf.mxu1 }
 0x18d   : > { %v1155_v61 = vsel %vm1142_vm3, %v1128_v55, %v1129_v3  ;;  %v838_v7 = vsel %vm827_vm2, %v813_v58, %v814_v54  ;;  %v5570_v58 = vld [vmem:[%s4839_s23 + $0x88] sm:$0xff]  }
 0x18e   : > { %v5558_v50 = vadd.f32 %v1155_v61, %v887_v43  ;;  %v1042_v38 = vpop.f32.mrf.mxu0  ;;  %v733_v53 = vpop.f32.mrf.mxu1  ;;  %v889_v36 = vadd.f32 %v838_v7, %v5136_v40 }
 0x18f   : > { %v1130_v2 = vrot.slane %v1042_v38, 2  ;;  %v815_v34 = vrot.slane %v733_v53, 1 }
 0x190   : > { %v4158_v12 = vpop.f32.mrf.mxu0  ;;  %v4076_v11 = vpop.f32.mrf.mxu1 }
 0x191   : > { %v1154_v63 = vsel %vm1142_vm3, %v1129_v3, %v1130_v2  ;;  %v837_v5 = vsel %vm827_vm2, %v814_v54, %v815_v34  ;;  %v5595_v12 = vld [vmem:[%s4839_s23 + $0x90] sm:$0xff]  }
 0x192   : > { %v5565_v13 = vadd.f32 %v1154_v63, %v888_v32  ;;  %v1047_v8 = vpop.f32.mrf.mxu0  ;;  %4344 = vmatmul.mubr.msk.bf16.gmra.mxu0 %vm324_vm1, %v5545_v28  ;;  %v738_v55 = vpop.f32.mrf.mxu1  ;;  %4262 = vmatmul.mubr.msk.bf16.gmra.mxu1 %vm324_vm1, %v5570_v58  ;;  %v890_v40 = vadd.f32 %v837_v5, %v5142_v44 }
 0x193   : > { %v1131_v41 = vrot.slane %v1047_v8, 2  ;;  %4347 = vmatprep.mubr.msk.bf16.mxu0 %vm4787_vm0, %v6904_v27  ;;  %v816_v46 = vrot.slane %v738_v55, 1  ;;  %4265 = vmatprep.mubr.msk.bf16.mxu1 %vm4787_vm0, %v6904_v27 }
 0x194   : > { %v4161_v31 = vpop.f32.mrf.mxu0  ;;  %v4079_v26 = vpop.f32.mrf.mxu1 }
 0x195   : > { %v1153_v24 = vsel %vm1142_vm3, %v1130_v2, %v1131_v41  ;;  %v836_v9 = vsel %vm827_vm2, %v815_v34, %v816_v46 }
 0x196   : > { %v5583_v22 = vadd.f32 %v1153_v24, %v889_v36  ;;  %v1050_v3 = vpop.f32.mrf.mxu0  ;;  %v741_v43 = vpop.f32.mrf.mxu1  ;;  %v891_v44 = vadd.f32 %v836_v9, %v5152_v48 }
 0x197   : > { %v1132_v54 = vrot.slane %v1050_v3, 2  ;;  %v817_v51 = vrot.slane %v741_v43, 1 }
 0x198   : > { %v4162_v61 = vpop.f32.mrf.mxu0  ;;  %v4080_v7 = vpop.f32.mrf.mxu1 }
 0x199   : > { %v1152_v20 = vsel %vm1142_vm3, %v1131_v41, %v1132_v54  ;;  %v835_v38 = vsel %vm827_vm2, %v816_v46, %v817_v51 }
 0x19a   : > { %v5590_v53 = vadd.f32 %v1152_v20, %v890_v40  ;;  %v1055_v2 = vpop.f32.mrf.mxu0  ;;  %4348 = vmatmul.mubr.msk.bf16.gmra.mxu0 %vm324_vm1, %v5570_v58  ;;  %v746_v32 = vpop.f32.mrf.mxu1  ;;  %4266 = vmatmul.mubr.msk.bf16.gmra.mxu1 %vm324_vm1, %v5595_v12  ;;  %v892_v48 = vadd.f32 %v835_v38, %v5158_v52  ;;  %v5620_v20 = vld [vmem:[%s4839_s23 + $0x98] sm:$0xff]  }
 0x19b   : > { %v1133_v34 = vrot.slane %v1055_v2, 2  ;;  %4351 = vmatprep.mubr.msk.bf16.mxu0 %vm4787_vm0, %v6904_v27  ;;  %v818_v63 = vrot.slane %v746_v32, 1  ;;  %4269 = vmatprep.mubr.msk.bf16.mxu1 %vm4787_vm0, %v6904_v27 }
 0x19c   : > { %v4165_v11 = vpop.f32.mrf.mxu0  ;;  %v4083_v8 = vpop.f32.mrf.mxu1 }
 0x19d   : > { %v1151_v5 = vsel %vm1142_vm3, %v1132_v54, %v1133_v34  ;;  %v834_v55 = vsel %vm827_vm2, %v817_v51, %v818_v63 }
 0x19e   : > { %v5608_v41 = vadd.f32 %v1151_v5, %v891_v44  ;;  %v1058_v36 = vpop.f32.mrf.mxu0  ;;  %v749_v46 = vpop.f32.mrf.mxu1  ;;  %v893_v52 = vadd.f32 %v834_v55, %v5168_v56 }
 0x19f   : > { %v1134_v31 = vrot.slane %v1058_v36, 2  ;;  %v819_v24 = vrot.slane %v749_v46, 1 }
 0x1a0   : > { %v4166_v26 = vpop.f32.mrf.mxu0  ;;  %v4084_v3 = vpop.f32.mrf.mxu1 }
 0x1a1   : > { %v1150_v9 = vsel %vm1142_vm3, %v1133_v34, %v1134_v31  ;;  %v833_v43 = vsel %vm827_vm2, %v818_v63, %v819_v24  ;;  %v5645_v3 = vld [vmem:[%s4839_s23 + $0xa0] ss:$0 sps:$4 sm:$0xff]  }
 0x1a2   : > { %v5615_v54 = vadd.f32 %v1150_v9, %v892_v48  ;;  %v1063_v40 = vpop.f32.mrf.mxu0  ;;  %4352 = vmatmul.mubr.msk.bf16.gmra.mxu0 %vm324_vm1, %v5595_v12  ;;  %v754_v51 = vpop.f32.mrf.mxu1  ;;  %4270 = vmatmul.mubr.msk.bf16.gmra.mxu1 %vm324_vm1, %v5620_v20  ;;  %v894_v56 = vadd.f32 %v833_v43, %v5174_v60 }
 0x1a3   : > { %v1135_v61 = vrot.slane %v1063_v40, 2  ;;  %4355 = vmatprep.mubr.msk.bf16.mxu0 %vm4787_vm0, %v6904_v27  ;;  %v820_v7 = vrot.slane %v754_v51, 1  ;;  %4273 = vmatprep.mubr.msk.bf16.mxu1 %vm4787_vm0, %v6904_v27 }
 0x1a4   : > { %v4169_v38 = vpop.f32.mrf.mxu0  ;;  %v4087_v32 = vpop.f32.mrf.mxu1 }
 0x1a5   : > { %v1149_v2 = vsel %vm1142_vm3, %v1134_v31, %v1135_v61  ;;  %v832_v34 = vsel %vm827_vm2, %v819_v24, %v820_v7 }
 0x1a6   : > { %v5633_v44 = vadd.f32 %v1149_v2, %v893_v52  ;;  %v1066_v63 = vpop.f32.mrf.mxu0  ;;  %v757_v11 = vpop.f32.mrf.mxu1  ;;  %v895_v60 = vadd.f32 %v832_v34, %v5184_v0 }
 0x1a7   : > { %v1136_v5 = vrot.slane %v1066_v63, 2  ;;  %v821_v8 = vrot.slane %v757_v11, 1  ;;  %v4749_v11 = vld [vmem:[%s6876_s1 + $0x38] sm:$0xff]  }
 0x1a8   : > { %v4170_v55 = vpop.f32.mrf.mxu0  ;;  %v4088_v46 = vpop.f32.mrf.mxu1 }
 0x1a9   : > { %v1148_v36 = vsel %vm1142_vm3, %v1135_v61, %v1136_v5  ;;  %v831_v31 = vsel %vm827_vm2, %v820_v7, %v821_v8 }
 0x1aa   : > { %v5640_v48 = vadd.f32 %v1148_v36, %v894_v56  ;;  %v1071_v24 = vpop.f32.mrf.mxu0  ;;  %4356 = vmatmul.mubr.msk.bf16.gmra.mxu0 %vm324_vm1, %v5620_v20  ;;  %v762_v26 = vpop.f32.mrf.mxu1  ;;  %4274 = vmatmul.mubr.msk.bf16.gmra.mxu1 %vm324_vm1, %v5645_v3  ;;  %v896_v0 = vadd.f32 %v831_v31, %v5190_v17  ;;  %v5673_v31 = vld [vmem:[%s4839_s23] sm:$0xff]  }
 0x1ab   : > { %v1137_v9 = vrot.slane %v1071_v24, 2  ;;  %4359 = vmatprep.mubr.msk.bf16.mxu0 %vm4787_vm0, %v6904_v27  ;;  %v822_v43 = vrot.slane %v762_v26, 1  ;;  %4365 = vmatprep.mubr.msk.bf16.mxu1 %vm4787_vm0, %v6904_v27 }
 0x1ac   : > { %v4173_v40 = vpop.f32.mrf.mxu0  ;;  %v4091_v61 = vpop.f32.mrf.mxu1 }
 0x1ad   : > { %v1147_v51 = vsel %vm1142_vm3, %v1136_v5, %v1137_v9  ;;  %v830_v52 = vsel %vm827_vm2, %v821_v8, %v822_v43 }
 0x1ae   : > { %v5658_v7 = vadd.f32 %v1147_v51, %v895_v60  ;;  %v1074_v38 = vpop.f32.mrf.mxu0  ;;  %v765_v2 = vpop.f32.mrf.mxu1  ;;  %v897_v24 = vadd.f32 %v830_v52, %v5200_v30  ;;  %v4750_v30 = vld [vmem:[%s6876_s1 + $0x40] sm:$0xff]  }
 0x1af   : > { %v1138_v32 = vrot.slane %v1074_v38, 2  ;;  %v823_v34 = vrot.slane %v765_v2, 1  ;;  %v6905_v52 = vld [vmem:[#allocation2_spill] sm:$0xff] }
 0x1b0   : > { %v4174_v63 = vpop.f32.mrf.mxu0  ;;  %v4092_v56 = vpop.f32.mrf.mxu1 }
 0x1b1   : > { %v1146_v5 = vsel %vm1142_vm3, %v1137_v9, %v1138_v32  ;;  %v829_v8 = vsel %vm827_vm2, %v822_v43, %v823_v34 }
 0x1b2   : > { %v5668_v55 = vadd.f32 %v1146_v5, %v896_v0  ;;  %v1079_v36 = vpop.f32.mrf.mxu0  ;;  %4360 = vmatmul.mubr.msk.bf16.gmra.mxu0 %vm324_vm1, %v5645_v3  ;;  %v770_v17 = vpop.f32.mrf.mxu1  ;;  %4366 = vmatmul.mubr.msk.bf16.vlgmr.msra.gmra.mxu1 %vm324_vm1, %v5673_v31  ;;  %v898_v0 = vadd.f32 %v829_v8, %v6905_v52  ;;  %v6906_v8 = vld [vmem:[#allocation3_spill] sm:$0xff] }
 0x1b3   : > { %v1139_v46 = vrot.slane %v1079_v36, 2  ;;  %4451 = vmatprep.mubr.msk.bf16.mxu0 %vm4787_vm0, %v6904_v27  ;;  %v824_v26 = vrot.slane %v770_v17, 1  ;;  %4536 = vmatpush3.bf16.msra.mxu1 %v4749_v11  ;;  %v5699_v17 = vld [vmem:[%s4839_s23 + $0x8] sm:$0xff]  }
 0x1b4   : > { %v4177_v9 = vpop.f32.mrf.mxu0  ;;  %4369 = vmatprep.mubr.msk.bf16.mxu1 %vm4787_vm0, %v6904_v27  ;;  %v4095_v43 = vpop.f32.mrf.mxu1 }
 0x1b5   : > { %v1145_v60 = vsel %vm1142_vm3, %v1138_v32, %v1139_v46  ;;  %v828_v40 = vsel %vm827_vm2, %v823_v34, %v824_v26 }
 0x1b6   : > { %v5686_v51 = vadd.f32 %v1145_v60, %v897_v24  ;;  %v1082_v61 = vpop.f32.mrf.mxu0  ;;  %v773_v38 = vpop.f32.mrf.mxu1  ;;  %v899_v24 = vadd.f32 %v828_v40, %v6906_v8 }
 0x1b7   : > { %v1140_v2 = vrot.slane %v1082_v61, 2 }
 0x1b8   : > { %v4178_v63 = vpop.f32.mrf.mxu0  ;;  %v4096_v11 = vpop.f32.mrf.mxu1 }
 0x1b9   : > { %v1144_v32 = vsel %vm1142_vm3, %v1139_v46, %v1140_v2 }
 0x1ba   : > { %v5694_v5 = vadd.f32 %v1144_v32, %v898_v0  ;;  %v1087_v56 = vpop.f32.mrf.mxu0  ;;  %4452 = vmatmul.mubr.msk.bf16.vlgmr.msra.gmra.mxu0 %vm324_vm1, %v5673_v31  ;;  %v777_v34 = vpop.f32.mrf.mxu1  ;;  %4370 = vmatmul.mubr.msk.bf16.gmra.mxu1 %vm324_vm1, %v5699_v17  ;;  %v5715_v0 = vld [vmem:[%s4839_s23 + $0x10] sm:$0xff]  }
 0x1bb   : > { %v1141_v36 = vrot.slane %v1087_v56, 2  ;;  %4622 = vmatpush3.bf16.msra.mxu0 %v4750_v30  ;;  %4373 = vmatprep.mubr.msk.bf16.mxu1 %vm4787_vm0, %v6904_v27 }
 0x1bc   : > { %v4181_v26 = vpop.f32.mrf.mxu0  ;;  %4455 = vmatprep.mubr.msk.bf16.mxu0 %vm4787_vm0, %v6904_v27  ;;  %v4099_v9 = vpop.f32.mrf.mxu1 }
 0x1bd   : > { %v1143_v46 = vsel %vm1142_vm3, %v1140_v2, %v1141_v36 }
 0x1be   : > { %v5710_v60 = vadd.f32 %v1143_v46, %v899_v24  ;;  %v1090_v43 = vpop.f32.mrf.mxu0  ;;  %v779_v61 = vpop.f32.mrf.mxu1  ;;  %v5726_v24 = vld [vmem:[%s4839_s23 + $0x18] sm:$0xff]  }
 0x1c0   : > { %v4182_v38 = vpop.f32.mrf.mxu0  ;;  %v4100_v52 = vpop.f32.mrf.mxu1 }
 0x1c2   : > { %v1094_v30 = vpop.f32.mrf.mxu0  ;;  %4456 = vmatmul.mubr.msk.bf16.gmra.mxu0 %vm324_vm1, %v5699_v17  ;;  %v783_v40 = vpop.f32.mrf.mxu1  ;;  %4374 = vmatmul.mubr.msk.bf16.gmra.mxu1 %vm324_vm1, %v5715_v0 }
 0x1c3   : > { %4459 = vmatprep.mubr.msk.bf16.mxu0 %vm4787_vm0, %v6904_v27  ;;  %4377 = vmatprep.mubr.msk.bf16.mxu1 %vm4787_vm0, %v6904_v27  ;;  %v5737_v40 = vld [vmem:[%s4839_s23 + $0x20] sm:$0xff]  }
 0x1c4   : > { %v4185_v2 = vpop.f32.mrf.mxu0  ;;  %v4103_v63 = vpop.f32.mrf.mxu1  ;;  %6907 = vst [vmem:[#allocation2_spill] sm:$0xff] %v5737_v40 }
 0x1c6   : > { %v1096_v32 = vpop.f32.mrf.mxu0  ;;  %v785_v11 = vpop.f32.mrf.mxu1 }
 0x1c8   : > { %v4186_v56 = vpop.f32.mrf.mxu0  ;;  %v4104_v34 = vpop.f32.mrf.mxu1 }
 0x1ca   : > { %v1100_v36 = vpop.f32.mrf.mxu0  ;;  %4460 = vmatmul.mubr.msk.bf16.gmra.mxu0 %vm324_vm1, %v5715_v0  ;;  %v1258_v8 = vpop.f32.mrf.mxu1  ;;  %4378 = vmatmul.mubr.msk.bf16.gmra.mxu1 %vm324_vm1, %v5726_v24 }
 0x1cb   : > { %4463 = vmatprep.mubr.msk.bf16.mxu0 %vm4787_vm0, %v6904_v27  ;;  %4381 = vmatprep.mubr.msk.bf16.mxu1 %vm4787_vm0, %v6904_v27 }
 0x1cc   : > { %v4189_v26 = vpop.f32.mrf.mxu0  ;;  %v4195_v46 = vpop.f32.mrf.mxu1 }
 0x1ce   : > { %v1102_v9 = vpop.f32.mrf.mxu0  ;;  %v1260_v43 = vpop.f32.mrf.mxu1 }
 0x1cf   : > { %v6908_v9 = vld [vmem:[#allocation4_spill] sm:$0xff] }
 0x1d0   : > { %v4190_v61 = vpop.f32.mrf.mxu0  ;;  %v4196_v38 = vpop.f32.mrf.mxu1 }
 0x1d1   : > { %v5751_v38 = vld [vmem:[%s4839_s23 + $0x28] sm:$0xff]  }
 0x1d2   : > { %v1572_v52 = vpop.f32.mrf.mxu0  ;;  %4464 = vmatmul.mubr.msk.bf16.gmra.mxu0 %vm324_vm1, %v5726_v24  ;;  %v1264_v30 = vpop.f32.mrf.mxu1  ;;  %4382 = vmatmul.mubr.msk.bf16.gmra.mxu1 %vm324_vm1, %v5737_v40  ;;  %6909 = vst [vmem:[#allocation3_spill] sm:$0xff] %v5751_v38 }
 0x1d3   : > { %4467 = vmatprep.mubr.msk.bf16.mxu0 %vm4787_vm0, %v6904_v27  ;;  %4385 = vmatprep.mubr.msk.bf16.mxu1 %vm4787_vm0, %v6904_v27  ;;  %v1420_v32 = vrot.slane %v1264_v30, 2 }
 0x1d4   : > { %v4281_v2 = vpop.f32.mrf.mxu0  ;;  %v4199_v63 = vpop.f32.mrf.mxu1 }
 0x1d6   : > { %v1574_v11 = vpop.f32.mrf.mxu0  ;;  %v1267_v56 = vpop.f32.mrf.mxu1 }
 0x1d7   : > { %v1421_v34 = vrot.slane %v1267_v56, 2 }
 0x1d8   : > { %v4282_v36 = vpop.f32.mrf.mxu0  ;;  %v4200_v8 = vpop.f32.mrf.mxu1 }
 0x1d9   : > { %v1492_v26 = vsel %vm1142_vm3, %v1420_v32, %v1421_v34 }
 0x1da   : > { %v1578_v46 = vpop.f32.mrf.mxu0  ;;  %4468 = vmatmul.mubr.msk.bf16.gmra.mxu0 %vm324_vm1, %v5737_v40  ;;  %v1493_v43 = vadd.f32 %v1492_v26, %v6908_v9  ;;  %v1272_v61 = vpop.f32.mrf.mxu1  ;;  %4386 = vmatmul.mubr.msk.bf16.gmra.mxu1 %vm324_vm1, %v5751_v38 }
 0x1db   : > { %4471 = vmatprep.mubr.msk.bf16.mxu0 %vm4787_vm0, %v6904_v27  ;;  %v1422_v52 = vrot.slane %v1272_v61, 2  ;;  %4389 = vmatprep.mubr.msk.bf16.mxu1 %vm4787_vm0, %v6904_v27  ;;  %v1734_v56 = vrot.slane %v1578_v46, 3 }
 0x1dc   : > { %v4285_v30 = vpop.f32.mrf.mxu0  ;;  %v4203_v2 = vpop.f32.mrf.mxu1 }
 0x1dd   : > { %v1491_v63 = vsel %vm1142_vm3, %v1421_v34, %v1422_v52 }
 0x1de   : > { %v1581_v32 = vpop.f32.mrf.mxu0  ;;  %v1494_v11 = vadd.f32 %v1491_v63, %v5310_v37  ;;  %v1275_v36 = vpop.f32.mrf.mxu1 }
 0x1df   : > { %v1735_v8 = vrot.slane %v1581_v32, 3  ;;  %v1423_v26 = vrot.slane %v1275_v36, 2  ;;  %v5773_v32 = vld [vmem:[%s4839_s23 + $0x30] sm:$0xff]  }
 0x1e0   : > { %v4286_v9 = vpop.f32.mrf.mxu0  ;;  %v4204_v30 = vpop.f32.mrf.mxu1  ;;  %6911 = vst [vmem:[#allocation5_spill] sm:$0xff] %v5773_v32 }
 0x1e1   : > { %v1807_v61 = vsel %vm1771_vm4, %v1734_v56, %v1735_v8  ;;  %v1490_v2 = vsel %vm1142_vm3, %v1422_v52, %v1423_v26 }
 0x1e2   : > { %v5767_v40 = vadd.f32 %v1807_v61, %v1493_v43  ;;  %v1586_v34 = vpop.f32.mrf.mxu0  ;;  %4472 = vmatmul.mubr.msk.bf16.gmra.mxu0 %vm324_vm1, %v5751_v38  ;;  %v1495_v37 = vadd.f32 %v1490_v2, %v5317_v10  ;;  %v1280_v46 = vpop.f32.mrf.mxu1  ;;  %4390 = vmatmul.mubr.msk.bf16.gmra.mxu1 %vm324_vm1, %v5773_v32 }
 0x1e3   : > { %v1736_v63 = vrot.slane %v1586_v34, 3  ;;  %4475 = vmatprep.mubr.msk.bf16.mxu0 %vm4787_vm0, %v6904_v27  ;;  %v1424_v56 = vrot.slane %v1280_v46, 2  ;;  %4393 = vmatprep.mubr.msk.bf16.mxu1 %vm4787_vm0, %v6904_v27 }
 0x1e4   : > { %6910 = vst [vmem:[#allocation4_spill] sm:$0xff] %v5767_v40  ;;  %v4289_v52 = vpop.f32.mrf.mxu0  ;;  %v4207_v36 = vpop.f32.mrf.mxu1 }
 0x1e5   : > { %v1806_v43 = vsel %vm1771_vm4, %v1735_v8, %v1736_v63  ;;  %v1489_v10 = vsel %vm1142_vm3, %v1423_v26, %v1424_v56 }
 0x1e6   : > { %v5785_v9 = vadd.f32 %v1806_v43, %v1494_v11  ;;  %v1589_v61 = vpop.f32.mrf.mxu0  ;;  %v1496_v30 = vadd.f32 %v1489_v10, %v5332_v14  ;;  %v1283_v2 = vpop.f32.mrf.mxu1  ;;  %v5798_v10 = vld [vmem:[%s4839_s23 + $0x38] sm:$0xff]  }
 0x1e7   : > { %v1737_v34 = vrot.slane %v1589_v61, 3  ;;  %v1425_v46 = vrot.slane %v1283_v2, 2  ;;  %6912 = vst [vmem:[#allocation6_spill] sm:$0xff] %v5798_v10 }
 0x1e8   : > { %v4290_v52 = vpop.f32.mrf.mxu0  ;;  %v4208_v40 = vpop.f32.mrf.mxu1 }
 0x1e9   : > { %v1805_v38 = vsel %vm1771_vm4, %v1736_v63, %v1737_v34  ;;  %v1488_v8 = vsel %vm1142_vm3, %v1424_v56, %v1425_v46 }
 0x1ea   : > { %v5792_v36 = vadd.f32 %v1805_v38, %v1495_v37  ;;  %v1594_v26 = vpop.f32.mrf.mxu0  ;;  %4476 = vmatmul.mubr.msk.bf16.gmra.mxu0 %vm324_vm1, %v5773_v32  ;;  %v1497_v11 = vadd.f32 %v1488_v8, %v5339_v49  ;;  %v1288_v14 = vpop.f32.mrf.mxu1  ;;  %4394 = vmatmul.mubr.msk.bf16.gmra.mxu1 %vm324_vm1, %v5798_v10 }
 0x1eb   : > { %v1738_v43 = vrot.slane %v1594_v26, 3  ;;  %4479 = vmatprep.mubr.msk.bf16.mxu0 %vm4787_vm0, %v6904_v27  ;;  %v1426_v40 = vrot.slane %v1288_v14, 2  ;;  %4397 = vmatprep.mubr.msk.bf16.mxu1 %vm4787_vm0, %v6904_v27 }
 0x1ec   : > { %v4293_v63 = vpop.f32.mrf.mxu0  ;;  %v4211_v37 = vpop.f32.mrf.mxu1 }
 0x1ed   : > { %v1804_v38 = vsel %vm1771_vm4, %v1737_v34, %v1738_v43  ;;  %v1487_v49 = vsel %vm1142_vm3, %v1425_v46, %v1426_v40 }
 0x1ee   : > { %v5810_v56 = vadd.f32 %v1804_v38, %v1496_v30  ;;  %v1597_v61 = vpop.f32.mrf.mxu0  ;;  %v1498_v2 = vadd.f32 %v1487_v49, %v5354_v23  ;;  %v1291_v52 = vpop.f32.mrf.mxu1  ;;  %v5823_v49 = vld [vmem:[%s4839_s23 + $0x40] sm:$0xff]  }
 0x1ef   : > { %v1739_v8 = vrot.slane %v1597_v61, 3  ;;  %v1427_v26 = vrot.slane %v1291_v52, 2  ;;  %6913 = vst [vmem:[#allocation7_spill] sm:$0xff] %v5823_v49 }
 0x1f0   : > { %v4294_v14 = vpop.f32.mrf.mxu0  ;;  %v4212_v32 = vpop.f32.mrf.mxu1 }
 0x1f1   : > { %v1803_v63 = vsel %vm1771_vm4, %v1738_v43, %v1739_v8  ;;  %v1486_v34 = vsel %vm1142_vm3, %v1426_v40, %v1427_v26 }
 0x1f2   : > { %v5817_v37 = vadd.f32 %v1803_v63, %v1497_v11  ;;  %v1602_v46 = vpop.f32.mrf.mxu0  ;;  %4480 = vmatmul.mubr.msk.bf16.gmra.mxu0 %vm324_vm1, %v5798_v10  ;;  %v1499_v30 = vadd.f32 %v1486_v34, %v5361_v57  ;;  %v1296_v23 = vpop.f32.mrf.mxu1  ;;  %4398 = vmatmul.mubr.msk.bf16.gmra.mxu1 %vm324_vm1, %v5823_v49 }
 0x1f3   : > { %v1740_v38 = vrot.slane %v1602_v46, 3  ;;  %4483 = vmatprep.mubr.msk.bf16.mxu0 %vm4787_vm0, %v6904_v27  ;;  %v1428_v32 = vrot.slane %v1296_v23, 2  ;;  %4401 = vmatprep.mubr.msk.bf16.mxu1 %vm4787_vm0, %v6904_v27 }
 0x1f4   : > { %v4297_v43 = vpop.f32.mrf.mxu0  ;;  %v4215_v40 = vpop.f32.mrf.mxu1 }
 0x1f5   : > { %v1802_v11 = vsel %vm1771_vm4, %v1739_v8, %v1740_v38  ;;  %v1485_v57 = vsel %vm1142_vm3, %v1427_v26, %v1428_v32 }
 0x1f6   : > { %v5835_v61 = vadd.f32 %v1802_v11, %v1498_v2  ;;  %v1605_v52 = vpop.f32.mrf.mxu0  ;;  %v1500_v14 = vadd.f32 %v1485_v57, %v5376_v6  ;;  %v1299_v63 = vpop.f32.mrf.mxu1  ;;  %v5848_v57 = vld [vmem:[%s4839_s23 + $0x48] sm:$0xff]  }
 0x1f7   : > { %v1741_v34 = vrot.slane %v1605_v52, 3  ;;  %v1429_v46 = vrot.slane %v1299_v63, 2  ;;  %6914 = vst [vmem:[#allocation8_spill] sm:$0xff] %v5848_v57 }
 0x1f8   : > { %v4298_v23 = vpop.f32.mrf.mxu0  ;;  %v4216_v10 = vpop.f32.mrf.mxu1 }
 0x1f9   : > { %v1801_v43 = vsel %vm1771_vm4, %v1740_v38, %v1741_v34  ;;  %v1484_v8 = vsel %vm1142_vm3, %v1428_v32, %v1429_v46 }
 0x1fa   : > { %v5842_v40 = vadd.f32 %v1801_v43, %v1499_v30  ;;  %v1610_v26 = vpop.f32.mrf.mxu0  ;;  %4484 = vmatmul.mubr.msk.bf16.gmra.mxu0 %vm324_vm1, %v5823_v49  ;;  %v1501_v2 = vadd.f32 %v1484_v8, %v5383_v33  ;;  %v1304_v6 = vpop.f32.mrf.mxu1  ;;  %4402 = vmatmul.mubr.msk.bf16.gmra.mxu1 %vm324_vm1, %v5848_v57 }
 0x1fb   : > { %v1742_v11 = vrot.slane %v1610_v26, 3  ;;  %4487 = vmatprep.mubr.msk.bf16.mxu0 %vm4787_vm0, %v6904_v27  ;;  %v1430_v10 = vrot.slane %v1304_v6, 2  ;;  %4405 = vmatprep.mubr.msk.bf16.mxu1 %vm4787_vm0, %v6904_v27 }
 0x1fc   : > { %v4301_v38 = vpop.f32.mrf.mxu0  ;;  %v4219_v32 = vpop.f32.mrf.mxu1 }
 0x1fd   : > { %v1800_v30 = vsel %vm1771_vm4, %v1741_v34, %v1742_v11  ;;  %v1483_v33 = vsel %vm1142_vm3, %v1429_v46, %v1430_v10 }
 0x1fe   : > { %v5860_v52 = vadd.f32 %v1800_v30, %v1500_v14  ;;  %v1613_v63 = vpop.f32.mrf.mxu0  ;;  %v1502_v23 = vadd.f32 %v1483_v33, %v5398_v35  ;;  %v1307_v43 = vpop.f32.mrf.mxu1  ;;  %v5873_v33 = vld [vmem:[%s4839_s23 + $0x50] sm:$0xff]  }
 0x1ff   : > { %v1743_v8 = vrot.slane %v1613_v63, 3  ;;  %v1431_v26 = vrot.slane %v1307_v43, 2  ;;  %6915 = vst [vmem:[#allocation9_spill] sm:$0xff] %v5873_v33 }
 0x200   : > { %v4302_v6 = vpop.f32.mrf.mxu0  ;;  %v4220_v49 = vpop.f32.mrf.mxu1 }
 0x201   : > { %v1799_v38 = vsel %vm1771_vm4, %v1742_v11, %v1743_v8  ;;  %v1482_v34 = vsel %vm1142_vm3, %v1430_v10, %v1431_v26 }
 0x202   : > { %v5867_v32 = vadd.f32 %v1799_v38, %v1501_v2  ;;  %v1618_v46 = vpop.f32.mrf.mxu0  ;;  %4488 = vmatmul.mubr.msk.bf16.gmra.mxu0 %vm324_vm1, %v5848_v57  ;;  %v1503_v14 = vadd.f32 %v1482_v34, %v5405_v1  ;;  %v1312_v35 = vpop.f32.mrf.mxu1  ;;  %4406 = vmatmul.mubr.msk.bf16.gmra.mxu1 %vm324_vm1, %v5873_v33 }
 0x203   : > { %v1744_v30 = vrot.slane %v1618_v46, 3  ;;  %4491 = vmatprep.mubr.msk.bf16.mxu0 %vm4787_vm0, %v6904_v27  ;;  %v1432_v49 = vrot.slane %v1312_v35, 2  ;;  %4409 = vmatprep.mubr.msk.bf16.mxu1 %vm4787_vm0, %v6904_v27 }
 0x204   : > { %v4305_v11 = vpop.f32.mrf.mxu0  ;;  %v4223_v10 = vpop.f32.mrf.mxu1 }
 0x205   : > { %v1798_v2 = vsel %vm1771_vm4, %v1743_v8, %v1744_v30  ;;  %v1481_v1 = vsel %vm1142_vm3, %v1431_v26, %v1432_v49 }
 0x206   : > { %v5885_v63 = vadd.f32 %v1798_v2, %v1502_v23  ;;  %v1621_v43 = vpop.f32.mrf.mxu0  ;;  %v1504_v6 = vadd.f32 %v1481_v1, %v5420_v62  ;;  %v1315_v38 = vpop.f32.mrf.mxu1  ;;  %v5898_v1 = vld [vmem:[%s4839_s23 + $0x58] sm:$0xff]  }
 0x207   : > { %v1745_v34 = vrot.slane %v1621_v43, 3  ;;  %v1433_v46 = vrot.slane %v1315_v38, 2  ;;  %6916 = vst [vmem:[#allocation10_spill] sm:$0xff] %v5898_v1 }
 0x208   : > { %v4306_v35 = vpop.f32.mrf.mxu0  ;;  %v4224_v57 = vpop.f32.mrf.mxu1 }
 0x209   : > { %v1797_v11 = vsel %vm1771_vm4, %v1744_v30, %v1745_v34  ;;  %v1480_v8 = vsel %vm1142_vm3, %v1432_v49, %v1433_v46 }
 0x20a   : > { %v5892_v10 = vadd.f32 %v1797_v11, %v1503_v14  ;;  %v1626_v26 = vpop.f32.mrf.mxu0  ;;  %4492 = vmatmul.mubr.msk.bf16.gmra.mxu0 %vm324_vm1, %v5873_v33  ;;  %v1505_v23 = vadd.f32 %v1480_v8, %v5427_v18  ;;  %v1320_v62 = vpop.f32.mrf.mxu1  ;;  %4410 = vmatmul.mubr.msk.bf16.gmra.mxu1 %vm324_vm1, %v5898_v1 }
 0x20b   : > { %v1746_v2 = vrot.slane %v1626_v26, 3  ;;  %4495 = vmatprep.mubr.msk.bf16.mxu0 %vm4787_vm0, %v6904_v27  ;;  %v1434_v57 = vrot.slane %v1320_v62, 2  ;;  %4413 = vmatprep.mubr.msk.bf16.mxu1 %vm4787_vm0, %v6904_v27 }
 0x20c   : > { %v4309_v30 = vpop.f32.mrf.mxu0  ;;  %v4227_v49 = vpop.f32.mrf.mxu1 }
 0x20d   : > { %v1796_v14 = vsel %vm1771_vm4, %v1745_v34, %v1746_v2  ;;  %v1479_v18 = vsel %vm1142_vm3, %v1433_v46, %v1434_v57 }
 0x20e   : > { %v5910_v43 = vadd.f32 %v1796_v14, %v1504_v6  ;;  %v1629_v38 = vpop.f32.mrf.mxu0  ;;  %v1506_v35 = vadd.f32 %v1479_v18, %v5442_v15  ;;  %v1323_v11 = vpop.f32.mrf.mxu1  ;;  %v5923_v18 = vld [vmem:[%s4839_s23 + $0x60] sm:$0xff]  }
 0x20f   : > { %v1747_v8 = vrot.slane %v1629_v38, 3  ;;  %v1435_v26 = vrot.slane %v1323_v11, 2  ;;  %6917 = vst [vmem:[#allocation11_spill] sm:$0xff] %v5923_v18 }
 0x210   : > { %v4310_v62 = vpop.f32.mrf.mxu0  ;;  %v4228_v33 = vpop.f32.mrf.mxu1 }
 0x211   : > { %v1795_v30 = vsel %vm1771_vm4, %v1746_v2, %v1747_v8  ;;  %v1478_v34 = vsel %vm1142_vm3, %v1434_v57, %v1435_v26 }
 0x212   : > { %v5917_v49 = vadd.f32 %v1795_v30, %v1505_v23  ;;  %v1634_v46 = vpop.f32.mrf.mxu0  ;;  %4496 = vmatmul.mubr.msk.bf16.gmra.mxu0 %vm324_vm1, %v5898_v1  ;;  %v1507_v6 = vadd.f32 %v1478_v34, %v5449_v4  ;;  %v1328_v15 = vpop.f32.mrf.mxu1  ;;  %4414 = vmatmul.mubr.msk.bf16.gmra.mxu1 %vm324_vm1, %v5923_v18 }
 0x213   : > { %v1748_v14 = vrot.slane %v1634_v46, 3  ;;  %4499 = vmatprep.mubr.msk.bf16.mxu0 %vm4787_vm0, %v6904_v27  ;;  %v1436_v33 = vrot.slane %v1328_v15, 2  ;;  %4417 = vmatprep.mubr.msk.bf16.mxu1 %vm4787_vm0, %v6904_v27 }
 0x214   : > { %v4313_v2 = vpop.f32.mrf.mxu0  ;;  %v4231_v57 = vpop.f32.mrf.mxu1 }
 0x215   : > { %v1794_v23 = vsel %vm1771_vm4, %v1747_v8, %v1748_v14  ;;  %v1477_v4 = vsel %vm1142_vm3, %v1435_v26, %v1436_v33 }
 0x216   : > { %v5935_v38 = vadd.f32 %v1794_v23, %v1506_v35  ;;  %v1637_v11 = vpop.f32.mrf.mxu0  ;;  %v1508_v62 = vadd.f32 %v1477_v4, %v5464_v16  ;;  %v1331_v30 = vpop.f32.mrf.mxu1  ;;  %v5948_v4 = vld [vmem:[%s4839_s23 + $0x68] sm:$0xff]  }
 0x217   : > { %v1749_v34 = vrot.slane %v1637_v11, 3  ;;  %v1437_v46 = vrot.slane %v1331_v30, 2  ;;  %6918 = vst [vmem:[#allocation12_spill] sm:$0xff] %v5948_v4 }
 0x218   : > { %v4314_v15 = vpop.f32.mrf.mxu0  ;;  %v4232_v1 = vpop.f32.mrf.mxu1 }
 0x219   : > { %v1793_v2 = vsel %vm1771_vm4, %v1748_v14, %v1749_v34  ;;  %v1476_v8 = vsel %vm1142_vm3, %v1436_v33, %v1437_v46 }
 0x21a   : > { %v5942_v57 = vadd.f32 %v1793_v2, %v1507_v6  ;;  %v1642_v26 = vpop.f32.mrf.mxu0  ;;  %4500 = vmatmul.mubr.msk.bf16.gmra.mxu0 %vm324_vm1, %v5923_v18  ;;  %v1509_v35 = vadd.f32 %v1476_v8, %v5471_v39  ;;  %v1336_v16 = vpop.f32.mrf.mxu1  ;;  %4418 = vmatmul.mubr.msk.bf16.gmra.mxu1 %vm324_vm1, %v5948_v4 }
 0x21b   : > { %v1750_v23 = vrot.slane %v1642_v26, 3  ;;  %4503 = vmatprep.mubr.msk.bf16.mxu0 %vm4787_vm0, %v6904_v27  ;;  %v1438_v1 = vrot.slane %v1336_v16, 2  ;;  %4421 = vmatprep.mubr.msk.bf16.mxu1 %vm4787_vm0, %v6904_v27 }
 0x21c   : > { %v4317_v14 = vpop.f32.mrf.mxu0  ;;  %v4235_v33 = vpop.f32.mrf.mxu1 }
 0x21d   : > { %v1792_v6 = vsel %vm1771_vm4, %v1749_v34, %v1750_v23  ;;  %v1475_v39 = vsel %vm1142_vm3, %v1437_v46, %v1438_v1 }
 0x21e   : > { %v5960_v11 = vadd.f32 %v1792_v6, %v1508_v62  ;;  %v1645_v30 = vpop.f32.mrf.mxu0  ;;  %v1510_v15 = vadd.f32 %v1475_v39, %v5486_v29  ;;  %v1339_v2 = vpop.f32.mrf.mxu1  ;;  %v5973_v39 = vld [vmem:[%s4839_s23 + $0x70] sm:$0xff]  }
 0x21f   : > { %v1751_v8 = vrot.slane %v1645_v30, 3  ;;  %v1439_v26 = vrot.slane %v1339_v2, 2 }
 0x220   : > { %v4318_v16 = vpop.f32.mrf.mxu0  ;;  %v4236_v18 = vpop.f32.mrf.mxu1 }
 0x221   : > { %v1791_v14 = vsel %vm1771_vm4, %v1750_v23, %v1751_v8  ;;  %v1474_v34 = vsel %vm1142_vm3, %v1438_v1, %v1439_v26 }
 0x222   : > { %v5967_v33 = vadd.f32 %v1791_v14, %v1509_v35  ;;  %v1650_v46 = vpop.f32.mrf.mxu0  ;;  %4504 = vmatmul.mubr.msk.bf16.gmra.mxu0 %vm324_vm1, %v5948_v4  ;;  %v1511_v62 = vadd.f32 %v1474_v34, %v5493_v21  ;;  %v1344_v29 = vpop.f32.mrf.mxu1  ;;  %4422 = vmatmul.mubr.msk.bf16.gmra.mxu1 %vm324_vm1, %v5973_v39 }
 0x223   : > { %v1752_v6 = vrot.slane %v1650_v46, 3  ;;  %4507 = vmatprep.mubr.msk.bf16.mxu0 %vm4787_vm0, %v6904_v27  ;;  %v1440_v18 = vrot.slane %v1344_v29, 2  ;;  %4425 = vmatprep.mubr.msk.bf16.mxu1 %vm4787_vm0, %v6904_v27 }
 0x224   : > { %6919 = vst [vmem:[#allocation13_spill] sm:$0xff] %v5967_v33  ;;  %v4321_v23 = vpop.f32.mrf.mxu0  ;;  %v4239_v1 = vpop.f32.mrf.mxu1 }
 0x225   : > { %v1790_v35 = vsel %vm1771_vm4, %v1751_v8, %v1752_v6  ;;  %v1473_v21 = vsel %vm1142_vm3, %v1439_v26, %v1440_v18 }
 0x226   : > { %v5985_v30 = vadd.f32 %v1790_v35, %v1510_v15  ;;  %v1653_v2 = vpop.f32.mrf.mxu0  ;;  %v1512_v16 = vadd.f32 %v1473_v21, %v5508_v59  ;;  %v1347_v14 = vpop.f32.mrf.mxu1 }
 0x227   : > { %v1753_v34 = vrot.slane %v1653_v2, 3  ;;  %v1441_v46 = vrot.slane %v1347_v14, 2 }
 0x228   : > { %v4322_v29 = vpop.f32.mrf.mxu0  ;;  %v4240_v4 = vpop.f32.mrf.mxu1 }
 0x229   : > { %v1789_v23 = vsel %vm1771_vm4, %v1752_v6, %v1753_v34  ;;  %v1472_v8 = vsel %vm1142_vm3, %v1440_v18, %v1441_v46 }
 0x22a   : > { %v5992_v1 = vadd.f32 %v1789_v23, %v1511_v62  ;;  %v1658_v33 = vpop.f32.mrf.mxu0  ;;  %4508 = vmatmul.mubr.msk.bf16.gmra.mxu0 %vm324_vm1, %v5973_v39  ;;  %v1513_v15 = vadd.f32 %v1472_v8, %v5515_v45  ;;  %v1352_v59 = vpop.f32.mrf.mxu1  ;;  %4426 = vmatmul.mubr.msk.bf16.gmra.mxu1 %vm324_vm1, %v5540_v42 }
 0x22b   : > { %v1754_v26 = vrot.slane %v1658_v33, 3  ;;  %4511 = vmatprep.mubr.msk.bf16.mxu0 %vm4787_vm0, %v6904_v27  ;;  %v1442_v4 = vrot.slane %v1352_v59, 2  ;;  %4429 = vmatprep.mubr.msk.bf16.mxu1 %vm4787_vm0, %v6904_v27 }
 0x22c   : > { %v4325_v6 = vpop.f32.mrf.mxu0  ;;  %v4243_v18 = vpop.f32.mrf.mxu1 }
 0x22d   : > { %v1788_v62 = vsel %vm1771_vm4, %v1753_v34, %v1754_v26  ;;  %v1471_v45 = vsel %vm1142_vm3, %v1441_v46, %v1442_v4 }
 0x22e   : > { %v6007_v35 = vadd.f32 %v1788_v62, %v1512_v16  ;;  %v1661_v33 = vpop.f32.mrf.mxu0  ;;  %v1514_v21 = vadd.f32 %v1471_v45, %v5530_v19  ;;  %v1355_v2 = vpop.f32.mrf.mxu1 }
 0x22f   : > { %v1755_v14 = vrot.slane %v1661_v33, 3  ;;  %v1443_v29 = vrot.slane %v1355_v2, 2 }
 0x230   : > { %v4326_v23 = vpop.f32.mrf.mxu0  ;;  %v4244_v59 = vpop.f32.mrf.mxu1 }
 0x231   : > { %v1787_v8 = vsel %vm1771_vm4, %v1754_v26, %v1755_v14  ;;  %v1470_v34 = vsel %vm1142_vm3, %v1442_v4, %v1443_v29 }
 0x232   : > { %v6014_v6 = vadd.f32 %v1787_v8, %v1513_v15  ;;  %v1666_v18 = vpop.f32.mrf.mxu0  ;;  %4512 = vmatmul.mubr.msk.bf16.gmra.mxu0 %vm324_vm1, %v5540_v42  ;;  %v1515_v16 = vadd.f32 %v1470_v34, %v5537_v47  ;;  %v1360_v19 = vpop.f32.mrf.mxu1  ;;  %4430 = vmatmul.mubr.msk.bf16.gmra.mxu1 %vm324_vm1, %v5545_v28 }
 0x233   : > { %v1756_v46 = vrot.slane %v1666_v18, 3  ;;  %4515 = vmatprep.mubr.msk.bf16.mxu0 %vm4787_vm0, %v6904_v27  ;;  %v1444_v26 = vrot.slane %v1360_v19, 2  ;;  %4433 = vmatprep.mubr.msk.bf16.mxu1 %vm4787_vm0, %v6904_v27 }
 0x234   : > { %v4329_v62 = vpop.f32.mrf.mxu0  ;;  %v4247_v4 = vpop.f32.mrf.mxu1 }
 0x235   : > { %v1786_v15 = vsel %vm1771_vm4, %v1755_v14, %v1756_v46  ;;  %v1469_v47 = vsel %vm1142_vm3, %v1443_v29, %v1444_v26 }
 0x236   : > { %v6029_v42 = vadd.f32 %v1786_v15, %v1514_v21  ;;  %v1669_v45 = vpop.f32.mrf.mxu0  ;;  %v1516_v33 = vadd.f32 %v1469_v47, %v5558_v50  ;;  %v1363_v2 = vpop.f32.mrf.mxu1 }
 0x237   : > { %v1757_v23 = vrot.slane %v1669_v45, 3  ;;  %v1445_v8 = vrot.slane %v1363_v2, 2 }
 0x238   : > { %v4330_v59 = vpop.f32.mrf.mxu0  ;;  %v4248_v18 = vpop.f32.mrf.mxu1 }
 0x239   : > { %v1785_v34 = vsel %vm1771_vm4, %v1756_v46, %v1757_v23  ;;  %v1468_v14 = vsel %vm1142_vm3, %v1444_v26, %v1445_v8 }
 0x23a   : > { %v6036_v19 = vadd.f32 %v1785_v34, %v1515_v16  ;;  %v1674_v62 = vpop.f32.mrf.mxu0  ;;  %4516 = vmatmul.mubr.msk.bf16.gmra.mxu0 %vm324_vm1, %v5545_v28  ;;  %v1517_v21 = vadd.f32 %v1468_v14, %v5565_v13  ;;  %v1368_v50 = vpop.f32.mrf.mxu1  ;;  %4434 = vmatmul.mubr.msk.bf16.gmra.mxu1 %vm324_vm1, %v5570_v58 }
 0x23b   : > { %v1758_v29 = vrot.slane %v1674_v62, 3  ;;  %4519 = vmatprep.mubr.msk.bf16.mxu0 %vm4787_vm0, %v6904_v27  ;;  %v1446_v46 = vrot.slane %v1368_v50, 2  ;;  %4437 = vmatprep.mubr.msk.bf16.mxu1 %vm4787_vm0, %v6904_v27 }
 0x23c   : > { %v4333_v15 = vpop.f32.mrf.mxu0  ;;  %v4251_v26 = vpop.f32.mrf.mxu1 }
 0x23d   : > { %v1784_v16 = vsel %vm1771_vm4, %v1757_v23, %v1758_v29  ;;  %v1467_v28 = vsel %vm1142_vm3, %v1445_v8, %v1446_v46 }
 0x23e   : > { %v6051_v13 = vadd.f32 %v1784_v16, %v1516_v33  ;;  %v1677_v4 = vpop.f32.mrf.mxu0  ;;  %v1518_v47 = vadd.f32 %v1467_v28, %v5583_v22  ;;  %v1371_v45 = vpop.f32.mrf.mxu1 }
 0x23f   : > { %v1759_v2 = vrot.slane %v1677_v4, 3  ;;  %v1447_v59 = vrot.slane %v1371_v45, 2 }
 0x240   : > { %v4334_v34 = vpop.f32.mrf.mxu0  ;;  %v4252_v14 = vpop.f32.mrf.mxu1 }
 0x241   : > { %v1783_v18 = vsel %vm1771_vm4, %v1758_v29, %v1759_v2  ;;  %v1466_v23 = vsel %vm1142_vm3, %v1446_v46, %v1447_v59 }
 0x242   : > { %v6058_v62 = vadd.f32 %v1783_v18, %v1517_v21  ;;  %v1682_v50 = vpop.f32.mrf.mxu0  ;;  %4520 = vmatmul.mubr.msk.bf16.gmra.mxu0 %vm324_vm1, %v5570_v58  ;;  %v1519_v33 = vadd.f32 %v1466_v23, %v5590_v53  ;;  %v1376_v22 = vpop.f32.mrf.mxu1  ;;  %4438 = vmatmul.mubr.msk.bf16.gmra.mxu1 %vm324_vm1, %v5595_v12 }
 0x243   : > { %v1760_v8 = vrot.slane %v1682_v50, 3  ;;  %4523 = vmatprep.mubr.msk.bf16.mxu0 %vm4787_vm0, %v6904_v27  ;;  %v1448_v29 = vrot.slane %v1376_v22, 2  ;;  %4441 = vmatprep.mubr.msk.bf16.mxu1 %vm4787_vm0, %v6904_v27 }
 0x244   : > { %v4337_v15 = vpop.f32.mrf.mxu0  ;;  %v4255_v46 = vpop.f32.mrf.mxu1 }
 0x245   : > { %v1782_v21 = vsel %vm1771_vm4, %v1759_v2, %v1760_v8  ;;  %v1465_v58 = vsel %vm1142_vm3, %v1447_v59, %v1448_v29 }
 0x246   : > { %v6073_v53 = vadd.f32 %v1782_v21, %v1518_v47  ;;  %v1685_v16 = vpop.f32.mrf.mxu0  ;;  %v1520_v26 = vadd.f32 %v1465_v58, %v5608_v41  ;;  %v1379_v28 = vpop.f32.mrf.mxu1 }
 0x247   : > { %v1761_v4 = vrot.slane %v1685_v16, 3  ;;  %v1449_v45 = vrot.slane %v1379_v28, 2 }
 0x248   : > { %v4338_v34 = vpop.f32.mrf.mxu0  ;;  %v4256_v14 = vpop.f32.mrf.mxu1 }
 0x249   : > { %v1781_v18 = vsel %vm1771_vm4, %v1760_v8, %v1761_v4  ;;  %v1464_v2 = vsel %vm1142_vm3, %v1448_v29, %v1449_v45 }
 0x24a   : > { %v6080_v23 = vadd.f32 %v1781_v18, %v1519_v33  ;;  %v1690_v50 = vpop.f32.mrf.mxu0  ;;  %4524 = vmatmul.mubr.msk.bf16.gmra.mxu0 %vm324_vm1, %v5595_v12  ;;  %v1521_v47 = vadd.f32 %v1464_v2, %v5615_v54  ;;  %v1384_v41 = vpop.f32.mrf.mxu1  ;;  %4442 = vmatmul.mubr.msk.bf16.gmra.mxu1 %vm324_vm1, %v5620_v20 }
 0x24b   : > { %v1762_v59 = vrot.slane %v1690_v50, 3  ;;  %4527 = vmatprep.mubr.msk.bf16.mxu0 %vm4787_vm0, %v6904_v27  ;;  %v1450_v22 = vrot.slane %v1384_v41, 2  ;;  %4445 = vmatprep.mubr.msk.bf16.mxu1 %vm4787_vm0, %v6904_v27 }
 0x24c   : > { %v4341_v8 = vpop.f32.mrf.mxu0  ;;  %v4259_v29 = vpop.f32.mrf.mxu1 }
 0x24d   : > { %v1780_v33 = vsel %vm1771_vm4, %v1761_v4, %v1762_v59  ;;  %v1463_v12 = vsel %vm1142_vm3, %v1449_v45, %v1450_v22 }
 0x24e   : > { %v6095_v54 = vadd.f32 %v1780_v33, %v1520_v26  ;;  %v1693_v15 = vpop.f32.mrf.mxu0  ;;  %v1522_v21 = vadd.f32 %v1463_v12, %v5633_v44  ;;  %v1387_v46 = vpop.f32.mrf.mxu1 }
 0x24f   : > { %v1763_v58 = vrot.slane %v1693_v15, 3  ;;  %v1451_v16 = vrot.slane %v1387_v46, 2 }
 0x250   : > { %v4342_v28 = vpop.f32.mrf.mxu0  ;;  %v4260_v18 = vpop.f32.mrf.mxu1 }
 0x251   : > { %v1779_v34 = vsel %vm1771_vm4, %v1762_v59, %v1763_v58  ;;  %v1462_v4 = vsel %vm1142_vm3, %v1450_v22, %v1451_v16 }
 0x252   : > { %v6102_v14 = vadd.f32 %v1779_v34, %v1521_v47  ;;  %v1698_v2 = vpop.f32.mrf.mxu0  ;;  %4528 = vmatmul.mubr.msk.bf16.gmra.mxu0 %vm324_vm1, %v5620_v20  ;;  %v1523_v26 = vadd.f32 %v1462_v4, %v5640_v48  ;;  %v1392_v44 = vpop.f32.mrf.mxu1  ;;  %4446 = vmatmul.mubr.msk.bf16.gmra.mxu1 %vm324_vm1, %v5645_v3 }
 0x253   : > { %v1764_v45 = vrot.slane %v1698_v2, 3  ;;  %4531 = vmatprep.mubr.msk.bf16.mxu0 %vm4787_vm0, %v6904_v27  ;;  %v1452_v50 = vrot.slane %v1392_v44, 2  ;;  %4537 = vmatprep.mubr.msk.bf16.mxu1 %vm4787_vm0, %v6904_v27 }
 0x254   : > { %v4345_v41 = vpop.f32.mrf.mxu0  ;;  %v4263_v59 = vpop.f32.mrf.mxu1 }
 0x255   : > { %v1778_v47 = vsel %vm1771_vm4, %v1763_v58, %v1764_v45  ;;  %v1461_v20 = vsel %vm1142_vm3, %v1451_v16, %v1452_v50 }
 0x256   : > { %v6117_v48 = vadd.f32 %v1778_v47, %v1522_v21  ;;  %v1701_v22 = vpop.f32.mrf.mxu0  ;;  %v1524_v8 = vadd.f32 %v1461_v20, %v5658_v7  ;;  %v1395_v33 = vpop.f32.mrf.mxu1 }
 0x257   : > { %v1765_v29 = vrot.slane %v1701_v22, 3  ;;  %v1453_v12 = vrot.slane %v1395_v33, 2 }
 0x258   : > { %v4346_v15 = vpop.f32.mrf.mxu0  ;;  %v4264_v28 = vpop.f32.mrf.mxu1 }
 0x259   : > { %v1777_v46 = vsel %vm1771_vm4, %v1764_v45, %v1765_v29  ;;  %v1460_v58 = vsel %vm1142_vm3, %v1452_v50, %v1453_v12 }
 0x25a   : > { %v6124_v34 = vadd.f32 %v1777_v46, %v1523_v26  ;;  %v1706_v18 = vpop.f32.mrf.mxu0  ;;  %4532 = vmatmul.mubr.msk.bf16.gmra.mxu0 %vm324_vm1, %v5645_v3  ;;  %v1525_v21 = vadd.f32 %v1460_v58, %v5668_v55  ;;  %v1400_v7 = vpop.f32.mrf.mxu1  ;;  %4538 = vmatmul.mubr.msk.bf16.vlgmr.msra.gmra.mxu1 %vm324_vm1, %v5673_v31 }
 0x25b   : > { %v1766_v16 = vrot.slane %v1706_v18, 3  ;;  %4623 = vmatprep.mubr.msk.bf16.mxu0 %vm4787_vm0, %v6904_v27  ;;  %v1454_v4 = vrot.slane %v1400_v7, 2  ;;  %4541 = vmatprep.mubr.msk.bf16.mxu1 %vm4787_vm0, %v6904_v27 }
 0x25c   : > { %v4349_v2 = vpop.f32.mrf.mxu0  ;;  %v4267_v44 = vpop.f32.mrf.mxu1 }
 0x25d   : > { %v1776_v26 = vsel %vm1771_vm4, %v1765_v29, %v1766_v16  ;;  %v1459_v3 = vsel %vm1142_vm3, %v1453_v12, %v1454_v4 }
 0x25e   : > { %v6139_v55 = vadd.f32 %v1776_v26, %v1524_v8  ;;  %v1709_v45 = vpop.f32.mrf.mxu0  ;;  %v1526_v50 = vadd.f32 %v1459_v3, %v5686_v51  ;;  %v1403_v41 = vpop.f32.mrf.mxu1 }
 0x25f   : > { %v1767_v47 = vrot.slane %v1709_v45, 3  ;;  %v1455_v59 = vrot.slane %v1403_v41, 2 }
 0x260   : > { %v4350_v20 = vpop.f32.mrf.mxu0  ;;  %v4268_v33 = vpop.f32.mrf.mxu1 }
 0x261   : > { %v1775_v22 = vsel %vm1771_vm4, %v1766_v16, %v1767_v47  ;;  %v1458_v29 = vsel %vm1142_vm3, %v1454_v4, %v1455_v59 }
 0x262   : > { %v6146_v15 = vadd.f32 %v1775_v22, %v1525_v21  ;;  %v1714_v46 = vpop.f32.mrf.mxu0  ;;  %4624 = vmatmul.mubr.msk.bf16.vlgmr.msra.gmra.mxu0 %vm324_vm1, %v5673_v31  ;;  %v1527_v8 = vadd.f32 %v1458_v29, %v5694_v5  ;;  %v1408_v51 = vpop.f32.mrf.mxu1  ;;  %4542 = vmatmul.mubr.msk.bf16.gmra.mxu1 %vm324_vm1, %v5699_v17 }
 0x263   : > { %v1768_v12 = vrot.slane %v1714_v46, 3  ;;  %4627 = vmatprep.mubr.msk.bf16.mxu0 %vm4787_vm0, %v6904_v27  ;;  %v1456_v28 = vrot.slane %v1408_v51, 2  ;;  %4545 = vmatprep.mubr.msk.bf16.mxu1 %vm4787_vm0, %v6904_v27 }
 0x264   : > { %v4353_v58 = vpop.f32.mrf.mxu0  ;;  %v4271_v21 = vpop.f32.mrf.mxu1 }
 0x265   : > { %v1774_v18 = vsel %vm1771_vm4, %v1767_v47, %v1768_v12  ;;  %v1457_v31 = vsel %vm1142_vm3, %v1455_v59, %v1456_v28 }
 0x266   : > { %v6161_v5 = vadd.f32 %v1774_v18, %v1526_v50  ;;  %v1717_v7 = vpop.f32.mrf.mxu0  ;;  %v1528_v16 = vadd.f32 %v1457_v31, %v5710_v60  ;;  %v1411_v4 = vpop.f32.mrf.mxu1 }
 0x267   : > { %v1769_v2 = vrot.slane %v1717_v7, 3 }
 0x268   : > { %v4354_v26 = vpop.f32.mrf.mxu0  ;;  %v4272_v3 = vpop.f32.mrf.mxu1 }
 0x269   : > { %v1773_v44 = vsel %vm1771_vm4, %v1768_v12, %v1769_v2 }
 0x26a   : > { %v6166_v45 = vadd.f32 %v1773_v44, %v1527_v8  ;;  %v1722_v41 = vpop.f32.mrf.mxu0  ;;  %4628 = vmatmul.mubr.msk.bf16.gmra.mxu0 %vm324_vm1, %v5699_v17  ;;  %v1415_v47 = vpop.f32.mrf.mxu1  ;;  %4546 = vmatmul.mubr.msk.bf16.gmra.mxu1 %vm324_vm1, %v5715_v0 }
 0x26b   : > { %v1770_v59 = vrot.slane %v1722_v41, 3  ;;  %4631 = vmatprep.mubr.msk.bf16.mxu0 %vm4787_vm0, %v6904_v27  ;;  %4549 = vmatprep.mubr.msk.bf16.mxu1 %vm4787_vm0, %v6904_v27 }
 0x26c   : > { %v4357_v60 = vpop.f32.mrf.mxu0  ;;  %v4275_v20 = vpop.f32.mrf.mxu1 }
 0x26d   : > { %v1772_v50 = vsel %vm1771_vm4, %v1769_v2, %v1770_v59 }
 0x26e   : > { %v6178_v22 = vadd.f32 %v1772_v50, %v1528_v16  ;;  %v1725_v33 = vpop.f32.mrf.mxu0  ;;  %v1417_v17 = vpop.f32.mrf.mxu1  ;;  %v6920_v16 = vld [vmem:[#allocation2_spill] sm:$0xff]  ;;  %v6921_v50 = vld [vmem:[#allocation4_spill] sm:$0xff] }
 0x26f   : > { %v6922_v17 = vld [vmem:[#allocation3_spill] sm:$0xff] }
 0x270   : > { %v4358_v29 = vpop.f32.mrf.mxu0  ;;  %v4276_v46 = vpop.f32.mrf.mxu1 }
 0x272   : > { %v1729_v8 = vpop.f32.mrf.mxu0  ;;  %4632 = vmatmul.mubr.msk.bf16.gmra.mxu0 %vm324_vm1, %v5715_v0  ;;  %v1887_v51 = vpop.f32.mrf.mxu1  ;;  %4550 = vmatmul.mubr.msk.bf16.gmra.mxu1 %vm324_vm1, %v5726_v24 }
 0x273   : > { %4635 = vmatprep.mubr.msk.bf16.mxu0 %vm4787_vm0, %v6904_v27  ;;  %4553 = vmatprep.mubr.msk.bf16.mxu1 %vm4787_vm0, %v6904_v27 }
 0x274   : > { %v4361_v12 = vpop.f32.mrf.mxu0  ;;  %v4367_v28 = vpop.f32.mrf.mxu1 }
 0x276   : > { %v1731_v58 = vpop.f32.mrf.mxu0  ;;  %v1889_v18 = vpop.f32.mrf.mxu1 }
 0x278   : > { %v4362_v21 = vpop.f32.mrf.mxu0  ;;  %v4368_v31 = vpop.f32.mrf.mxu1 }
 0x27a   : > { %v2202_v7 = vpop.f32.mrf.mxu0  ;;  %4636 = vmatmul.mubr.msk.bf16.gmra.mxu0 %vm324_vm1, %v5726_v24  ;;  %v1893_v0 = vpop.f32.mrf.mxu1  ;;  %4554 = vmatmul.mubr.msk.bf16.gmra.mxu1 %vm324_vm1, %v6920_v16 }
 0x27b   : > { %4639 = vmatprep.mubr.msk.bf16.mxu0 %vm4787_vm0, %v6904_v27  ;;  %4557 = vmatprep.mubr.msk.bf16.mxu1 %vm4787_vm0, %v6904_v27  ;;  %v2049_v26 = vrot.slane %v1893_v0, 4 }
 0x27c   : > { %v4453_v4 = vpop.f32.mrf.mxu0  ;;  %v4371_v2 = vpop.f32.mrf.mxu1 }
 0x27d   : > { %v6923_v2 = vld [vmem:[#allocation5_spill] sm:$0xff] }
 0x27e   : > { %v2204_v44 = vpop.f32.mrf.mxu0  ;;  %v1896_v3 = vpop.f32.mrf.mxu1 }
 0x27f   : > { %v2050_v41 = vrot.slane %v1896_v3, 4 }
 0x280   : > { %v4454_v47 = vpop.f32.mrf.mxu0  ;;  %v4372_v24 = vpop.f32.mrf.mxu1 }
 0x281   : > { %v2122_v59 = vsel %vm2086_vm5, %v2049_v26, %v2050_v41 }
 0x282   : > { %v2208_v60 = vpop.f32.mrf.mxu0  ;;  %4640 = vmatmul.mubr.msk.bf16.gmra.mxu0 %vm324_vm1, %v6920_v16  ;;  %v2123_v20 = vadd.f32 %v2122_v59, %v6921_v50  ;;  %v1901_v33 = vpop.f32.mrf.mxu1  ;;  %4558 = vmatmul.mubr.msk.bf16.gmra.mxu1 %vm324_vm1, %v6922_v17 }
 0x283   : > { %4643 = vmatprep.mubr.msk.bf16.mxu0 %vm4787_vm0, %v6904_v27  ;;  %v2051_v29 = vrot.slane %v1901_v33, 4  ;;  %4561 = vmatprep.mubr.msk.bf16.mxu1 %vm4787_vm0, %v6904_v27 }
 0x284   : > { %v4457_v46 = vpop.f32.mrf.mxu0  ;;  %v4375_v8 = vpop.f32.mrf.mxu1 }
 0x285   : > { %v2121_v51 = vsel %vm2086_vm5, %v2050_v41, %v2051_v29 }
 0x286   : > { %v2210_v12 = vpop.f32.mrf.mxu0  ;;  %v2124_v28 = vadd.f32 %v2121_v51, %v5785_v9  ;;  %v1904_v58 = vpop.f32.mrf.mxu1 }
 0x287   : > { %v2052_v18 = vrot.slane %v1904_v58, 4  ;;  %v6924_v58 = vld [vmem:[#allocation6_spill] sm:$0xff] }
 0x288   : > { %v4458_v21 = vpop.f32.mrf.mxu0  ;;  %v4376_v31 = vpop.f32.mrf.mxu1 }
 0x289   : > { %v2120_v7 = vsel %vm2086_vm5, %v2051_v29, %v2052_v18 }
 0x28a   : > { %v2214_v0 = vpop.f32.mrf.mxu0  ;;  %4644 = vmatmul.mubr.msk.bf16.gmra.mxu0 %vm324_vm1, %v6922_v17  ;;  %v2125_v16 = vadd.f32 %v2120_v7, %v5792_v36  ;;  %v1909_v4 = vpop.f32.mrf.mxu1  ;;  %4562 = vmatmul.mubr.msk.bf16.gmra.mxu1 %vm324_vm1, %v6923_v2 }
 0x28b   : > { %4647 = vmatprep.mubr.msk.bf16.mxu0 %vm4787_vm0, %v6904_v27  ;;  %v2053_v9 = vrot.slane %v1909_v4, 4  ;;  %4565 = vmatprep.mubr.msk.bf16.mxu1 %vm4787_vm0, %v6904_v27  ;;  %v2364_v36 = vrot.slane %v2214_v0, 4 }
 0x28c   : > { %v4461_v26 = vpop.f32.mrf.mxu0  ;;  %v4379_v44 = vpop.f32.mrf.mxu1 }
 0x28d   : > { %v2119_v3 = vsel %vm2086_vm5, %v2052_v18, %v2053_v9 }
 0x28e   : > { %v2217_v41 = vpop.f32.mrf.mxu0  ;;  %v2126_v47 = vadd.f32 %v2119_v3, %v5810_v56  ;;  %v1912_v24 = vpop.f32.mrf.mxu1 }
 0x28f   : > { %v2365_v59 = vrot.slane %v2217_v41, 4  ;;  %v2054_v60 = vrot.slane %v1912_v24, 4 }
 0x290   : > { %v4462_v50 = vpop.f32.mrf.mxu0  ;;  %v4380_v17 = vpop.f32.mrf.mxu1 }
 0x291   : > { %v2436_v33 = vsel %vm2086_vm5, %v2364_v36, %v2365_v59  ;;  %v2118_v29 = vsel %vm2086_vm5, %v2053_v9, %v2054_v60  ;;  %v6925_v50 = vld [vmem:[#allocation7_spill] sm:$0xff] }
 0x292   : > { %v6229_v46 = vadd.f32 %v2436_v33, %v2123_v20  ;;  %v2222_v8 = vpop.f32.mrf.mxu0  ;;  %4648 = vmatmul.mubr.msk.bf16.gmra.mxu0 %vm324_vm1, %v6923_v2  ;;  %v2127_v56 = vadd.f32 %v2118_v29, %v5817_v37  ;;  %v1917_v51 = vpop.f32.mrf.mxu1  ;;  %4566 = vmatmul.mubr.msk.bf16.gmra.mxu1 %vm324_vm1, %v6924_v58 }
 0x293   : > { %v2366_v12 = vrot.slane %v2222_v8, 4  ;;  %4651 = vmatprep.mubr.msk.bf16.mxu0 %vm4787_vm0, %v6904_v27  ;;  %v2055_v18 = vrot.slane %v1917_v51, 4  ;;  %4569 = vmatprep.mubr.msk.bf16.mxu1 %vm4787_vm0, %v6904_v27 }
 0x294   : > { %v4465_v21 = vpop.f32.mrf.mxu0  ;;  %v4383_v31 = vpop.f32.mrf.mxu1 }
 0x295   : > { %v2435_v20 = vsel %vm2086_vm5, %v2365_v59, %v2366_v12  ;;  %v2117_v37 = vsel %vm2086_vm5, %v2054_v60, %v2055_v18 }
 0x296   : > { %v6244_v7 = vadd.f32 %v2435_v20, %v2124_v28  ;;  %v2225_v0 = vpop.f32.mrf.mxu0  ;;  %v2128_v4 = vadd.f32 %v2117_v37, %v5835_v61  ;;  %v1920_v2 = vpop.f32.mrf.mxu1 }
 0x297   : > { %v2367_v9 = vrot.slane %v2225_v0, 4  ;;  %v2056_v26 = vrot.slane %v1920_v2, 4 }
 0x298   : > { %v4466_v44 = vpop.f32.mrf.mxu0  ;;  %v4384_v41 = vpop.f32.mrf.mxu1 }
 0x299   : > { %v2434_v3 = vsel %vm2086_vm5, %v2366_v12, %v2367_v9  ;;  %v2116_v36 = vsel %vm2086_vm5, %v2055_v18, %v2056_v26  ;;  %v6926_v44 = vld [vmem:[#allocation8_spill] sm:$0xff] }
 0x29a   : > { %v6251_v24 = vadd.f32 %v2434_v3, %v2125_v16  ;;  %v2230_v59 = vpop.f32.mrf.mxu0  ;;  %4652 = vmatmul.mubr.msk.bf16.gmra.mxu0 %vm324_vm1, %v6924_v58  ;;  %v2129_v28 = vadd.f32 %v2116_v36, %v5842_v40  ;;  %v1925_v61 = vpop.f32.mrf.mxu1  ;;  %4570 = vmatmul.mubr.msk.bf16.gmra.mxu1 %vm324_vm1, %v6925_v50 }
 0x29b   : > { %v2368_v60 = vrot.slane %v2230_v59, 4  ;;  %4655 = vmatprep.mubr.msk.bf16.mxu0 %vm4787_vm0, %v6904_v27  ;;  %v2057_v33 = vrot.slane %v1925_v61, 4  ;;  %4573 = vmatprep.mubr.msk.bf16.mxu1 %vm4787_vm0, %v6904_v27 }
 0x29c   : > { %v4469_v17 = vpop.f32.mrf.mxu0  ;;  %v4387_v29 = vpop.f32.mrf.mxu1 }
 0x29d   : > { %v2433_v16 = vsel %vm2086_vm5, %v2367_v9, %v2368_v60  ;;  %v2115_v40 = vsel %vm2086_vm5, %v2056_v26, %v2057_v33 }
 0x29e   : > { %v6266_v8 = vadd.f32 %v2433_v16, %v2126_v47  ;;  %v2233_v51 = vpop.f32.mrf.mxu0  ;;  %v2130_v12 = vadd.f32 %v2115_v40, %v5860_v52  ;;  %v1928_v58 = vpop.f32.mrf.mxu1 }
 0x29f   : > { %v2369_v18 = vrot.slane %v2233_v51, 4  ;;  %v2058_v21 = vrot.slane %v1928_v58, 4 }
 0x2a0   : > { %v4470_v20 = vpop.f32.mrf.mxu0  ;;  %v4388_v37 = vpop.f32.mrf.mxu1 }
 0x2a1   : > { %v2432_v31 = vsel %vm2086_vm5, %v2368_v60, %v2369_v18  ;;  %v2114_v0 = vsel %vm2086_vm5, %v2057_v33, %v2058_v21  ;;  %v6927_v20 = vld [vmem:[#allocation9_spill] sm:$0xff] }
 0x2a2   : > { %v6273_v2 = vadd.f32 %v2432_v31, %v2127_v56  ;;  %v2238_v9 = vpop.f32.mrf.mxu0  ;;  %4656 = vmatmul.mubr.msk.bf16.gmra.mxu0 %vm324_vm1, %v6925_v50  ;;  %v2131_v47 = vadd.f32 %v2114_v0, %v5867_v32  ;;  %v1933_v52 = vpop.f32.mrf.mxu1  ;;  %4574 = vmatmul.mubr.msk.bf16.gmra.mxu1 %vm324_vm1, %v6926_v44 }
 0x2a3   : > { %v2370_v26 = vrot.slane %v2238_v9, 4  ;;  %4659 = vmatprep.mubr.msk.bf16.mxu0 %vm4787_vm0, %v6904_v27  ;;  %v2059_v3 = vrot.slane %v1933_v52, 4  ;;  %4577 = vmatprep.mubr.msk.bf16.mxu1 %vm4787_vm0, %v6904_v27 }
 0x2a4   : > { %v4473_v41 = vpop.f32.mrf.mxu0  ;;  %v4391_v36 = vpop.f32.mrf.mxu1 }
 0x2a5   : > { %v2431_v56 = vsel %vm2086_vm5, %v2369_v18, %v2370_v26  ;;  %v2113_v32 = vsel %vm2086_vm5, %v2058_v21, %v2059_v3 }
 0x2a6   : > { %v6288_v59 = vadd.f32 %v2431_v56, %v2128_v4  ;;  %v2241_v61 = vpop.f32.mrf.mxu0  ;;  %v2132_v60 = vadd.f32 %v2113_v32, %v5885_v63  ;;  %v1936_v50 = vpop.f32.mrf.mxu1 }
 0x2a7   : > { %v2371_v33 = vrot.slane %v2241_v61, 4  ;;  %v2060_v17 = vrot.slane %v1936_v50, 4 }
 0x2a8   : > { %v4474_v16 = vpop.f32.mrf.mxu0  ;;  %v4392_v40 = vpop.f32.mrf.mxu1 }
 0x2a9   : > { %v2430_v29 = vsel %vm2086_vm5, %v2370_v26, %v2371_v33  ;;  %v2112_v51 = vsel %vm2086_vm5, %v2059_v3, %v2060_v17  ;;  %v6928_v16 = vld [vmem:[#allocation10_spill] sm:$0xff] }
 0x2aa   : > { %v6295_v58 = vadd.f32 %v2430_v29, %v2129_v28  ;;  %v2246_v18 = vpop.f32.mrf.mxu0  ;;  %4660 = vmatmul.mubr.msk.bf16.gmra.mxu0 %vm324_vm1, %v6926_v44  ;;  %v2133_v4 = vadd.f32 %v2112_v51, %v5892_v10  ;;  %v1941_v63 = vpop.f32.mrf.mxu1  ;;  %4578 = vmatmul.mubr.msk.bf16.gmra.mxu1 %vm324_vm1, %v6927_v20 }
 0x2ab   : > { %v2372_v21 = vrot.slane %v2246_v18, 4  ;;  %4663 = vmatprep.mubr.msk.bf16.mxu0 %vm4787_vm0, %v6904_v27  ;;  %v2061_v31 = vrot.slane %v1941_v63, 4  ;;  %4581 = vmatprep.mubr.msk.bf16.mxu1 %vm4787_vm0, %v6904_v27 }
 0x2ac   : > { %v4477_v37 = vpop.f32.mrf.mxu0  ;;  %v4395_v0 = vpop.f32.mrf.mxu1 }
 0x2ad   : > { %v2429_v28 = vsel %vm2086_vm5, %v2371_v33, %v2372_v21  ;;  %v2111_v10 = vsel %vm2086_vm5, %v2060_v17, %v2061_v31 }
 0x2ae   : > { %v6310_v9 = vadd.f32 %v2429_v28, %v2130_v12  ;;  %v2249_v52 = vpop.f32.mrf.mxu0  ;;  %v2134_v26 = vadd.f32 %v2111_v10, %v5910_v43  ;;  %v1944_v44 = vpop.f32.mrf.mxu1 }
 0x2af   : > { %v2373_v3 = vrot.slane %v2249_v52, 4  ;;  %v2062_v41 = vrot.slane %v1944_v44, 4 }
 0x2b0   : > { %v4478_v56 = vpop.f32.mrf.mxu0  ;;  %v4396_v32 = vpop.f32.mrf.mxu1 }
 0x2b1   : > { %v2428_v36 = vsel %vm2086_vm5, %v2372_v21, %v2373_v3  ;;  %v2110_v61 = vsel %vm2086_vm5, %v2061_v31, %v2062_v41  ;;  %v6929_v56 = vld [vmem:[#allocation11_spill] sm:$0xff] }
 0x2b2   : > { %v6317_v50 = vadd.f32 %v2428_v36, %v2131_v47  ;;  %v2254_v33 = vpop.f32.mrf.mxu0  ;;  %4664 = vmatmul.mubr.msk.bf16.gmra.mxu0 %vm324_vm1, %v6927_v20  ;;  %v2135_v12 = vadd.f32 %v2110_v61, %v5917_v49  ;;  %v1949_v43 = vpop.f32.mrf.mxu1  ;;  %4582 = vmatmul.mubr.msk.bf16.gmra.mxu1 %vm324_vm1, %v6928_v16 }
 0x2b3   : > { %v2374_v17 = vrot.slane %v2254_v33, 4  ;;  %4667 = vmatprep.mubr.msk.bf16.mxu0 %vm4787_vm0, %v6904_v27  ;;  %v2063_v29 = vrot.slane %v1949_v43, 4  ;;  %4585 = vmatprep.mubr.msk.bf16.mxu1 %vm4787_vm0, %v6904_v27 }
 0x2b4   : > { %v4481_v40 = vpop.f32.mrf.mxu0  ;;  %v4399_v51 = vpop.f32.mrf.mxu1 }
 0x2b5   : > { %v2427_v47 = vsel %vm2086_vm5, %v2373_v3, %v2374_v17  ;;  %v2109_v49 = vsel %vm2086_vm5, %v2062_v41, %v2063_v29 }
 0x2b6   : > { %v6332_v18 = vadd.f32 %v2427_v47, %v2132_v60  ;;  %v2257_v63 = vpop.f32.mrf.mxu0  ;;  %v2136_v21 = vadd.f32 %v2109_v49, %v5935_v38  ;;  %v1952_v20 = vpop.f32.mrf.mxu1 }
 0x2b7   : > { %v2375_v31 = vrot.slane %v2257_v63, 4  ;;  %v2064_v37 = vrot.slane %v1952_v20, 4 }
 0x2b8   : > { %v4482_v28 = vpop.f32.mrf.mxu0  ;;  %v4400_v10 = vpop.f32.mrf.mxu1 }
 0x2b9   : > { %v2426_v0 = vsel %vm2086_vm5, %v2374_v17, %v2375_v31  ;;  %v2108_v52 = vsel %vm2086_vm5, %v2063_v29, %v2064_v37 }
 0x2ba   : > { %v6339_v44 = vadd.f32 %v2426_v0, %v2133_v4  ;;  %v2262_v3 = vpop.f32.mrf.mxu0  ;;  %4668 = vmatmul.mubr.msk.bf16.gmra.mxu0 %vm324_vm1, %v6928_v16  ;;  %v2137_v60 = vadd.f32 %v2108_v52, %v5942_v57  ;;  %v1957_v38 = vpop.f32.mrf.mxu1  ;;  %4586 = vmatmul.mubr.msk.bf16.gmra.mxu1 %vm324_vm1, %v6929_v56  ;;  %v6931_v0 = vld [vmem:[#allocation12_spill] sm:$0xff] }
 0x2bb   : > { %v2376_v41 = vrot.slane %v2262_v3, 4  ;;  %4671 = vmatprep.mubr.msk.bf16.mxu0 %vm4787_vm0, %v6904_v27  ;;  %v2065_v36 = vrot.slane %v1957_v38, 4  ;;  %4589 = vmatprep.mubr.msk.bf16.mxu1 %vm4787_vm0, %v6904_v27 }
 0x2bc   : > { %v4485_v32 = vpop.f32.mrf.mxu0  ;;  %v4403_v61 = vpop.f32.mrf.mxu1 }
 0x2bd   : > { %v2425_v4 = vsel %vm2086_vm5, %v2375_v31, %v2376_v41  ;;  %v2107_v57 = vsel %vm2086_vm5, %v2064_v37, %v2065_v36 }
 0x2be   : > { %v6354_v33 = vadd.f32 %v2425_v4, %v2134_v26  ;;  %v2265_v43 = vpop.f32.mrf.mxu0  ;;  %v2138_v17 = vadd.f32 %v2107_v57, %v5960_v11  ;;  %v1960_v16 = vpop.f32.mrf.mxu1  ;;  %v6930_v26 = vld [vmem:[#allocation13_spill] sm:$0xff] }
 0x2bf   : > { %v2377_v29 = vrot.slane %v2265_v43, 4  ;;  %v2066_v40 = vrot.slane %v1960_v16, 4 }
 0x2c0   : > { %v4486_v47 = vpop.f32.mrf.mxu0  ;;  %v4404_v49 = vpop.f32.mrf.mxu1 }
 0x2c1   : > { %v2424_v51 = vsel %vm2086_vm5, %v2376_v41, %v2377_v29  ;;  %v2106_v63 = vsel %vm2086_vm5, %v2065_v36, %v2066_v40 }
 0x2c2   : > { %v6361_v20 = vadd.f32 %v2424_v51, %v2135_v12  ;;  %v2270_v31 = vpop.f32.mrf.mxu0  ;;  %4672 = vmatmul.mubr.msk.bf16.gmra.mxu0 %vm324_vm1, %v6929_v56  ;;  %v2139_v37 = vadd.f32 %v2106_v63, %v6930_v26  ;;  %v1965_v11 = vpop.f32.mrf.mxu1  ;;  %4590 = vmatmul.mubr.msk.bf16.gmra.mxu1 %vm324_vm1, %v6931_v0 }
 0x2c3   : > { %v2378_v28 = vrot.slane %v2270_v31, 4  ;;  %4675 = vmatprep.mubr.msk.bf16.mxu0 %vm4787_vm0, %v6904_v27  ;;  %v2067_v10 = vrot.slane %v1965_v11, 4  ;;  %4593 = vmatprep.mubr.msk.bf16.mxu1 %vm4787_vm0, %v6904_v27 }
 0x2c4   : > { %v4489_v52 = vpop.f32.mrf.mxu0  ;;  %v4407_v3 = vpop.f32.mrf.mxu1 }
 0x2c5   : > { %v2423_v12 = vsel %vm2086_vm5, %v2377_v29, %v2378_v28  ;;  %v2105_v38 = vsel %vm2086_vm5, %v2066_v40, %v2067_v10 }
 0x2c6   : > { %v6376_v41 = vadd.f32 %v2423_v12, %v2136_v21  ;;  %v2273_v56 = vpop.f32.mrf.mxu0  ;;  %v2140_v36 = vadd.f32 %v2105_v38, %v5985_v30  ;;  %v1968_v32 = vpop.f32.mrf.mxu1 }
 0x2c7   : > { %v2379_v4 = vrot.slane %v2273_v56, 4  ;;  %v2068_v61 = vrot.slane %v1968_v32, 4 }
 0x2c8   : > { %v4490_v57 = vpop.f32.mrf.mxu0  ;;  %v4408_v16 = vpop.f32.mrf.mxu1 }
 0x2c9   : > { %v2422_v43 = vsel %vm2086_vm5, %v2378_v28, %v2379_v4  ;;  %v2104_v29 = vsel %vm2086_vm5, %v2067_v10, %v2068_v61  ;;  %v4772_v57 = vld [vmem:[%s4839_s23 + $0x78] sm:$0xff]  }
 0x2ca   : > { %v6383_v47 = vadd.f32 %v2422_v43, %v2137_v60  ;;  %v2278_v51 = vpop.f32.mrf.mxu0  ;;  %4676 = vmatmul.mubr.msk.bf16.gmra.mxu0 %vm324_vm1, %v6931_v0  ;;  %v2141_v21 = vadd.f32 %v2104_v29, %v5992_v1  ;;  %v1973_v30 = vpop.f32.mrf.mxu1  ;;  %4594 = vmatmul.mubr.msk.bf16.gmra.mxu1 %vm324_vm1, %v5973_v39 }
 0x2cb   : > { %v2380_v40 = vrot.slane %v2278_v51, 4  ;;  %4679 = vmatprep.mubr.msk.bf16.mxu0 %vm4787_vm0, %v6904_v27  ;;  %v2069_v49 = vrot.slane %v1973_v30, 4  ;;  %4597 = vmatprep.mubr.msk.bf16.mxu1 %vm4787_vm0, %v6904_v27 }
 0x2cc   : > { %v4493_v63 = vpop.f32.mrf.mxu0  ;;  %v4411_v31 = vpop.f32.mrf.mxu1 }
 0x2cd   : > { %v2421_v60 = vsel %vm2086_vm5, %v2379_v4, %v2380_v40  ;;  %v2103_v1 = vsel %vm2086_vm5, %v2068_v61, %v2069_v49 }
 0x2ce   : > { %v6398_v26 = vadd.f32 %v2421_v60, %v2138_v17  ;;  %v2281_v11 = vpop.f32.mrf.mxu0  ;;  %v2142_v28 = vadd.f32 %v2103_v1, %v6007_v35  ;;  %v1976_v0 = vpop.f32.mrf.mxu1 }
 0x2cf   : > { %v2381_v10 = vrot.slane %v2281_v11, 4  ;;  %v2070_v52 = vrot.slane %v1976_v0, 4 }
 0x2d0   : > { %v4494_v12 = vpop.f32.mrf.mxu0  ;;  %v4412_v38 = vpop.f32.mrf.mxu1 }
 0x2d1   : > { %v2420_v3 = vsel %vm2086_vm5, %v2380_v40, %v2381_v10  ;;  %v2102_v56 = vsel %vm2086_vm5, %v2069_v49, %v2070_v52  ;;  %v4773_v12 = vld [vmem:[%s4839_s23 + $0x80] sm:$0xff]  }
 0x2d2   : > { %v6405_v32 = vadd.f32 %v2420_v3, %v2139_v37  ;;  %v2286_v4 = vpop.f32.mrf.mxu0  ;;  %4680 = vmatmul.mubr.msk.bf16.gmra.mxu0 %vm324_vm1, %v5973_v39  ;;  %v2143_v17 = vadd.f32 %v2102_v56, %v6014_v6  ;;  %v1981_v35 = vpop.f32.mrf.mxu1  ;;  %4598 = vmatmul.mubr.msk.bf16.gmra.mxu1 %vm324_vm1, %v4772_v57 }
 0x2d3   : > { %v2382_v61 = vrot.slane %v2286_v4, 4  ;;  %4683 = vmatprep.mubr.msk.bf16.mxu0 %vm4787_vm0, %v6904_v27  ;;  %v2071_v43 = vrot.slane %v1981_v35, 4  ;;  %4601 = vmatprep.mubr.msk.bf16.mxu1 %vm4787_vm0, %v6904_v27 }
 0x2d4   : > { %v4497_v16 = vpop.f32.mrf.mxu0  ;;  %v4415_v29 = vpop.f32.mrf.mxu1 }
 0x2d5   : > { %v2419_v37 = vsel %vm2086_vm5, %v2381_v10, %v2382_v61  ;;  %v2101_v39 = vsel %vm2086_vm5, %v2070_v52, %v2071_v43 }
 0x2d6   : > { %v6420_v6 = vadd.f32 %v2419_v37, %v2140_v36  ;;  %v2289_v51 = vpop.f32.mrf.mxu0  ;;  %v2144_v30 = vadd.f32 %v2101_v39, %v6029_v42  ;;  %v1984_v40 = vpop.f32.mrf.mxu1 }
 0x2d7   : > { %v2383_v49 = vrot.slane %v2289_v51, 4  ;;  %v2072_v63 = vrot.slane %v1984_v40, 4 }
 0x2d8   : > { %v4498_v60 = vpop.f32.mrf.mxu0  ;;  %v4416_v1 = vpop.f32.mrf.mxu1 }
 0x2d9   : > { %v2418_v31 = vsel %vm2086_vm5, %v2382_v61, %v2383_v49  ;;  %v2100_v11 = vsel %vm2086_vm5, %v2071_v43, %v2072_v63  ;;  %v4774_v60 = vld [vmem:[%s4839_s23 + $0x88] sm:$0xff]  }
 0x2da   : > { %v6427_v0 = vadd.f32 %v2418_v31, %v2141_v21  ;;  %v2294_v10 = vpop.f32.mrf.mxu0  ;;  %4684 = vmatmul.mubr.msk.bf16.gmra.mxu0 %vm324_vm1, %v4772_v57  ;;  %v2145_v36 = vadd.f32 %v2100_v11, %v6036_v19  ;;  %v1989_v52 = vpop.f32.mrf.mxu1  ;;  %4602 = vmatmul.mubr.msk.bf16.gmra.mxu1 %vm324_vm1, %v4773_v12 }
 0x2db   : > { %v2384_v42 = vrot.slane %v2294_v10, 4  ;;  %4687 = vmatprep.mubr.msk.bf16.mxu0 %vm4787_vm0, %v6904_v27  ;;  %v2073_v3 = vrot.slane %v1989_v52, 4  ;;  %4605 = vmatprep.mubr.msk.bf16.mxu1 %vm4787_vm0, %v6904_v27 }
 0x2dc   : > { %v4501_v38 = vpop.f32.mrf.mxu0  ;;  %v4419_v56 = vpop.f32.mrf.mxu1 }
 0x2dd   : > { %v2417_v21 = vsel %vm2086_vm5, %v2383_v49, %v2384_v42  ;;  %v2099_v19 = vsel %vm2086_vm5, %v2072_v63, %v2073_v3 }
 0x2de   : > { %v6441_v4 = vadd.f32 %v2417_v21, %v2142_v28  ;;  %v2297_v35 = vpop.f32.mrf.mxu0  ;;  %v2146_v61 = vadd.f32 %v2099_v19, %v6051_v13  ;;  %v1992_v57 = vpop.f32.mrf.mxu1 }
 0x2df   : > { %v2385_v43 = vrot.slane %v2297_v35, 4  ;;  %v2074_v16 = vrot.slane %v1992_v57, 4 }
 0x2e0   : > { %v4502_v37 = vpop.f32.mrf.mxu0  ;;  %v4420_v39 = vpop.f32.mrf.mxu1 }
 0x2e1   : > { %v2416_v29 = vsel %vm2086_vm5, %v2384_v42, %v2385_v43  ;;  %v2098_v51 = vsel %vm2086_vm5, %v2073_v3, %v2074_v16  ;;  %v4775_v37 = vld [vmem:[%s4839_s23 + $0x90] sm:$0xff]  }
 0x2e2   : > { %v6448_v40 = vadd.f32 %v2416_v29, %v2143_v17  ;;  %v2302_v49 = vpop.f32.mrf.mxu0  ;;  %4688 = vmatmul.mubr.msk.bf16.gmra.mxu0 %vm324_vm1, %v4773_v12  ;;  %v2147_v28 = vadd.f32 %v2098_v51, %v6058_v62  ;;  %v1997_v63 = vpop.f32.mrf.mxu1  ;;  %4606 = vmatmul.mubr.msk.bf16.gmra.mxu1 %vm324_vm1, %v4774_v60 }
 0x2e3   : > { %v2386_v13 = vrot.slane %v2302_v49, 4  ;;  %4691 = vmatprep.mubr.msk.bf16.mxu0 %vm4787_vm0, %v6904_v27  ;;  %v2075_v31 = vrot.slane %v1997_v63, 4  ;;  %4609 = vmatprep.mubr.msk.bf16.mxu1 %vm4787_vm0, %v6904_v27 }
 0x2e4   : > { %v4505_v1 = vpop.f32.mrf.mxu0  ;;  %v4423_v11 = vpop.f32.mrf.mxu1 }
 0x2e5   : > { %v2415_v17 = vsel %vm2086_vm5, %v2385_v43, %v2386_v13  ;;  %v2097_v62 = vsel %vm2086_vm5, %v2074_v16, %v2075_v31 }
 0x2e6   : > { %v6462_v10 = vadd.f32 %v2415_v17, %v2144_v30  ;;  %v2305_v52 = vpop.f32.mrf.mxu0  ;;  %v2148_v42 = vadd.f32 %v2097_v62, %v6073_v53  ;;  %v2000_v12 = vpop.f32.mrf.mxu1 }
 0x2e7   : > { %v2387_v3 = vrot.slane %v2305_v52, 4  ;;  %v2076_v38 = vrot.slane %v2000_v12, 4 }
 0x2e8   : > { %v4506_v21 = vpop.f32.mrf.mxu0  ;;  %v4424_v19 = vpop.f32.mrf.mxu1 }
 0x2e9   : > { %v2414_v56 = vsel %vm2086_vm5, %v2386_v13, %v2387_v3  ;;  %v2096_v35 = vsel %vm2086_vm5, %v2075_v31, %v2076_v38  ;;  %v4776_v21 = vld [vmem:[%s4839_s23 + $0x98] sm:$0xff]  }
 0x2ea   : > { %v6469_v57 = vadd.f32 %v2414_v56, %v2145_v36  ;;  %v2310_v43 = vpop.f32.mrf.mxu0  ;;  %4692 = vmatmul.mubr.msk.bf16.gmra.mxu0 %vm324_vm1, %v4774_v60  ;;  %v2149_v30 = vadd.f32 %v2096_v35, %v6080_v23  ;;  %v2005_v16 = vpop.f32.mrf.mxu1  ;;  %4610 = vmatmul.mubr.msk.bf16.gmra.mxu1 %vm324_vm1, %v4775_v37 }
 0x2eb   : > { %v2388_v53 = vrot.slane %v2310_v43, 4  ;;  %4695 = vmatprep.mubr.msk.bf16.mxu0 %vm4787_vm0, %v6904_v27  ;;  %v2077_v29 = vrot.slane %v2005_v16, 4  ;;  %4613 = vmatprep.mubr.msk.bf16.mxu1 %vm4787_vm0, %v6904_v27 }
 0x2ec   : > { %v4509_v39 = vpop.f32.mrf.mxu0  ;;  %v4427_v51 = vpop.f32.mrf.mxu1 }
 0x2ed   : > { %v2413_v36 = vsel %vm2086_vm5, %v2387_v3, %v2388_v53  ;;  %v2095_v23 = vsel %vm2086_vm5, %v2076_v38, %v2077_v29 }
 0x2ee   : > { %v6483_v49 = vadd.f32 %v2413_v36, %v2146_v61  ;;  %v2313_v63 = vpop.f32.mrf.mxu0  ;;  %v2150_v13 = vadd.f32 %v2095_v23, %v6095_v54  ;;  %v2008_v60 = vpop.f32.mrf.mxu1 }
 0x2ef   : > { %v2389_v31 = vrot.slane %v2313_v63, 4  ;;  %v2078_v1 = vrot.slane %v2008_v60, 4 }
 0x2f0   : > { %v4510_v17 = vpop.f32.mrf.mxu0  ;;  %v4428_v62 = vpop.f32.mrf.mxu1 }
 0x2f1   : > { %v2412_v11 = vsel %vm2086_vm5, %v2388_v53, %v2389_v31  ;;  %v2094_v52 = vsel %vm2086_vm5, %v2077_v29, %v2078_v1  ;;  %v4777_v17 = vld [vmem:[%s4839_s23 + $0xa0] ss:$0 sps:$4 sm:$0xff]  }
 0x2f2   : > { %v6490_v12 = vadd.f32 %v2412_v11, %v2147_v28  ;;  %v2318_v3 = vpop.f32.mrf.mxu0  ;;  %4696 = vmatmul.mubr.msk.bf16.gmra.mxu0 %vm324_vm1, %v4775_v37  ;;  %v2151_v61 = vadd.f32 %v2094_v52, %v6102_v14  ;;  %v2013_v38 = vpop.f32.mrf.mxu1  ;;  %4614 = vmatmul.mubr.msk.bf16.gmra.mxu1 %vm324_vm1, %v4776_v21 }
 0x2f3   : > { %v2390_v54 = vrot.slane %v2318_v3, 4  ;;  %4699 = vmatprep.mubr.msk.bf16.mxu0 %vm4787_vm0, %v6904_v27  ;;  %v2079_v56 = vrot.slane %v2013_v38, 4  ;;  %4617 = vmatprep.mubr.msk.bf16.mxu1 %vm4787_vm0, %v6904_v27 }
 0x2f4   : > { %v4513_v19 = vpop.f32.mrf.mxu0  ;;  %v4431_v35 = vpop.f32.mrf.mxu1 }
 0x2f5   : > { %v2411_v28 = vsel %vm2086_vm5, %v2389_v31, %v2390_v54  ;;  %v2093_v14 = vsel %vm2086_vm5, %v2078_v1, %v2079_v56 }
 0x2f6   : > { %v6504_v43 = vadd.f32 %v2411_v28, %v2148_v42  ;;  %v2321_v16 = vpop.f32.mrf.mxu0  ;;  %v2152_v53 = vadd.f32 %v2093_v14, %v6117_v48  ;;  %v2016_v37 = vpop.f32.mrf.mxu1 }
 0x2f7   : > { %v2391_v29 = vrot.slane %v2321_v16, 4  ;;  %v2080_v39 = vrot.slane %v2016_v37, 4 }
 0x2f8   : > { %v4514_v36 = vpop.f32.mrf.mxu0  ;;  %v4432_v23 = vpop.f32.mrf.mxu1 }
 0x2f9   : > { %v2410_v51 = vsel %vm2086_vm5, %v2390_v54, %v2391_v29  ;;  %v2092_v63 = vsel %vm2086_vm5, %v2079_v56, %v2080_v39 }
 0x2fa   : > { %v6511_v60 = vadd.f32 %v2410_v51, %v2149_v30  ;;  %v2326_v31 = vpop.f32.mrf.mxu0  ;;  %4700 = vmatmul.mubr.msk.bf16.gmra.mxu0 %vm324_vm1, %v4776_v21  ;;  %v2153_v42 = vadd.f32 %v2092_v63, %v6124_v34  ;;  %v2021_v1 = vpop.f32.mrf.mxu1  ;;  %4618 = vmatmul.mubr.msk.bf16.gmra.mxu1 %vm324_vm1, %v4777_v17 }
 0x2fb   : > { %v2392_v48 = vrot.slane %v2326_v31, 4  ;;  %4703 = vmatprep.mubr.msk.bf16.mxu0 %vm4787_vm0, %v6904_v27  ;;  %v2081_v11 = vrot.slane %v2021_v1, 4 }
 0x2fc   : > { %v4517_v62 = vpop.f32.mrf.mxu0  ;;  %v4435_v30 = vpop.f32.mrf.mxu1 }
 0x2fd   : > { %v2409_v52 = vsel %vm2086_vm5, %v2391_v29, %v2392_v48  ;;  %v2091_v3 = vsel %vm2086_vm5, %v2080_v39, %v2081_v11 }
 0x2fe   : > { %v6523_v38 = vadd.f32 %v2409_v52, %v2150_v13  ;;  %v2329_v34 = vpop.f32.mrf.mxu0  ;;  %v2154_v54 = vadd.f32 %v2091_v3, %v6139_v55  ;;  %v2024_v21 = vpop.f32.mrf.mxu1 }
 0x2ff   : > { %v2393_v56 = vrot.slane %v2329_v34, 4  ;;  %v2082_v19 = vrot.slane %v2024_v21, 4 }
 0x300   : > { %v4518_v28 = vpop.f32.mrf.mxu0  ;;  %v4436_v35 = vpop.f32.mrf.mxu1 }
 0x301   : > { %v2408_v27 = vsel %vm2086_vm5, %v2392_v48, %v2393_v56  ;;  %v2090_v14 = vsel %vm2086_vm5, %v2081_v11, %v2082_v19 }
 0x302   : > { %v6530_v16 = vadd.f32 %v2408_v27, %v2151_v61  ;;  %v2334_v37 = vpop.f32.mrf.mxu0  ;;  %4704 = vmatmul.mubr.msk.bf16.gmra.mxu0 %vm324_vm1, %v4777_v17  ;;  %v2155_v13 = vadd.f32 %v2090_v14, %v6146_v15  ;;  %v2029_v29 = vpop.f32.mrf.mxu1 }
 0x303   : > { %v2394_v55 = vrot.slane %v2334_v37, 4  ;;  %v2083_v39 = vrot.slane %v2029_v29, 4 }
 0x304   : > { %v4521_v36 = vpop.f32.mrf.mxu0  ;;  %v4439_v23 = vpop.f32.mrf.mxu1 }
 0x305   : > { %v2407_v51 = vsel %vm2086_vm5, %v2393_v56, %v2394_v55  ;;  %v2089_v63 = vsel %vm2086_vm5, %v2082_v19, %v2083_v39 }
 0x306   : > { %v6538_v31 = vadd.f32 %v2407_v51, %v2152_v53  ;;  %v2337_v61 = vpop.f32.mrf.mxu0  ;;  %v2156_v1 = vadd.f32 %v2089_v63, %v6161_v5  ;;  %v2032_v48 = vpop.f32.mrf.mxu1 }
 0x307   : > { %v2395_v17 = vrot.slane %v2337_v61, 4  ;;  %v2084_v11 = vrot.slane %v2032_v48, 4 }
 0x308   : > { %v4522_v15 = vpop.f32.mrf.mxu0  ;;  %v4440_v52 = vpop.f32.mrf.mxu1 }
 0x309   : > { %v2406_v62 = vsel %vm2086_vm5, %v2394_v55, %v2395_v17  ;;  %v2088_v30 = vsel %vm2086_vm5, %v2083_v39, %v2084_v11 }
 0x30a   : > { %v6545_v3 = vadd.f32 %v2406_v62, %v2153_v42  ;;  %v2342_v34 = vpop.f32.mrf.mxu0  ;;  %v2157_v53 = vadd.f32 %v2088_v30, %v6166_v45  ;;  %v2037_v21 = vpop.f32.mrf.mxu1 }
 0x30b   : > { %v2396_v56 = vrot.slane %v2342_v34, 4  ;;  %v2085_v19 = vrot.slane %v2037_v21, 4 }
 0x30c   : > { %v4525_v5 = vpop.f32.mrf.mxu0  ;;  %v4443_v27 = vpop.f32.mrf.mxu1 }
 0x30d   : > { %v2405_v28 = vsel %vm2086_vm5, %v2395_v17, %v2396_v56  ;;  %v2087_v35 = vsel %vm2086_vm5, %v2084_v11, %v2085_v19 }
 0x30e   : > { %v6552_v14 = vadd.f32 %v2405_v28, %v2154_v54  ;;  %v2345_v37 = vpop.f32.mrf.mxu0  ;;  %v2158_v42 = vadd.f32 %v2087_v35, %v6178_v22  ;;  %v2040_v29 = vpop.f32.mrf.mxu1 }
 0x30f   : > { %v2397_v55 = vrot.slane %v2345_v37, 4 }
 0x310   : > { %v4526_v39 = vpop.f32.mrf.mxu0  ;;  %v4444_v36 = vpop.f32.mrf.mxu1 }
 0x311   : > { %v2404_v45 = vsel %vm2086_vm5, %v2396_v56, %v2397_v55 }
 0x312   : > { %v6557_v51 = vadd.f32 %v2404_v45, %v2155_v13  ;;  %v2350_v23 = vpop.f32.mrf.mxu0  ;;  %v2044_v63 = vpop.f32.mrf.mxu1 }
 0x313   : > { %v2398_v61 = vrot.slane %v2350_v23, 4 }
 0x314   : > { %v4529_v48 = vpop.f32.mrf.mxu0  ;;  %v4447_v17 = vpop.f32.mrf.mxu1 }
 0x315   : > { %v2403_v54 = vsel %vm2086_vm5, %v2397_v55, %v2398_v61 }
 0x316   : > { %v6561_v11 = vadd.f32 %v2403_v54, %v2156_v1  ;;  %v2353_v22 = vpop.f32.mrf.mxu0  ;;  %v2046_v15 = vpop.f32.mrf.mxu1 }
 0x317   : > { %v2399_v62 = vrot.slane %v2353_v22, 4 }
 0x318   : > { %v4530_v52 = vpop.f32.mrf.mxu0  ;;  %v4448_v34 = vpop.f32.mrf.mxu1 }
 0x319   : > { %v2402_v30 = vsel %vm2086_vm5, %v2398_v61, %v2399_v62 }
 0x31a   : > { %v6565_v13 = vadd.f32 %v2402_v30, %v2157_v53  ;;  %v2358_v21 = vpop.f32.mrf.mxu0  ;;  %v2516_v19 = vpop.f32.mrf.mxu1 }
 0x31b   : > { %v2400_v56 = vrot.slane %v2358_v21, 4 }
 0x31c   : > { %v4533_v5 = vpop.f32.mrf.mxu0  ;;  %v4539_v27 = vpop.f32.mrf.mxu1 }
 0x31d   : > { %v2401_v28 = vsel %vm2086_vm5, %v2399_v62, %v2400_v56 }
 0x31e   : > { %v6569_v1 = vadd.f32 %v2401_v28, %v2158_v42  ;;  %v2361_v35 = vpop.f32.mrf.mxu0  ;;  %v2518_v37 = vpop.f32.mrf.mxu1 }
 0x320   : > { %v4534_v29 = vpop.f32.mrf.mxu0  ;;  %v4540_v55 = vpop.f32.mrf.mxu1 }
 0x322   : > { %v2831_v39 = vpop.f32.mrf.mxu0  ;;  %v2522_v45 = vpop.f32.mrf.mxu1 }
 0x324   : > { %v4625_v36 = vpop.f32.mrf.mxu0  ;;  %v4543_v23 = vpop.f32.mrf.mxu1 }
 0x326   : > { %v2833_v53 = vpop.f32.mrf.mxu0  ;;  %v2524_v63 = vpop.f32.mrf.mxu1 }
 0x328   : > { %v4626_v61 = vpop.f32.mrf.mxu0  ;;  %v4544_v48 = vpop.f32.mrf.mxu1 }
 0x329   : > { %v6583_v61 = vld [vmem:[%s6877_s2] ss:$0 sm:$0xff] }
 0x32a   : > { %v2837_v54 = vpop.f32.mrf.mxu0  ;;  %v2528_v17 = vpop.f32.mrf.mxu1 }
 0x32b   : > { %v2678_v30 = vrot.slane %v2528_v17, 5 }
 0x32c   : > { %v4629_v22 = vpop.f32.mrf.mxu0  ;;  %v4547_v15 = vpop.f32.mrf.mxu1 }
 0x32e   : > { %v2839_v62 = vpop.f32.mrf.mxu0  ;;  %v2531_v52 = vpop.f32.mrf.mxu1 }
 0x32f   : > { %v2679_v34 = vrot.slane %v2531_v52, 5 }
 0x330   : > { %v4630_v42 = vpop.f32.mrf.mxu0  ;;  %v4548_v21 = vpop.f32.mrf.mxu1 }
 0x331   : > { %v2751_v28 = vsel %vm2715_vm6, %v2678_v30, %v2679_v34 }
 0x332   : > { %v2843_v56 = vpop.f32.mrf.mxu0  ;;  %v2536_v19 = vpop.f32.mrf.mxu1  ;;  %v2752_v45 = vadd.f32 %v2751_v28, %v6229_v46 }
 0x333   : > { %v2680_v27 = vrot.slane %v2536_v19, 5  ;;  %v2993_v29 = vrot.slane %v2843_v56, 6 }
 0x334   : > { %v4633_v5 = vpop.f32.mrf.mxu0  ;;  %v4551_v35 = vpop.f32.mrf.mxu1 }
 0x335   : > { %v2750_v23 = vsel %vm2715_vm6, %v2679_v34, %v2680_v27 }
 0x336   : > { %v2846_v37 = vpop.f32.mrf.mxu0  ;;  %v2539_v55 = vpop.f32.mrf.mxu1  ;;  %v2753_v46 = vadd.f32 %v2750_v23, %v6244_v7 }
 0x337   : > { %v2994_v39 = vrot.slane %v2846_v37, 6  ;;  %v2681_v53 = vrot.slane %v2539_v55, 5 }
 0x338   : > { %v4634_v36 = vpop.f32.mrf.mxu0  ;;  %v4552_v48 = vpop.f32.mrf.mxu1 }
 0x339   : > { %v3066_v63 = vsel %vm3030_vm7, %v2993_v29, %v2994_v39  ;;  %v2749_v42 = vsel %vm2715_vm6, %v2680_v27, %v2681_v53 }
 0x33a   : > { %v3067_v54 = vadd.f32 %v3066_v63, %v2752_v45  ;;  %v2851_v17 = vpop.f32.mrf.mxu0  ;;  %v2544_v22 = vpop.f32.mrf.mxu1  ;;  %v2754_v35 = vadd.f32 %v2749_v42, %v6251_v24 }
 0x33b   : > { %v2995_v15 = vrot.slane %v2851_v17, 6  ;;  %v2682_v30 = vrot.slane %v2544_v22, 5 }
 0x33c   : > { %v3110_v62 = vadd.f32 %v6583_v61, %v3067_v54  ;;  %v4637_v52 = vpop.f32.mrf.mxu0  ;;  %v4555_v21 = vpop.f32.mrf.mxu1 }
 0x33d   : > { %v3065_v34 = vsel %vm3030_vm7, %v2994_v39, %v2995_v15  ;;  %v2748_v55 = vsel %vm2715_vm6, %v2681_v53, %v2682_v30 }
 0x33e   : > { %v3146_v56 = vmax.f32 %v3110_v62, 0.0  ;;  %v3068_v19 = vadd.f32 %v3065_v34, %v2753_v46  ;;  %v2854_v5 = vpop.f32.mrf.mxu0  ;;  %v2547_v7 = vpop.f32.mrf.mxu1  ;;  %v2755_v17 = vadd.f32 %v2748_v55, %v6266_v8 }
 0x33f   : > { %v2996_v28 = vrot.slane %v2854_v5, 6  ;;  %v2683_v39 = vrot.slane %v2547_v7, 5 }
 0x340   : > { %v3699_v27 = vpack.c.bf16 %v3146_v56, %v3146_v56  ;;  %v3111_v37 = vadd.f32 %v6583_v61, %v3068_v19  ;;  %v4638_v29 = vpop.f32.mrf.mxu0  ;;  %v4556_v36 = vpop.f32.mrf.mxu1 }
 0x341   : > { %v3064_v45 = vsel %vm3030_vm7, %v2995_v15, %v2996_v28  ;;  %v2747_v53 = vsel %vm2715_vm6, %v2682_v30, %v2683_v39 }
 0x342   : > { %3327 = vst.msk [vmem:[%s6595_s15] sm:$0xf] %vm3326_vm8, %v3699_v27  ;;  %v3147_v23 = vmax.f32 %v3111_v37, 0.0  ;;  %v3069_v63 = vadd.f32 %v3064_v45, %v2754_v35  ;;  %v2859_v48 = vpop.f32.mrf.mxu0  ;;  %v2552_v54 = vpop.f32.mrf.mxu1  ;;  %v2756_v5 = vadd.f32 %v2747_v53, %v6273_v2 }
 0x343   : > { %v2997_v24 = vrot.slane %v2859_v48, 6  ;;  %v2684_v52 = vrot.slane %v2552_v54, 5 }
 0x344   : > { %v3700_v22 = vpack.c.bf16 %v3147_v23, %v3147_v23  ;;  %v3112_v46 = vadd.f32 %v6583_v61, %v3069_v63  ;;  %v4641_v62 = vpop.f32.mrf.mxu0  ;;  %v4559_v42 = vpop.f32.mrf.mxu1 }
 0x345   : > { %v3063_v15 = vsel %vm3030_vm7, %v2996_v28, %v2997_v24  ;;  %v2746_v30 = vsel %vm2715_vm6, %v2683_v39, %v2684_v52 }
 0x346   : > { %3328 = vst.msk [vmem:[%s6595_s15 + $0x4] sm:$0xf] %vm3326_vm8, %v3700_v22  ;;  %v3148_v34 = vmax.f32 %v3112_v46, 0.0  ;;  %v3070_v21 = vadd.f32 %v3063_v15, %v2755_v17  ;;  %v2862_v56 = vpop.f32.mrf.mxu0  ;;  %v2555_v19 = vpop.f32.mrf.mxu1  ;;  %v2757_v63 = vadd.f32 %v2746_v30, %v6288_v59 }
 0x347   : > { %v2998_v8 = vrot.slane %v2862_v56, 6  ;;  %v2685_v37 = vrot.slane %v2555_v19, 5 }
 0x348   : > { %v3701_v7 = vpack.c.bf16 %v3148_v34, %v3148_v34  ;;  %v3113_v35 = vadd.f32 %v6583_v61, %v3070_v21  ;;  %v4642_v27 = vpop.f32.mrf.mxu0  ;;  %v4560_v29 = vpop.f32.mrf.mxu1 }
 0x349   : > { %v3062_v28 = vsel %vm3030_vm7, %v2997_v24, %v2998_v8  ;;  %v2745_v39 = vsel %vm2715_vm6, %v2684_v52, %v2685_v37 }
 0x34a   : > { %3329 = vst.msk [vmem:[%s6595_s15 + $0x8] sm:$0xf] %vm3326_vm8, %v3701_v7  ;;  %v3149_v55 = vmax.f32 %v3113_v35, 0.0  ;;  %v3071_v45 = vadd.f32 %v3062_v28, %v2756_v5  ;;  %v2867_v36 = vpop.f32.mrf.mxu0  ;;  %v2560_v23 = vpop.f32.mrf.mxu1  ;;  %v2758_v34 = vadd.f32 %v2745_v39, %v6295_v58 }
 0x34b   : > { %v2999_v2 = vrot.slane %v2867_v36, 6  ;;  %v2686_v22 = vrot.slane %v2560_v23, 5 }
 0x34c   : > { %v3702_v48 = vpack.c.bf16 %v3149_v55, %v3149_v55  ;;  %v3114_v54 = vadd.f32 %v6583_v61, %v3071_v45  ;;  %v4645_v17 = vpop.f32.mrf.mxu0  ;;  %v4563_v46 = vpop.f32.mrf.mxu1 }
 0x34d   : > { %v3061_v24 = vsel %vm3030_vm7, %v2998_v8, %v2999_v2  ;;  %v2744_v52 = vsel %vm2715_vm6, %v2685_v37, %v2686_v22 }
 0x34e   : > { %3330 = vst.msk [vmem:[%s6595_s15 + $0xc] sm:$0xf] %vm3326_vm8, %v3702_v48  ;;  %v3150_v62 = vmax.f32 %v3114_v54, 0.0  ;;  %v3072_v53 = vadd.f32 %v3061_v24, %v2757_v63  ;;  %v2870_v15 = vpop.f32.mrf.mxu0  ;;  %v2563_v42 = vpop.f32.mrf.mxu1  ;;  %v2759_v29 = vadd.f32 %v2744_v52, %v6310_v9 }
 0x34f   : > { %v3000_v59 = vrot.slane %v2870_v15, 6  ;;  %v2687_v5 = vrot.slane %v2563_v42, 5 }
 0x350   : > { %v3703_v21 = vpack.c.bf16 %v3150_v62, %v3150_v62  ;;  %v3115_v56 = vadd.f32 %v6583_v61, %v3072_v53  ;;  %v4646_v19 = vpop.f32.mrf.mxu0  ;;  %v4564_v7 = vpop.f32.mrf.mxu1 }
 0x351   : > { %v3060_v8 = vsel %vm3030_vm7, %v2999_v2, %v3000_v59  ;;  %v2743_v37 = vsel %vm2715_vm6, %v2686_v22, %v2687_v5 }
 0x352   : > { %3331 = vst.msk [vmem:[%s6595_s15 + $0x10] sm:$0xf] %vm3326_vm8, %v3703_v21  ;;  %v3151_v35 = vmax.f32 %v3115_v56, 0.0  ;;  %v3073_v27 = vadd.f32 %v3060_v8, %v2758_v34  ;;  %v2875_v30 = vpop.f32.mrf.mxu0  ;;  %v2568_v28 = vpop.f32.mrf.mxu1  ;;  %v2760_v24 = vadd.f32 %v2743_v37, %v6317_v50 }
 0x353   : > { %v3001_v58 = vrot.slane %v2875_v30, 6  ;;  %v2688_v23 = vrot.slane %v2568_v28, 5 }
 0x354   : > { %v3704_v55 = vpack.c.bf16 %v3151_v35, %v3151_v35  ;;  %v3116_v45 = vadd.f32 %v6583_v61, %v3073_v27  ;;  %v4649_v36 = vpop.f32.mrf.mxu0  ;;  %v4567_v63 = vpop.f32.mrf.mxu1 }
 0x355   : > { %v3059_v2 = vsel %vm3030_vm7, %v3000_v59, %v3001_v58  ;;  %v2742_v22 = vsel %vm2715_vm6, %v2687_v5, %v2688_v23 }
 0x356   : > { %3332 = vst.msk [vmem:[%s6595_s15 + $0x14] sm:$0xf] %vm3326_vm8, %v3704_v55  ;;  %v3152_v48 = vmax.f32 %v3116_v45, 0.0  ;;  %v3074_v54 = vadd.f32 %v3059_v2, %v2759_v29  ;;  %v2878_v17 = vpop.f32.mrf.mxu0  ;;  %v2571_v39 = vpop.f32.mrf.mxu1  ;;  %v2761_v52 = vadd.f32 %v2742_v22, %v6332_v18 }
 0x357   : > { %v3002_v9 = vrot.slane %v2878_v17, 6  ;;  %v2689_v15 = vrot.slane %v2571_v39, 5 }
 0x358   : > { %v3705_v46 = vpack.c.bf16 %v3152_v48, %v3152_v48  ;;  %v3117_v62 = vadd.f32 %v6583_v61, %v3074_v54  ;;  %v4650_v53 = vpop.f32.mrf.mxu0  ;;  %v4568_v59 = vpop.f32.mrf.mxu1 }
 0x359   : > { %v3058_v42 = vsel %vm3030_vm7, %v3001_v58, %v3002_v9  ;;  %v2741_v5 = vsel %vm2715_vm6, %v2688_v23, %v2689_v15 }
 0x35a   : > { %3333 = vst.msk [vmem:[%s6595_s15 + $0x18] sm:$0xf] %vm3326_vm8, %v3705_v46  ;;  %v3153_v34 = vmax.f32 %v3117_v62, 0.0  ;;  %v3075_v21 = vadd.f32 %v3058_v42, %v2760_v24  ;;  %v2883_v56 = vpop.f32.mrf.mxu0  ;;  %v2576_v19 = vpop.f32.mrf.mxu1  ;;  %v2762_v36 = vadd.f32 %v2741_v5, %v6339_v44 }
 0x35b   : > { %v3003_v50 = vrot.slane %v2883_v56, 6  ;;  %v2690_v27 = vrot.slane %v2576_v19, 5 }
 0x35c   : > { %v3706_v8 = vpack.c.bf16 %v3153_v34, %v3153_v34  ;;  %v3118_v7 = vadd.f32 %v6583_v61, %v3075_v21  ;;  %v4653_v35 = vpop.f32.mrf.mxu0  ;;  %v4571_v28 = vpop.f32.mrf.mxu1 }
 0x35d   : > { %v3057_v30 = vsel %vm3030_vm7, %v3002_v9, %v3003_v50  ;;  %v2740_v23 = vsel %vm2715_vm6, %v2689_v15, %v2690_v27 }
 0x35e   : > { %3334 = vst.msk [vmem:[%s6595_s15 + $0x1c] sm:$0xf] %vm3326_vm8, %v3706_v8  ;;  %v3154_v58 = vmax.f32 %v3118_v7, 0.0  ;;  %v3076_v29 = vadd.f32 %v3057_v30, %v2761_v52  ;;  %v2886_v55 = vpop.f32.mrf.mxu0  ;;  %v2579_v45 = vpop.f32.mrf.mxu1  ;;  %v2763_v62 = vadd.f32 %v2740_v23, %v6354_v33 }
 0x35f   : > { %v3004_v18 = vrot.slane %v2886_v55, 6  ;;  %v2691_v48 = vrot.slane %v2579_v45, 5 }
 0x360   : > { %v3707_v37 = vpack.c.bf16 %v3154_v58, %v3154_v58  ;;  %v3119_v2 = vadd.f32 %v6583_v61, %v3076_v29  ;;  %v4654_v63 = vpop.f32.mrf.mxu0  ;;  %v4572_v17 = vpop.f32.mrf.mxu1 }
 0x361   : > { %v3056_v54 = vsel %vm3030_vm7, %v3003_v50, %v3004_v18  ;;  %v2739_v15 = vsel %vm2715_vm6, %v2690_v27, %v2691_v48 }
 0x362   : > { %3335 = vst.msk [vmem:[%s6595_s15 + $0x20] sm:$0xf] %vm3326_vm8, %v3707_v37  ;;  %v3155_v39 = vmax.f32 %v3119_v2, 0.0  ;;  %v3077_v9 = vadd.f32 %v3056_v54, %v2762_v36  ;;  %v2891_v24 = vpop.f32.mrf.mxu0  ;;  %v2584_v46 = vpop.f32.mrf.mxu1  ;;  %v2764_v8 = vadd.f32 %v2739_v15, %v6361_v20 }
 0x363   : > { %v3005_v44 = vrot.slane %v2891_v24, 6  ;;  %v2692_v59 = vrot.slane %v2584_v46, 5 }
 0x364   : > { %v3708_v53 = vpack.c.bf16 %v3155_v39, %v3155_v39  ;;  %v3120_v22 = vadd.f32 %v6583_v61, %v3077_v9  ;;  %v4657_v42 = vpop.f32.mrf.mxu0  ;;  %v4575_v21 = vpop.f32.mrf.mxu1 }
 0x365   : > { %v3055_v34 = vsel %vm3030_vm7, %v3004_v18, %v3005_v44  ;;  %v2738_v27 = vsel %vm2715_vm6, %v2691_v48, %v2692_v59 }
 0x366   : > { %3336 = vst.msk [vmem:[%s6595_s15 + $0x24] sm:$0xf] %vm3326_vm8, %v3708_v53  ;;  %v3156_v56 = vmax.f32 %v3120_v22, 0.0  ;;  %v3078_v19 = vadd.f32 %v3055_v34, %v2763_v62  ;;  %v2894_v50 = vpop.f32.mrf.mxu0  ;;  %v2587_v52 = vpop.f32.mrf.mxu1  ;;  %v2765_v36 = vadd.f32 %v2738_v27, %v6376_v41 }
 0x367   : > { %v3006_v33 = vrot.slane %v2894_v50, 6  ;;  %v2693_v30 = vrot.slane %v2587_v52, 5 }
 0x368   : > { %v3709_v7 = vpack.c.bf16 %v3156_v56, %v3156_v56  ;;  %v3121_v35 = vadd.f32 %v6583_v61, %v3078_v19  ;;  %v4658_v5 = vpop.f32.mrf.mxu0  ;;  %v4576_v58 = vpop.f32.mrf.mxu1 }
 0x369   : > { %v3054_v28 = vsel %vm3030_vm7, %v3005_v44, %v3006_v33  ;;  %v2737_v23 = vsel %vm2715_vm6, %v2692_v59, %v2693_v30 }
 0x36a   : > { %3337 = vst.msk [vmem:[%s6595_s15 + $0x28] sm:$0xf] %vm3326_vm8, %v3709_v7  ;;  %v3157_v29 = vmax.f32 %v3121_v35, 0.0  ;;  %v3079_v55 = vadd.f32 %v3054_v28, %v2764_v8  ;;  %v2899_v45 = vpop.f32.mrf.mxu0  ;;  %v2592_v18 = vpop.f32.mrf.mxu1  ;;  %v2766_v44 = vadd.f32 %v2737_v23, %v6383_v47 }
 0x36b   : > { %v3007_v20 = vrot.slane %v2899_v45, 6  ;;  %v2694_v48 = vrot.slane %v2592_v18, 5 }
 0x36c   : > { %v3710_v37 = vpack.c.bf16 %v3157_v29, %v3157_v29  ;;  %v3122_v2 = vadd.f32 %v6583_v61, %v3079_v55  ;;  %v4661_v63 = vpop.f32.mrf.mxu0  ;;  %v4579_v17 = vpop.f32.mrf.mxu1 }
 0x36d   : > { %v3053_v54 = vsel %vm3030_vm7, %v3006_v33, %v3007_v20  ;;  %v2736_v42 = vsel %vm2715_vm6, %v2693_v30, %v2694_v48 }
 0x36e   : > { %3338 = vst.msk [vmem:[%s6595_s15 + $0x2c] sm:$0xf] %vm3326_vm8, %v3710_v37  ;;  %v3158_v39 = vmax.f32 %v3122_v2, 0.0  ;;  %v3080_v9 = vadd.f32 %v3053_v54, %v2765_v36  ;;  %v2902_v24 = vpop.f32.mrf.mxu0  ;;  %v2595_v46 = vpop.f32.mrf.mxu1  ;;  %v2767_v52 = vadd.f32 %v2736_v42, %v6398_v26 }
 0x36f   : > { %v3008_v41 = vrot.slane %v2902_v24, 6  ;;  %v2695_v15 = vrot.slane %v2595_v46, 5 }
 0x370   : > { %v3711_v62 = vpack.c.bf16 %v3158_v39, %v3158_v39  ;;  %v3123_v53 = vadd.f32 %v6583_v61, %v3080_v9  ;;  %v4662_v22 = vpop.f32.mrf.mxu0  ;;  %v4580_v34 = vpop.f32.mrf.mxu1 }
 0x371   : > { %v3052_v59 = vsel %vm3030_vm7, %v3007_v20, %v3008_v41  ;;  %v2735_v35 = vsel %vm2715_vm6, %v2694_v48, %v2695_v15 }
 0x372   : > { %3339 = vst.msk [vmem:[%s6595_s15 + $0x30] sm:$0xf] %vm3326_vm8, %v3711_v62  ;;  %v3159_v21 = vmax.f32 %v3123_v53, 0.0  ;;  %v3081_v56 = vadd.f32 %v3052_v59, %v2766_v44  ;;  %v2907_v19 = vpop.f32.mrf.mxu0  ;;  %v2600_v50 = vpop.f32.mrf.mxu1  ;;  %v2768_v45 = vadd.f32 %v2735_v35, %v6405_v32 }
 0x373   : > { %v3009_v47 = vrot.slane %v2907_v19, 6  ;;  %v2696_v5 = vrot.slane %v2600_v50, 5 }
 0x374   : > { %v3712_v33 = vpack.c.bf16 %v3159_v21, %v3159_v21  ;;  %v3124_v8 = vadd.f32 %v6583_v61, %v3081_v56  ;;  %v4665_v7 = vpop.f32.mrf.mxu0  ;;  %v4583_v30 = vpop.f32.mrf.mxu1 }
 0x375   : > { %v3051_v27 = vsel %vm3030_vm7, %v3008_v41, %v3009_v47  ;;  %v2734_v37 = vsel %vm2715_vm6, %v2695_v15, %v2696_v5 }
 0x376   : > { %3340 = vst.msk [vmem:[%s6595_s15 + $0x34] sm:$0xf] %vm3326_vm8, %v3712_v33  ;;  %v3160_v28 = vmax.f32 %v3124_v8, 0.0  ;;  %v3082_v58 = vadd.f32 %v3051_v27, %v2767_v52  ;;  %v2910_v29 = vpop.f32.mrf.mxu0  ;;  %v2603_v55 = vpop.f32.mrf.mxu1  ;;  %v2769_v9 = vadd.f32 %v2734_v37, %v6420_v6 }
 0x377   : > { %v3010_v26 = vrot.slane %v2910_v29, 6  ;;  %v2697_v2 = vrot.slane %v2603_v55, 5 }
 0x378   : > { %v3713_v18 = vpack.c.bf16 %v3160_v28, %v3160_v28  ;;  %v3125_v20 = vadd.f32 %v6583_v61, %v3082_v58  ;;  %v4666_v36 = vpop.f32.mrf.mxu0  ;;  %v4584_v23 = vpop.f32.mrf.mxu1 }
 0x379   : > { %v3050_v63 = vsel %vm3030_vm7, %v3009_v47, %v3010_v26  ;;  %v2733_v44 = vsel %vm2715_vm6, %v2696_v5, %v2697_v2 }
 0x37a   : > { %3341 = vst.msk [vmem:[%s6595_s15 + $0x38] sm:$0xf] %vm3326_vm8, %v3713_v18  ;;  %v3161_v48 = vmax.f32 %v3125_v20, 0.0  ;;  %v3083_v54 = vadd.f32 %v3050_v63, %v2768_v45  ;;  %v2915_v17 = vpop.f32.mrf.mxu0  ;;  %v2608_v39 = vpop.f32.mrf.mxu1  ;;  %v2770_v21 = vadd.f32 %v2733_v44, %v6427_v0 }
 0x37b   : > { %v3011_v32 = vrot.slane %v2915_v17, 6  ;;  %v2698_v62 = vrot.slane %v2608_v39, 5 }
 0x37c   : > { %v3714_v24 = vpack.c.bf16 %v3161_v48, %v3161_v48  ;;  %v3126_v46 = vadd.f32 %v6583_v61, %v3083_v54  ;;  %v4669_v41 = vpop.f32.mrf.mxu0  ;;  %v4587_v22 = vpop.f32.mrf.mxu1 }
 0x37d   : > { %v3049_v53 = vsel %vm3030_vm7, %v3010_v26, %v3011_v32  ;;  %v2732_v47 = vsel %vm2715_vm6, %v2697_v2, %v2698_v62 }
 0x37e   : > { %3342 = vst.msk [vmem:[%s6595_s15 + $0x3c] sm:$0xf] %vm3326_vm8, %v3714_v24  ;;  %v3162_v42 = vmax.f32 %v3126_v46, 0.0  ;;  %v3084_v15 = vadd.f32 %v3049_v53, %v2769_v9  ;;  %v2918_v59 = vpop.f32.mrf.mxu0  ;;  %v2611_v34 = vpop.f32.mrf.mxu1  ;;  %v2771_v30 = vadd.f32 %v2732_v47, %v6441_v4 }
 0x37f   : > { %v3012_v6 = vrot.slane %v2918_v59, 6  ;;  %v2699_v52 = vrot.slane %v2611_v34, 5 }
 0x380   : > { %v3715_v56 = vpack.c.bf16 %v3162_v42, %v3162_v42  ;;  %v3127_v19 = vadd.f32 %v6583_v61, %v3084_v15  ;;  %v4670_v50 = vpop.f32.mrf.mxu0  ;;  %v4588_v8 = vpop.f32.mrf.mxu1 }
 0x381   : > { %v3048_v33 = vsel %vm3030_vm7, %v3011_v32, %v3012_v6  ;;  %v2731_v55 = vsel %vm2715_vm6, %v2698_v62, %v2699_v52 }
 0x382   : > { %3343 = vst.msk [vmem:[%s6595_s15 + $0x40] sm:$0xf] %vm3326_vm8, %v3715_v56  ;;  %v3163_v7 = vmax.f32 %v3127_v19, 0.0  ;;  %v3085_v35 = vadd.f32 %v3048_v33, %v2770_v21  ;;  %v2923_v5 = vpop.f32.mrf.mxu0  ;;  %v2616_v27 = vpop.f32.mrf.mxu1  ;;  %v2772_v63 = vadd.f32 %v2731_v55, %v6448_v40 }
 0x383   : > { %v3013_v0 = vrot.slane %v2923_v5, 6  ;;  %v2700_v26 = vrot.slane %v2616_v27, 5 }
 0x384   : > { %v3716_v28 = vpack.c.bf16 %v3163_v7, %v3163_v7  ;;  %v3128_v58 = vadd.f32 %v6583_v61, %v3085_v35  ;;  %v4673_v29 = vpop.f32.mrf.mxu0  ;;  %v4591_v18 = vpop.f32.mrf.mxu1 }
 0x385   : > { %v3047_v45 = vsel %vm3030_vm7, %v3012_v6, %v3013_v0  ;;  %v2730_v17 = vsel %vm2715_vm6, %v2699_v52, %v2700_v26 }
 0x386   : > { %3344 = vst.msk [vmem:[%s6595_s15 + $0x44] sm:$0xf] %vm3326_vm8, %v3716_v28  ;;  %v3164_v20 = vmax.f32 %v3128_v58, 0.0  ;;  %v3086_v36 = vadd.f32 %v3047_v45, %v2771_v30  ;;  %v2926_v37 = vpop.f32.mrf.mxu0  ;;  %v2619_v2 = vpop.f32.mrf.mxu1  ;;  %v2773_v62 = vadd.f32 %v2730_v17, %v6462_v10 }
 0x387   : > { %v3014_v4 = vrot.slane %v2926_v37, 6  ;;  %v2701_v39 = vrot.slane %v2619_v2, 5 }
 0x388   : > { %v3717_v23 = vpack.c.bf16 %v3164_v20, %v3164_v20  ;;  %v3129_v48 = vadd.f32 %v6583_v61, %v3086_v36  ;;  %v4674_v54 = vpop.f32.mrf.mxu0  ;;  %v4592_v9 = vpop.f32.mrf.mxu1 }
 0x389   : > { %v3046_v32 = vsel %vm3030_vm7, %v3013_v0, %v3014_v4  ;;  %v2729_v15 = vsel %vm2715_vm6, %v2700_v26, %v2701_v39 }
 0x38a   : > { %3345 = vst.msk [vmem:[%s6595_s15 + $0x48] sm:$0xf] %vm3326_vm8, %v3717_v23  ;;  %v3165_v24 = vmax.f32 %v3129_v48, 0.0  ;;  %v3087_v46 = vadd.f32 %v3046_v32, %v2772_v63  ;;  %v2931_v41 = vpop.f32.mrf.mxu0  ;;  %v2624_v44 = vpop.f32.mrf.mxu1  ;;  %v2774_v47 = vadd.f32 %v2729_v15, %v6469_v57 }
 0x38b   : > { %v3015_v40 = vrot.slane %v2931_v41, 6  ;;  %v2702_v59 = vrot.slane %v2624_v44, 5 }
 0x38c   : > { %v3718_v53 = vpack.c.bf16 %v3165_v24, %v3165_v24  ;;  %v3130_v22 = vadd.f32 %v6583_v61, %v3087_v46  ;;  %v4677_v42 = vpop.f32.mrf.mxu0  ;;  %v4595_v6 = vpop.f32.mrf.mxu1 }
 0x38d   : > { %v3045_v34 = vsel %vm3030_vm7, %v3014_v4, %v3015_v40  ;;  %v2728_v7 = vsel %vm2715_vm6, %v2701_v39, %v2702_v59 }
 0x38e   : > { %3346 = vst.msk [vmem:[%s6595_s15 + $0x4c] sm:$0xf] %vm3326_vm8, %v3718_v53  ;;  %v3166_v21 = vmax.f32 %v3130_v22, 0.0  ;;  %v3088_v56 = vadd.f32 %v3045_v34, %v2773_v62  ;;  %v2934_v19 = vpop.f32.mrf.mxu0  ;;  %v2627_v50 = vpop.f32.mrf.mxu1  ;;  %v2775_v29 = vadd.f32 %v2728_v7, %v6483_v49 }
 0x38f   : > { %v3016_v10 = vrot.slane %v2934_v19, 6  ;;  %v2703_v35 = vrot.slane %v2627_v50, 5 }
 0x390   : > { %v3719_v52 = vpack.c.bf16 %v3166_v21, %v3166_v21  ;;  %v3131_v33 = vadd.f32 %v6583_v61, %v3088_v56  ;;  %v4678_v8 = vpop.f32.mrf.mxu0  ;;  %v4596_v27 = vpop.f32.mrf.mxu1 }
 0x391   : > { %v3044_v5 = vsel %vm3030_vm7, %v3015_v40, %v3016_v10  ;;  %v2727_v18 = vsel %vm2715_vm6, %v2702_v59, %v2703_v35 }
 0x392   : > { %3347 = vst.msk [vmem:[%s6595_s15 + $0x50] sm:$0xf] %vm3326_vm8, %v3719_v52  ;;  %v3167_v0 = vmax.f32 %v3131_v33, 0.0  ;;  %v3089_v30 = vadd.f32 %v3044_v5, %v2774_v47  ;;  %v2939_v28 = vpop.f32.mrf.mxu0  ;;  %v2632_v58 = vpop.f32.mrf.mxu1  ;;  %v2776_v48 = vadd.f32 %v2727_v18, %v6490_v12 }
 0x393   : > { %v3017_v57 = vrot.slane %v2939_v28, 6  ;;  %v2704_v20 = vrot.slane %v2632_v58, 5 }
 0x394   : > { %v3720_v55 = vpack.c.bf16 %v3167_v0, %v3167_v0  ;;  %v3132_v26 = vadd.f32 %v6583_v61, %v3089_v30  ;;  %v4681_v45 = vpop.f32.mrf.mxu0  ;;  %v4599_v37 = vpop.f32.mrf.mxu1 }
 0x395   : > { %v3043_v36 = vsel %vm3030_vm7, %v3016_v10, %v3017_v57  ;;  %v2726_v32 = vsel %vm2715_vm6, %v2703_v35, %v2704_v20 }
 0x396   : > { %3348 = vst.msk [vmem:[%s6595_s15 + $0x54] sm:$0xf] %vm3326_vm8, %v3720_v55  ;;  %v3168_v2 = vmax.f32 %v3132_v26, 0.0  ;;  %v3090_v4 = vadd.f32 %v3043_v36, %v2775_v29  ;;  %v2942_v63 = vpop.f32.mrf.mxu0  ;;  %v2635_v23 = vpop.f32.mrf.mxu1  ;;  %v2777_v53 = vadd.f32 %v2726_v32, %v6504_v43 }
 0x397   : > { %v3018_v49 = vrot.slane %v2942_v63, 6  ;;  %v2705_v9 = vrot.slane %v2635_v23, 5 }
 0x398   : > { %v3721_v54 = vpack.c.bf16 %v3168_v2, %v3168_v2  ;;  %v3133_v17 = vadd.f32 %v6583_v61, %v3090_v4  ;;  %v4682_v39 = vpop.f32.mrf.mxu0  ;;  %v4600_v46 = vpop.f32.mrf.mxu1 }
 0x399   : > { %v3042_v24 = vsel %vm3030_vm7, %v3017_v57, %v3018_v49  ;;  %v2725_v59 = vsel %vm2715_vm6, %v2704_v20, %v2705_v9 }
 0x39a   : > { %3349 = vst.msk [vmem:[%s6595_s15 + $0x58] sm:$0xf] %vm3326_vm8, %v3721_v54  ;;  %v3169_v41 = vmax.f32 %v3133_v17, 0.0  ;;  %v3091_v44 = vadd.f32 %v3042_v24, %v2776_v48  ;;  %v2947_v40 = vpop.f32.mrf.mxu0  ;;  %v2640_v62 = vpop.f32.mrf.mxu1  ;;  %v2778_v47 = vadd.f32 %v2725_v59, %v6511_v60 }
 0x39b   : > { %v3019_v12 = vrot.slane %v2947_v40, 6  ;;  %v2706_v34 = vrot.slane %v2640_v62, 5 }
 0x39c   : > { %v3722_v22 = vpack.c.bf16 %v3169_v41, %v3169_v41  ;;  %v3134_v42 = vadd.f32 %v6583_v61, %v3091_v44  ;;  %v4685_v15 = vpop.f32.mrf.mxu0  ;;  %v4603_v21 = vpop.f32.mrf.mxu1 }
 0x39d   : > { %v3041_v6 = vsel %vm3030_vm7, %v3018_v49, %v3019_v12  ;;  %v2724_v7 = vsel %vm2715_vm6, %v2705_v9, %v2706_v34 }
 0x39e   : > { %3350 = vst.msk [vmem:[%s6595_s15 + $0x5c] sm:$0xf] %vm3326_vm8, %v3722_v22  ;;  %v3170_v56 = vmax.f32 %v3134_v42, 0.0  ;;  %v3092_v19 = vadd.f32 %v3041_v6, %v2777_v53  ;;  %v2950_v50 = vpop.f32.mrf.mxu0  ;;  %v2643_v10 = vpop.f32.mrf.mxu1  ;;  %v2779_v57 = vadd.f32 %v2724_v7, %v6523_v38 }
 0x39f   : > { %v3020_v43 = vrot.slane %v2950_v50, 6  ;;  %v2707_v35 = vrot.slane %v2643_v10, 5 }
 0x3a0   : > { %v3723_v52 = vpack.c.bf16 %v3170_v56, %v3170_v56  ;;  %v3135_v33 = vadd.f32 %v6583_v61, %v3092_v19  ;;  %v4686_v8 = vpop.f32.mrf.mxu0  ;;  %v4604_v27 = vpop.f32.mrf.mxu1 }
 0x3a1   : > { %v3040_v5 = vsel %vm3030_vm7, %v3019_v12, %v3020_v43  ;;  %v2723_v45 = vsel %vm2715_vm6, %v2706_v34, %v2707_v35 }
 0x3a2   : > { %3351 = vst.msk [vmem:[%s6595_s15 + $0x60] sm:$0xf] %vm3326_vm8, %v3723_v52  ;;  %v3171_v0 = vmax.f32 %v3135_v33, 0.0  ;;  %v3093_v30 = vadd.f32 %v3040_v5, %v2778_v47  ;;  %v2955_v28 = vpop.f32.mrf.mxu0  ;;  %v2648_v58 = vpop.f32.mrf.mxu1  ;;  %v2780_v23 = vadd.f32 %v2723_v45, %v6530_v16 }
 0x3a3   : > { %v3021_v60 = vrot.slane %v2955_v28, 6  ;;  %v2708_v18 = vrot.slane %v2648_v58, 5 }
 0x3a4   : > { %v3724_v29 = vpack.c.bf16 %v3171_v0, %v3171_v0  ;;  %v3136_v55 = vadd.f32 %v6583_v61, %v3093_v30  ;;  %v4689_v26 = vpop.f32.mrf.mxu0  ;;  %v4607_v36 = vpop.f32.mrf.mxu1 }
 0x3a5   : > { %v3039_v20 = vsel %vm3030_vm7, %v3020_v43, %v3021_v60  ;;  %v2722_v17 = vsel %vm2715_vm6, %v2707_v35, %v2708_v18 }
 0x3a6   : > { %3352 = vst.msk [vmem:[%s6595_s15 + $0x64] sm:$0xf] %vm3326_vm8, %v3724_v29  ;;  %v3172_v37 = vmax.f32 %v3136_v55, 0.0  ;;  %v3094_v2 = vadd.f32 %v3039_v20, %v2779_v57  ;;  %v2958_v4 = vpop.f32.mrf.mxu0  ;;  %v2651_v63 = vpop.f32.mrf.mxu1  ;;  %v2781_v40 = vadd.f32 %v2722_v17, %v6538_v31 }
 0x3a7   : > { %v3022_v38 = vrot.slane %v2958_v4, 6  ;;  %v2709_v39 = vrot.slane %v2651_v63, 5 }
 0x3a8   : > { %v3725_v49 = vpack.c.bf16 %v3172_v37, %v3172_v37  ;;  %v3137_v48 = vadd.f32 %v6583_v61, %v3094_v2  ;;  %v4690_v54 = vpop.f32.mrf.mxu0  ;;  %v4608_v9 = vpop.f32.mrf.mxu1 }
 0x3a9   : > { %v3038_v32 = vsel %vm3030_vm7, %v3021_v60, %v3022_v38  ;;  %v2721_v22 = vsel %vm2715_vm6, %v2708_v18, %v2709_v39 }
 0x3aa   : > { %3353 = vst.msk [vmem:[%s6595_s15 + $0x68] sm:$0xf] %vm3326_vm8, %v3725_v49  ;;  %v3173_v24 = vmax.f32 %v3137_v48, 0.0  ;;  %v3095_v46 = vadd.f32 %v3038_v32, %v2780_v23  ;;  %v2963_v41 = vpop.f32.mrf.mxu0  ;;  %v2656_v44 = vpop.f32.mrf.mxu1  ;;  %v2782_v19 = vadd.f32 %v2721_v22, %v6545_v3 }
 0x3ab   : > { %v3023_v16 = vrot.slane %v2963_v41, 6  ;;  %v2710_v42 = vrot.slane %v2656_v44, 5 }
 0x3ac   : > { %v3726_v62 = vpack.c.bf16 %v3173_v24, %v3173_v24  ;;  %v3138_v12 = vadd.f32 %v6583_v61, %v3095_v46  ;;  %v4693_v53 = vpop.f32.mrf.mxu0  ;;  %v4611_v59 = vpop.f32.mrf.mxu1 }
 0x3ad   : > { %v3037_v15 = vsel %vm3030_vm7, %v3022_v38, %v3023_v16  ;;  %v2720_v47 = vsel %vm2715_vm6, %v2709_v39, %v2710_v42 }
 0x3ae   : > { %3354 = vst.msk [vmem:[%s6595_s15 + $0x6c] sm:$0xf] %vm3326_vm8, %v3726_v62  ;;  %v3174_v34 = vmax.f32 %v3138_v12, 0.0  ;;  %v3096_v6 = vadd.f32 %v3037_v15, %v2781_v40  ;;  %v2966_v21 = vpop.f32.mrf.mxu0  ;;  %v2659_v56 = vpop.f32.mrf.mxu1  ;;  %v2783_v0 = vadd.f32 %v2720_v47, %v6552_v14 }
 0x3af   : > { %v3024_v31 = vrot.slane %v2966_v21, 6  ;;  %v2711_v52 = vrot.slane %v2659_v56, 5 }
 0x3b0   : > { %v3727_v50 = vpack.c.bf16 %v3174_v34, %v3174_v34  ;;  %v3139_v10 = vadd.f32 %v6583_v61, %v3096_v6  ;;  %v4694_v43 = vpop.f32.mrf.mxu0  ;;  %v4612_v8 = vpop.f32.mrf.mxu1 }
 0x3b1   : > { %v3036_v33 = vsel %vm3030_vm7, %v3023_v16, %v3024_v31  ;;  %v2719_v60 = vsel %vm2715_vm6, %v2710_v42, %v2711_v52 }
 0x3b2   : > { %3355 = vst.msk [vmem:[%s6595_s15 + $0x70] sm:$0xf] %vm3326_vm8, %v3727_v50  ;;  %v3175_v7 = vmax.f32 %v3139_v10, 0.0  ;;  %v3097_v35 = vadd.f32 %v3036_v33, %v2782_v19  ;;  %v2971_v5 = vpop.f32.mrf.mxu0  ;;  %v2664_v27 = vpop.f32.mrf.mxu1  ;;  %v2784_v36 = vadd.f32 %v2719_v60, %v6557_v51 }
 0x3b3   : > { %v3025_v3 = vrot.slane %v2971_v5, 6  ;;  %v2712_v57 = vrot.slane %v2664_v27, 5 }
 0x3b4   : > { %v3728_v30 = vpack.c.bf16 %v3175_v7, %v3175_v7  ;;  %v3140_v28 = vadd.f32 %v6583_v61, %v3097_v35  ;;  %v4697_v58 = vpop.f32.mrf.mxu0  ;;  %v4615_v55 = vpop.f32.mrf.mxu1 }
 0x3b5   : > { %v3035_v29 = vsel %vm3030_vm7, %v3024_v31, %v3025_v3  ;;  %v2718_v63 = vsel %vm2715_vm6, %v2711_v52, %v2712_v57 }
 0x3b6   : > { %3356 = vst.msk [vmem:[%s6595_s15 + $0x74] sm:$0xf] %vm3326_vm8, %v3728_v30  ;;  %v3176_v26 = vmax.f32 %v3140_v28, 0.0  ;;  %v3098_v45 = vadd.f32 %v3035_v29, %v2783_v0  ;;  %v2974_v18 = vpop.f32.mrf.mxu0  ;;  %v2667_v20 = vpop.f32.mrf.mxu1  ;;  %v2785_v32 = vadd.f32 %v2718_v63, %v6561_v11 }
 0x3b7   : > { %v3026_v14 = vrot.slane %v2974_v18, 6  ;;  %v2713_v38 = vrot.slane %v2667_v20, 5 }
 0x3b8   : > { %v3729_v37 = vpack.c.bf16 %v3176_v26, %v3176_v26  ;;  %v3141_v2 = vadd.f32 %v6583_v61, %v3098_v45  ;;  %v4698_v4 = vpop.f32.mrf.mxu0  ;;  %v4616_v49 = vpop.f32.mrf.mxu1 }
 0x3b9   : > { %v3034_v23 = vsel %vm3030_vm7, %v3025_v3, %v3026_v14  ;;  %v2717_v41 = vsel %vm2715_vm6, %v2712_v57, %v2713_v38 }
 0x3ba   : > { %3357 = vst.msk [vmem:[%s6595_s15 + $0x78] sm:$0xf] %vm3326_vm8, %v3729_v37  ;;  %v3177_v48 = vmax.f32 %v3141_v2, 0.0  ;;  %v3099_v54 = vadd.f32 %v3034_v23, %v2784_v36  ;;  %v2979_v17 = vpop.f32.mrf.mxu0  ;;  %v2672_v39 = vpop.f32.mrf.mxu1  ;;  %v2786_v42 = vadd.f32 %v2717_v41, %v6565_v13 }
 0x3bb   : > { %v3027_v51 = vrot.slane %v2979_v17, 6  ;;  %v2714_v44 = vrot.slane %v2672_v39, 5 }
 0x3bc   : > { %v3730_v9 = vpack.c.bf16 %v3177_v48, %v3177_v48  ;;  %v3142_v24 = vadd.f32 %v6583_v61, %v3099_v54  ;;  %v4701_v46 = vpop.f32.mrf.mxu0  ;;  %v4619_v40 = vpop.f32.mrf.mxu1 }
 0x3bd   : > { %v3033_v16 = vsel %vm3030_vm7, %v3026_v14, %v3027_v51  ;;  %v2716_v6 = vsel %vm2715_vm6, %v2713_v38, %v2714_v44 }
 0x3be   : > { %3358 = vst.msk [vmem:[%s6595_s15 + $0x7c] sm:$0xf] %vm3326_vm8, %v3730_v9  ;;  %v3178_v62 = vmax.f32 %v3142_v24, 0.0  ;;  %v3100_v12 = vadd.f32 %v3033_v16, %v2785_v32  ;;  %v2982_v53 = vpop.f32.mrf.mxu0  ;;  %v2675_v22 = vpop.f32.mrf.mxu1  ;;  %v2787_v13 = vadd.f32 %v2716_v6, %v6569_v1 }
 0x3bf   : > { %v3028_v11 = vrot.slane %v2982_v53, 6 }
 0x3c0   : > { %v3731_v15 = vpack.c.bf16 %v3178_v62, %v3178_v62  ;;  %v3143_v59 = vadd.f32 %v6583_v61, %v3100_v12  ;;  %v4702_v34 = vpop.f32.mrf.mxu0  ;;  %v4620_v56 = vpop.f32.mrf.mxu1 }
 0x3c1   : > { %v3032_v21 = vsel %vm3030_vm7, %v3027_v51, %v3028_v11 }
 0x3c2   : > { %3359 = vst.msk [vmem:[%s6595_s15 + $0x80] sm:$0xf] %vm3326_vm8, %v3731_v15  ;;  %v3179_v31 = vmax.f32 %v3143_v59, 0.0  ;;  %v3101_v19 = vadd.f32 %v3032_v21, %v2786_v42  ;;  %v2987_v50 = vpop.f32.mrf.mxu0 }
 0x3c3   : > { %v3029_v10 = vrot.slane %v2987_v50, 6 }
 0x3c4   : > { %v3732_v43 = vpack.c.bf16 %v3179_v31, %v3179_v31  ;;  %v3144_v47 = vadd.f32 %v6583_v61, %v3101_v19  ;;  %v4705_v52 = vpop.f32.mrf.mxu0 }
 0x3c5   : > { %v3031_v33 = vsel %vm3030_vm7, %v3028_v11, %v3029_v10 }
 0x3c6   : > { %3360 = vst.msk [vmem:[%s6595_s15 + $0x84] sm:$0xf] %vm3326_vm8, %v3732_v43  ;;  %v3180_v8 = vmax.f32 %v3144_v47, 0.0  ;;  %v3102_v7 = vadd.f32 %v3031_v33, %v2787_v13  ;;  %v2990_v35 = vpop.f32.mrf.mxu0 }
 0x3c8   : > { %v3733_v5 = vpack.c.bf16 %v3180_v8, %v3180_v8  ;;  %v3145_v27 = vadd.f32 %v6583_v61, %v3102_v7  ;;  %v4706_v3 = vpop.f32.mrf.mxu0 }
 0x3ca   : > { %3361 = vst.msk [vmem:[%s6595_s15 + $0x88] sm:$0xf] %vm3326_vm8, %v3733_v5  ;;  %v3181_v0 = vmax.f32 %v3145_v27, 0.0 }
 0x3cc   : > { %v3734_v1 = vpack.c.bf16 %v3181_v0, %v3181_v0 }
 0x3ce   : > { %3362 = vst.msk [vmem:[%s6595_s15 + $0x8c] sm:$0xf] %vm3326_vm8, %v3734_v1 }
 0x3cf PF: > { %s13_s12 = sadd.s32 1, %s4784_s12  }
 0x3d0   : > { %p10_p4 = scmp.ge.s32.totalorder %s13_s12, 4  }
 0x3d2   :  { %12 = sbr.rel (!%p10_p4) target bundleno = 1 (0x1), region = 70 }

</bundles_post_ra>
